<compile_context>
chip_gen: v7x
topology: tpu7x:2x2x1
jax: 0.10.0
libtpu: 0.0.40
codegen_flags: <defaults>
</compile_context>

<pallas_src>
import functools

import numpy as np
import jax
import jax.numpy as jnp
from jax import lax
from jax.experimental import pallas as pl
from jax.experimental.pallas import tpu as pltpu


# --------------------------------------------------------------------------
# Helpers
# --------------------------------------------------------------------------
def _rup(x, m):
    return ((x + m - 1) // m) * m


def _same_pad(in_size, k, stride, dilation=1):
    """TF 'same' padding, identical to SamePadConv2d.get_pad_odd logic."""
    eff = (k - 1) * dilation + 1
    out = (in_size + stride - 1) // stride
    pad = max(0, (out - 1) * stride + eff - in_size)
    return pad // 2, pad - pad // 2          # (front, back) -- extra pad at back


def _fold_bn(bn, eps=1e-3):
    gamma, beta, mean, var = bn
    scale = gamma / jnp.sqrt(var + eps)
    return scale, beta - mean * scale


def _tile_bytes(shape, dtype):
    """Physical VMEM bytes of an array, accounting for (8,128) tile padding."""
    itemsize = jnp.dtype(dtype).itemsize
    sublane = 8 * max(1, 4 // itemsize)      # f32: 8, bf16: 16, int8: 32
    if len(shape) == 0:
        return 8 * 128 * 4
    if len(shape) == 1:
        return _rup(int(shape[0]), 128) * sublane * itemsize
    lead = 1
    for d in shape[:-2]:
        lead *= int(d)
    return lead * _rup(int(shape[-2]), sublane) * _rup(int(shape[-1]), 128) * itemsize


def _const_spec(arr, single_buffer):
    """Whole-array, revisited-every-step spec; single-buffered when possible."""
    zeros = (0,) * arr.ndim
    imap = lambda n, _z=zeros: _z
    if single_buffer and hasattr(pl, "Buffered"):
        try:
            return pl.BlockSpec(arr.shape, imap, pipeline_mode=pl.Buffered(1))
        except TypeError:                    # pipeline_mode kwarg not available
            pass
    return pl.BlockSpec(arr.shape, imap)


# --------------------------------------------------------------------------
# Fused MBConv kernel (one batch element per grid step, channel-major).
# --------------------------------------------------------------------------
def _make_mbconv_kernel(*, cin, mid, cout, k, stride, Wc, Lg, Lacc, res_base,
                        has_expand, has_se, has_skip, inv_hw, compute_dtype):
    def kernel(*refs):
        it = iter(refs)
        x_ref = next(it)
        if has_expand:
            w_exp_ref, s1_ref, b1_ref, vmask_ref = (next(it), next(it),
                                                    next(it), next(it))
        w_dw_ref, s2_ref, b2_ref = next(it), next(it), next(it)
        if has_se:
            ov_ref, w_se1_ref, b_se1_ref, w_se2_ref, b_se2_ref = (
                next(it), next(it), next(it), next(it), next(it))
        w_p_ref, s3_ref, b3_ref = next(it), next(it), next(it)
        o_ref = next(it)
        ep_ref = next(it) if has_expand else None

        # ---- expand 1x1 + folded BN + Swish; result lives only in VMEM ----
        if has_expand:
            xv = x_ref[0]                               # (cin, s*Lg)
            if compute_dtype != jnp.float32:
                xv = xv.astype(compute_dtype)
            e = lax.dot_general(w_exp_ref[...], xv, (((1,), (0,)), ((), ())),
                                preferred_element_type=jnp.float32)
            e = e * s1_ref[...] + b1_ref[...]           # (mid,1) scale/bias
            e = e * jax.nn.sigmoid(e)                   # Swish (f32 VPU/EUP)
            e = e * vmask_ref[...]                      # re-zero TF 'same' pads
            ep_ref[...] = e                             # -> scratch; e is dead

            def tap(off):                               # contiguous lane slice
                return ep_ref[:, off:off + Lacc]
        else:
            def tap(off):                               # read taps from x itself
                return x_ref[0, :, off:off + Lacc]

        # ---- depthwise KxK: contiguous windows + per-channel FMAs ----
        acc = None
        for i in range(k):
            for j in range(k):
                off = (j % stride) * Lg + i * Wc + j // stride
                t = i * k + j
                contrib = tap(off) * w_dw_ref[:, t:t + 1]
                acc = contrib if acc is None else acc + contrib
        dw = acc * s2_ref[...] + b2_ref[...]
        dw = dw * jax.nn.sigmoid(dw)                    # Swish

        # ---- SE on VPU/XLU (no M=1 MXU matmuls) ----
        if has_se:
            pooled = jnp.sum(dw * ov_ref[...], axis=1, keepdims=True) * inv_hw
            h1 = jnp.sum(pooled * w_se1_ref[...], axis=0, keepdims=True) \
                + b_se1_ref[...]                        # (1, se_ch)
            h1 = h1 * jax.nn.sigmoid(h1)                # Swish
            gate = jnp.sum(w_se2_ref[...] * h1, axis=1, keepdims=True) \
                + b_se2_ref[...]                        # (mid, 1)
            dw = dw * jax.nn.sigmoid(gate)

        # ---- project 1x1 + folded BN (+ residual), lane-dense store ----
        dwc = dw.astype(compute_dtype) if compute_dtype != jnp.float32 else dw
        y = lax.dot_general(w_p_ref[...], dwc, (((1,), (0,)), ((), ())),
                            preferred_element_type=jnp.float32)   # (cout, Lacc)
        y = y * s3_ref[...] + b3_ref[...]
        if has_skip:
            # Residual straight from the same input ref (no duplicate DMA).
            y = y + x_ref[0, :, res_base:res_base + Lacc]
        o_ref[0] = y.astype(o_ref.dtype)

    return kernel


# --------------------------------------------------------------------------
# Forward wrapper (NCHW in / NCHW out, like the PyTorch module).
# --------------------------------------------------------------------------
def mbconv_forward(params, x_nchw, *, kernel_size, stride, skip, se_ratio,
                   expand, compute_dtype=jnp.bfloat16, single_buffer_consts=True):
    x_nchw = x_nchw.astype(jnp.float32)
    N, cin, H, W = x_nchw.shape
    k, s = kernel_size, stride
    has_expand = expand != 1
    has_se = se_ratio > 0
    mid = params["w_expand"].shape[1] if has_expand else cin
    cout = params["w_proj"].shape[1]
    has_skip = bool(skip) and s == 1 and cin == cout

    Ho, Wo = -(-H // s), -(-W // s)
    pt, pb = _same_pad(H, k, s)
    pL, pR = _same_pad(W, k, s)
    Hp = H + pt + pb
    Wp = _rup(W + pL + pR, s)           # padded width, forced divisible by stride
    Wc = Wp // s                        # columns per column-parity group
    Lg = Hp * Wc + Wp                   # per-group length incl. read slack
    Lx = s * Lg                         # prep width (all groups)
    Lacc = Ho * Wp                      # accumulator / output row pitch = Wp
    res_base = pt * Wp + pL             # residual offset inside the prep layout

    # ---- prep input in XLA: pad, column-deinterleave by stride, flatten ----
    xp = jnp.pad(x_nchw, ((0, 0), (0, 0), (pt, pb), (pL, Wp - W - pL)))
    parts = []
    for g in range(s):
        xg = xp[:, :, :, g::s].reshape(N, cin, Hp * Wc)
        parts.append(jnp.pad(xg, ((0, 0), (0, 0), (0, Wp))))
    x_prep = parts[0] if s == 1 else jnp.concatenate(parts, axis=-1)

    inputs = [x_prep]
    in_specs = [pl.BlockSpec((1, cin, Lx), lambda n: (n, 0, 0))]

    def add_const(arr, dtype=jnp.float32):
        arr = jnp.asarray(arr, dtype)
        inputs.append(arr)
        in_specs.append(_const_spec(arr, single_buffer_consts))

    if has_expand:
        s1, b1 = _fold_bn(params["bn1"])
        add_const(jnp.asarray(params["w_expand"]).T, compute_dtype)   # (mid, cin)
        add_const(s1.reshape(-1, 1)); add_const(b1.reshape(-1, 1))
        vm = np.zeros((Hp, Wp), np.float32)
        vm[pt:pt + H, pL:pL + W] = 1.0
        vmask = np.concatenate(
            [np.concatenate([vm[:, g::s].reshape(-1), np.zeros(Wp, np.float32)])
             for g in range(s)])[None, :]                             # (1, Lx)
        add_const(vmask)
    s2, b2 = _fold_bn(params["bn2"])
    add_const(jnp.asarray(params["w_dw"]).T)                          # (mid, k*k)
    add_const(s2.reshape(-1, 1)); add_const(b2.reshape(-1, 1))
    if has_se:
        ov = np.zeros((Ho, Wp), np.float32)
        ov[:, :Wo] = 1.0
        add_const(ov.reshape(1, -1))                                  # (1, Lacc)
        add_const(params["w_se1"])                                    # (mid, se)
        add_const(params["b_se1"].reshape(1, -1))                     # (1, se)
        add_const(jnp.asarray(params["w_se2"]).T)                     # (mid, se)
        add_const(params["b_se2"].reshape(-1, 1))                     # (mid, 1)
    s3, b3 = _fold_bn(params["bn3"])
    add_const(jnp.asarray(params["w_proj"]).T, compute_dtype)         # (cout, mid)
    add_const(s3.reshape(-1, 1)); add_const(b3.reshape(-1, 1))        # (cout, 1)

    kernel = _make_mbconv_kernel(
        cin=cin, mid=mid, cout=cout, k=k, stride=s, Wc=Wc, Lg=Lg, Lacc=Lacc,
        res_base=res_base, has_expand=has_expand, has_se=has_se,
        has_skip=has_skip, inv_hw=1.0 / float(Ho * Wo), compute_dtype=compute_dtype)

    # ---- (8,128)-aware VMEM budget with generation-aware cap + headroom ----
    f32 = jnp.float32
    need = 2 * _tile_bytes((1, cin, Lx), f32) + 2 * _tile_bytes((1, cout, Lacc), f32)
    cbuf = 1 if single_buffer_consts else 2
    need += cbuf * sum(_tile_bytes(a.shape, a.dtype) for a in inputs[1:])
    if has_expand:
        need += 2 * _tile_bytes((mid, Lx), f32)     # scratch + live expand value
    need += 3 * _tile_bytes((mid, Lacc), f32)       # acc / tap window / dw
    need += _tile_bytes((cout, Lacc), f32)          # projection result
    try:
        cap_total = int(pltpu.get_tpu_info().vmem_capacity_bytes)
    except Exception:
        cap_total = 64 * 2 ** 20                    # conservative (v7x-sized)
    cap = max(32 * 2 ** 20, cap_total - 16 * 2 ** 20)   # always leave headroom
    vmem_limit = int(min(max(int(need * 1.25) + (2 << 20), 32 * 2 ** 20), cap))

    # ---- advisory cost estimate for the XLA scheduler ----
    flops = 2 * N * ((mid * cin * Lx if has_expand else 0)
                     + k * k * mid * Lacc + mid * cout * Lacc)
    if has_se:
        flops += 4 * N * mid * int(params["w_se1"].shape[1])
    transcend = N * ((mid * Lx if has_expand else 0) + 2 * mid * Lacc + 2 * mid)
    bytes_acc = int(sum(int(np.prod(a.shape)) * jnp.dtype(a.dtype).itemsize
                        for a in inputs) + N * cout * Lacc * 4)

    y = pl.pallas_call(
        kernel,
        out_shape=jax.ShapeDtypeStruct((N, cout, Lacc), jnp.float32),
        grid=(N,),
        in_specs=in_specs,
        out_specs=pl.BlockSpec((1, cout, Lacc), lambda n: (n, 0, 0)),
        scratch_shapes=([pltpu.VMEM((mid, Lx), jnp.float32)] if has_expand else []),
        compiler_params=pltpu.CompilerParams(
            dimension_semantics=("parallel",),
            vmem_limit_bytes=vmem_limit),
        cost_estimate=pl.CostEstimate(flops=int(flops),
                                      transcendentals=int(transcend),
                                      bytes_accessed=int(bytes_acc)),
    )(*inputs)

    # Channel-major (N, Cout, Ho*Wp) -> NCHW: drop the Wp-Wo pad columns.
    return y.reshape(N, cout, Ho, Wp)[:, :, :, :Wo]


# --------------------------------------------------------------------------
# Parameter init (deterministic, synthetic).
# --------------------------------------------------------------------------
def init_mbconv_params(key, in_, out_, expand, kernel_size, se_ratio):
    mid = in_ * expand
    se_ch = int(in_ * se_ratio)
    ks = jax.random.split(key, 10)

    def normal(k, shape, sd=0.1):
        return sd * jax.random.normal(k, shape, jnp.float32)

    def bn_params(k, c):
        k1, k2, k3, k4 = jax.random.split(k, 4)
        gamma = 1.0 + normal(k1, (c,))
        beta = normal(k2, (c,))
        mean = normal(k3, (c,))
        var = 0.5 + jnp.abs(normal(k4, (c,), 1.0))
        return (gamma, beta, mean, var)

    p = {}
    if expand != 1:
        p["w_expand"] = normal(ks[0], (in_, mid))                    # (Cin, Cmid)
        p["bn1"] = bn_params(ks[1], mid)
    p["w_dw"] = normal(ks[2], (kernel_size * kernel_size, mid))      # (k*k, Cmid)
    p["bn2"] = bn_params(ks[3], mid)
    if se_ratio > 0:
        p["w_se1"] = normal(ks[4], (mid, se_ch))
        p["b_se1"] = normal(ks[5], (se_ch,))
        p["w_se2"] = normal(ks[6], (se_ch, mid))
        p["b_se2"] = normal(ks[7], (mid,))
    p["w_proj"] = normal(ks[8], (mid, out_))
    p["bn3"] = bn_params(ks[9], out_)
    return p


# --------------------------------------------------------------------------
# Pure-JAX reference (NCHW, lax convs) for correctness checking.
# --------------------------------------------------------------------------
def mbconv_reference(params, x_nchw, *, kernel_size, stride, skip, se_ratio, expand):
    eps = 1e-3

    def bn(x, gbmv):
        g, b, m, v = gbmv
        rs = lambda a: a.reshape(1, -1, 1, 1)
        return (x - rs(m)) * (rs(g) / jnp.sqrt(rs(v) + eps)) + rs(b)

    def swish(x):
        return x * jax.nn.sigmoid(x)

    def same_conv(x, w_oihw, s, groups):
        kh, kw = w_oihw.shape[2], w_oihw.shape[3]
        pt, pb = _same_pad(x.shape[2], kh, s)
        pL, pR = _same_pad(x.shape[3], kw, s)
        return lax.conv_general_dilated(
            x, w_oihw, (s, s), ((pt, pb), (pL, pR)),
            dimension_numbers=("NCHW", "OIHW", "NCHW"),
            feature_group_count=groups, precision=lax.Precision.HIGHEST)

    x = x_nchw.astype(jnp.float32)
    cin = x.shape[1]
    if expand != 1:
        mid = params["w_expand"].shape[1]
        w = params["w_expand"].T.reshape(mid, cin, 1, 1)
        h_ = swish(bn(same_conv(x, w, 1, 1), params["bn1"]))
    else:
        h_ = x
    mid = h_.shape[1]
    k = kernel_size
    wdw = params["w_dw"].T.reshape(mid, 1, k, k)
    d = swish(bn(same_conv(h_, wdw, stride, mid), params["bn2"]))
    if se_ratio > 0:
        se_ch = params["w_se1"].shape[1]
        pooled = jnp.mean(d, axis=(2, 3), keepdims=True)
        w1 = params["w_se1"].T.reshape(se_ch, mid, 1, 1)
        w2 = params["w_se2"].T.reshape(mid, se_ch, 1, 1)
        s1 = swish(same_conv(pooled, w1, 1, 1) + params["b_se1"].reshape(1, -1, 1, 1))
        s2 = same_conv(s1, w2, 1, 1) + params["b_se2"].reshape(1, -1, 1, 1)
        d = d * jax.nn.sigmoid(s2)
    cout = params["w_proj"].shape[1]
    wpj = params["w_proj"].T.reshape(cout, mid, 1, 1)
    y = bn(same_conv(d, wpj, 1, 1), params["bn3"])
    if skip and stride == 1 and cin == cout:
        y = y + x
    return y


if __name__ == "__main__":
    # MBConv(in_=8, out_=8, expand=4, kernel_size=3, stride=..., skip=True, se_ratio=0.25)
    in_, out_, expand, k = 8, 8, 4, 3
    se_ratio = 0.25
    N, H, W = 2, 16, 16

    key = jax.random.PRNGKey(0)
    kx, kp = jax.random.split(key)
    x = jax.random.normal(kx, (N, in_, H, W), jnp.float32)        # NCHW like PyTorch
    params = init_mbconv_params(kp, in_, out_, expand, k, se_ratio)

    def run(stride, cd, sbc):
        fwd = functools.partial(mbconv_forward, kernel_size=k, stride=stride,
                                skip=True, se_ratio=se_ratio, expand=expand,
                                compute_dtype=cd, single_buffer_consts=sbc)
        return jax.block_until_ready(jax.jit(fwd)(params, x))

    def run_with_fallback(stride, cd):
        try:
            return run(stride, cd, True)
        except Exception:
            # Fall back to default (double-buffered) constant specs if the
            # single-buffer pipeline mode is rejected by this JAX/Mosaic build.
            return run(stride, cd, False)

    # stride=1 with residual, f32 MXU operands: tight check.
    y_ref1 = mbconv_reference(params, x, kernel_size=k, stride=1, skip=True,
                              se_ratio=se_ratio, expand=expand)
    y1 = run_with_fallback(1, jnp.float32)
    assert y1.shape == (N, out_, H, W)
    np.testing.assert_allclose(np.asarray(y1), np.asarray(y_ref1), rtol=2e-3, atol=2e-3)

    # bf16 MXU operands (valid on v5e/v6e/v7x; elementwise stays f32): loose check.
    y1b = run_with_fallback(1, jnp.bfloat16)
    np.testing.assert_allclose(np.asarray(y1b), np.asarray(y_ref1), rtol=5e-2, atol=5e-2)

    # stride=2 (column-deinterleaved depthwise path, skip auto-disabled), f32.
    y_ref2 = mbconv_reference(params, x, kernel_size=k, stride=2, skip=True,
                              se_ratio=se_ratio, expand=expand)
    y2 = run_with_fallback(2, jnp.float32)
    assert y2.shape == (N, out_, (H + 1) // 2, (W + 1) // 2)
    np.testing.assert_allclose(np.asarray(y2), np.asarray(y_ref2), rtol=2e-3, atol=2e-3)

    print("KERNEL_OK")
</pallas_src>

<mosaic_0001>
module attributes {stable_mosaic.version = 11 : i64} {
  func.func @kernel(%arg0: i32, %arg1: memref<1x8x342xf32, #tpu.memory_space<vmem>>, %arg2: memref<32x8xf32, #tpu.memory_space<vmem>>, %arg3: memref<32x1xf32, #tpu.memory_space<vmem>>, %arg4: memref<32x1xf32, #tpu.memory_space<vmem>>, %arg5: memref<1x342xf32, #tpu.memory_space<vmem>>, %arg6: memref<32x9xf32, #tpu.memory_space<vmem>>, %arg7: memref<32x1xf32, #tpu.memory_space<vmem>>, %arg8: memref<32x1xf32, #tpu.memory_space<vmem>>, %arg9: memref<1x288xf32, #tpu.memory_space<vmem>>, %arg10: memref<32x2xf32, #tpu.memory_space<vmem>>, %arg11: memref<1x2xf32, #tpu.memory_space<vmem>>, %arg12: memref<32x2xf32, #tpu.memory_space<vmem>>, %arg13: memref<32x1xf32, #tpu.memory_space<vmem>>, %arg14: memref<8x32xf32, #tpu.memory_space<vmem>>, %arg15: memref<8x1xf32, #tpu.memory_space<vmem>>, %arg16: memref<8x1xf32, #tpu.memory_space<vmem>>, %arg17: memref<1x8x288xf32, #tpu.memory_space<vmem>>, %arg18: memref<32x342xf32, #tpu.memory_space<vmem>>) attributes {dimension_semantics = [#tpu.dimension_semantics<parallel>], iteration_bounds = array<i64: 2>, scalar_prefetch = 0 : i64, scratch_operands = 1 : i64, tpu.core_type = #tpu.core_type<tc>, window_params = [{transform_indices = @transform_0, window_bounds = array<i64: 1, 8, 342>}, {pipeline_mode = #tpu.pipeline_mode<synchronous>, transform_indices = @transform_1, window_bounds = array<i64: 32, 8>}, {pipeline_mode = #tpu.pipeline_mode<synchronous>, transform_indices = @transform_2, window_bounds = array<i64: 32, 1>}, {pipeline_mode = #tpu.pipeline_mode<synchronous>, transform_indices = @transform_3, window_bounds = array<i64: 32, 1>}, {pipeline_mode = #tpu.pipeline_mode<synchronous>, transform_indices = @transform_4, window_bounds = array<i64: 1, 342>}, {pipeline_mode = #tpu.pipeline_mode<synchronous>, transform_indices = @transform_5, window_bounds = array<i64: 32, 9>}, {pipeline_mode = #tpu.pipeline_mode<synchronous>, transform_indices = @transform_6, window_bounds = array<i64: 32, 1>}, {pipeline_mode = #tpu.pipeline_mode<synchronous>, transform_indices = @transform_7, window_bounds = array<i64: 32, 1>}, {pipeline_mode = #tpu.pipeline_mode<synchronous>, transform_indices = @transform_8, window_bounds = array<i64: 1, 288>}, {pipeline_mode = #tpu.pipeline_mode<synchronous>, transform_indices = @transform_9, window_bounds = array<i64: 32, 2>}, {pipeline_mode = #tpu.pipeline_mode<synchronous>, transform_indices = @transform_10, window_bounds = array<i64: 1, 2>}, {pipeline_mode = #tpu.pipeline_mode<synchronous>, transform_indices = @transform_11, window_bounds = array<i64: 32, 2>}, {pipeline_mode = #tpu.pipeline_mode<synchronous>, transform_indices = @transform_12, window_bounds = array<i64: 32, 1>}, {pipeline_mode = #tpu.pipeline_mode<synchronous>, transform_indices = @transform_13, window_bounds = array<i64: 8, 32>}, {pipeline_mode = #tpu.pipeline_mode<synchronous>, transform_indices = @transform_14, window_bounds = array<i64: 8, 1>}, {pipeline_mode = #tpu.pipeline_mode<synchronous>, transform_indices = @transform_15, window_bounds = array<i64: 8, 1>}, {transform_indices = @transform_16, window_bounds = array<i64: 1, 8, 288>}]} {
    %c0 = arith.constant 0 : index
    %c0_0 = arith.constant 0 : index
    %c0_1 = arith.constant 0 : index
    %0 = vector.load %arg1[%c0, %c0_0, %c0_1] : memref<1x8x342xf32, #tpu.memory_space<vmem>>, vector<1x8x342xf32>
    %1 = vector.shape_cast %0 : vector<1x8x342xf32> to vector<8x342xf32>
    %c0_2 = arith.constant 0 : index
    %c0_3 = arith.constant 0 : index
    %2 = vector.load %arg2[%c0_2, %c0_3] : memref<32x8xf32, #tpu.memory_space<vmem>>, vector<32x8xf32>
    %cst = arith.constant dense<0.000000e+00> : vector<32x342xf32>
    %3 = tpu.matmul %2, %1, %cst {dimension_numbers = #tpu.dot_dimension_numbers<[1], [0], [0], [1], [0, 0, 1, 1], [], []>} : vector<32x8xf32>, vector<8x342xf32>, vector<32x342xf32> -> vector<32x342xf32>
    %c0_4 = arith.constant 0 : index
    %c0_5 = arith.constant 0 : index
    %4 = vector.load %arg3[%c0_4, %c0_5] : memref<32x1xf32, #tpu.memory_space<vmem>>, vector<32x1xf32>
    %5 = vector.broadcast %4 : vector<32x1xf32> to vector<32x342xf32>
    %6 = arith.mulf %3, %5 : vector<32x342xf32>
    %c0_6 = arith.constant 0 : index
    %c0_7 = arith.constant 0 : index
    %7 = vector.load %arg4[%c0_6, %c0_7] : memref<32x1xf32, #tpu.memory_space<vmem>>, vector<32x1xf32>
    %8 = vector.broadcast %7 : vector<32x1xf32> to vector<32x342xf32>
    %9 = arith.addf %6, %8 : vector<32x342xf32>
    %10 = arith.negf %9 : vector<32x342xf32>
    %11 = math.exp %10 : vector<32x342xf32>
    %cst_8 = arith.constant 1.000000e+00 : f32
    %12 = vector.broadcast %cst_8 : f32 to vector<32x342xf32>
    %13 = arith.addf %12, %11 : vector<32x342xf32>
    %14 = arith.divf %12, %13 : vector<32x342xf32>
    %15 = arith.mulf %9, %14 : vector<32x342xf32>
    %c0_9 = arith.constant 0 : index
    %c0_10 = arith.constant 0 : index
    %16 = vector.load %arg5[%c0_9, %c0_10] : memref<1x342xf32, #tpu.memory_space<vmem>>, vector<1x342xf32>
    %17 = vector.broadcast %16 : vector<1x342xf32> to vector<32x342xf32>
    %18 = arith.mulf %15, %17 : vector<32x342xf32>
    %c0_11 = arith.constant 0 : index
    %c0_12 = arith.constant 0 : index
    %19 = vector.load %arg18[%c0_11, %c0_12] : memref<32x342xf32, #tpu.memory_space<vmem>>, vector<32x342xf32>
    tpu.vector_store %arg18[%c0_11, %c0_12], %18 {strides = array<i32>} : memref<32x342xf32, #tpu.memory_space<vmem>>, vector<32x342xf32>,
    %c0_13 = arith.constant 0 : index
    %c0_14 = arith.constant 0 : index
    %20 = vector.load %arg18[%c0_13, %c0_14] : memref<32x342xf32, #tpu.memory_space<vmem>>, vector<32x288xf32>
    %c0_15 = arith.constant 0 : index
    %c0_16 = arith.constant 0 : index
    %21 = vector.load %arg6[%c0_15, %c0_16] : memref<32x9xf32, #tpu.memory_space<vmem>>, vector<32x1xf32>
    %22 = vector.broadcast %21 : vector<32x1xf32> to vector<32x288xf32>
    %23 = arith.mulf %20, %22 : vector<32x288xf32>
    %c0_17 = arith.constant 0 : index
    %c1 = arith.constant 1 : index
    %24 = vector.load %arg18[%c0_17, %c1] : memref<32x342xf32, #tpu.memory_space<vmem>>, vector<32x288xf32>
    %c0_18 = arith.constant 0 : index
    %c1_19 = arith.constant 1 : index
    %25 = vector.load %arg6[%c0_18, %c1_19] : memref<32x9xf32, #tpu.memory_space<vmem>>, vector<32x1xf32>
    %26 = vector.broadcast %25 : vector<32x1xf32> to vector<32x288xf32>
    %27 = arith.mulf %24, %26 : vector<32x288xf32>
    %28 = arith.addf %23, %27 : vector<32x288xf32>
    %c0_20 = arith.constant 0 : index
    %c2 = arith.constant 2 : index
    %29 = vector.load %arg18[%c0_20, %c2] : memref<32x342xf32, #tpu.memory_space<vmem>>, vector<32x288xf32>
    %c0_21 = arith.constant 0 : index
    %c2_22 = arith.constant 2 : index
    %30 = vector.load %arg6[%c0_21, %c2_22] : memref<32x9xf32, #tpu.memory_space<vmem>>, vector<32x1xf32>
    %31 = vector.broadcast %30 : vector<32x1xf32> to vector<32x288xf32>
    %32 = arith.mulf %29, %31 : vector<32x288xf32>
    %33 = arith.addf %28, %32 : vector<32x288xf32>
    %c0_23 = arith.constant 0 : index
    %c18 = arith.constant 18 : index
    %34 = vector.load %arg18[%c0_23, %c18] : memref<32x342xf32, #tpu.memory_space<vmem>>, vector<32x288xf32>
    %c0_24 = arith.constant 0 : index
    %c3 = arith.constant 3 : index
    %35 = vector.load %arg6[%c0_24, %c3] : memref<32x9xf32, #tpu.memory_space<vmem>>, vector<32x1xf32>
    %36 = vector.broadcast %35 : vector<32x1xf32> to vector<32x288xf32>
    %37 = arith.mulf %34, %36 : vector<32x288xf32>
    %38 = arith.addf %33, %37 : vector<32x288xf32>
    %c0_25 = arith.constant 0 : index
    %c19 = arith.constant 19 : index
    %39 = vector.load %arg18[%c0_25, %c19] : memref<32x342xf32, #tpu.memory_space<vmem>>, vector<32x288xf32>
    %c0_26 = arith.constant 0 : index
    %c4 = arith.constant 4 : index
    %40 = vector.load %arg6[%c0_26, %c4] : memref<32x9xf32, #tpu.memory_space<vmem>>, vector<32x1xf32>
    %41 = vector.broadcast %40 : vector<32x1xf32> to vector<32x288xf32>
    %42 = arith.mulf %39, %41 : vector<32x288xf32>
    %43 = arith.addf %38, %42 : vector<32x288xf32>
    %c0_27 = arith.constant 0 : index
    %c20 = arith.constant 20 : index
    %44 = vector.load %arg18[%c0_27, %c20] : memref<32x342xf32, #tpu.memory_space<vmem>>, vector<32x288xf32>
    %c0_28 = arith.constant 0 : index
    %c5 = arith.constant 5 : index
    %45 = vector.load %arg6[%c0_28, %c5] : memref<32x9xf32, #tpu.memory_space<vmem>>, vector<32x1xf32>
    %46 = vector.broadcast %45 : vector<32x1xf32> to vector<32x288xf32>
    %47 = arith.mulf %44, %46 : vector<32x288xf32>
    %48 = arith.addf %43, %47 : vector<32x288xf32>
    %c0_29 = arith.constant 0 : index
    %c36 = arith.constant 36 : index
    %49 = vector.load %arg18[%c0_29, %c36] : memref<32x342xf32, #tpu.memory_space<vmem>>, vector<32x288xf32>
    %c0_30 = arith.constant 0 : index
    %c6 = arith.constant 6 : index
    %50 = vector.load %arg6[%c0_30, %c6] : memref<32x9xf32, #tpu.memory_space<vmem>>, vector<32x1xf32>
    %51 = vector.broadcast %50 : vector<32x1xf32> to vector<32x288xf32>
    %52 = arith.mulf %49, %51 : vector<32x288xf32>
    %53 = arith.addf %48, %52 : vector<32x288xf32>
    %c0_31 = arith.constant 0 : index
    %c37 = arith.constant 37 : index
    %54 = vector.load %arg18[%c0_31, %c37] : memref<32x342xf32, #tpu.memory_space<vmem>>, vector<32x288xf32>
    %c0_32 = arith.constant 0 : index
    %c7 = arith.constant 7 : index
    %55 = vector.load %arg6[%c0_32, %c7] : memref<32x9xf32, #tpu.memory_space<vmem>>, vector<32x1xf32>
    %56 = vector.broadcast %55 : vector<32x1xf32> to vector<32x288xf32>
    %57 = arith.mulf %54, %56 : vector<32x288xf32>
    %58 = arith.addf %53, %57 : vector<32x288xf32>
    %c0_33 = arith.constant 0 : index
    %c38 = arith.constant 38 : index
    %59 = vector.load %arg18[%c0_33, %c38] : memref<32x342xf32, #tpu.memory_space<vmem>>, vector<32x288xf32>
    %c0_34 = arith.constant 0 : index
    %c8 = arith.constant 8 : index
    %60 = vector.load %arg6[%c0_34, %c8] : memref<32x9xf32, #tpu.memory_space<vmem>>, vector<32x1xf32>
    %61 = vector.broadcast %60 : vector<32x1xf32> to vector<32x288xf32>
    %62 = arith.mulf %59, %61 : vector<32x288xf32>
    %63 = arith.addf %58, %62 : vector<32x288xf32>
    %c0_35 = arith.constant 0 : index
    %c0_36 = arith.constant 0 : index
    %64 = vector.load %arg7[%c0_35, %c0_36] : memref<32x1xf32, #tpu.memory_space<vmem>>, vector<32x1xf32>
    %65 = vector.broadcast %64 : vector<32x1xf32> to vector<32x288xf32>
    %66 = arith.mulf %63, %65 : vector<32x288xf32>
    %c0_37 = arith.constant 0 : index
    %c0_38 = arith.constant 0 : index
    %67 = vector.load %arg8[%c0_37, %c0_38] : memref<32x1xf32, #tpu.memory_space<vmem>>, vector<32x1xf32>
    %68 = vector.broadcast %67 : vector<32x1xf32> to vector<32x288xf32>
    %69 = arith.addf %66, %68 : vector<32x288xf32>
    %70 = arith.negf %69 : vector<32x288xf32>
    %71 = math.exp %70 : vector<32x288xf32>
    %cst_39 = arith.constant 1.000000e+00 : f32
    %72 = vector.broadcast %cst_39 : f32 to vector<32x288xf32>
    %73 = arith.addf %72, %71 : vector<32x288xf32>
    %74 = arith.divf %72, %73 : vector<32x288xf32>
    %75 = arith.mulf %69, %74 : vector<32x288xf32>
    %c0_40 = arith.constant 0 : index
    %c0_41 = arith.constant 0 : index
    %76 = vector.load %arg9[%c0_40, %c0_41] : memref<1x288xf32, #tpu.memory_space<vmem>>, vector<1x288xf32>
    %77 = vector.broadcast %76 : vector<1x288xf32> to vector<32x288xf32>
    %78 = arith.mulf %75, %77 : vector<32x288xf32>
    %cst_42 = arith.constant dense<0.000000e+00> : vector<32xf32>
    %79 = vector.multi_reduction <add>, %78, %cst_42 [1] : vector<32x288xf32> to vector<32xf32>
    %80 = vector.shape_cast %79 : vector<32xf32> to vector<32x1xf32>
    %cst_43 = arith.constant 3.906250e-03 : f32
    %81 = vector.broadcast %cst_43 : f32 to vector<32x1xf32>
    %82 = arith.mulf %80, %81 : vector<32x1xf32>
    %c0_44 = arith.constant 0 : index
    %c0_45 = arith.constant 0 : index
    %83 = vector.load %arg10[%c0_44, %c0_45] : memref<32x2xf32, #tpu.memory_space<vmem>>, vector<32x2xf32>
    %84 = vector.broadcast %82 : vector<32x1xf32> to vector<32x2xf32>
    %85 = arith.mulf %84, %83 : vector<32x2xf32>
    %cst_46 = arith.constant dense<0.000000e+00> : vector<2xf32>
    %86 = vector.multi_reduction <add>, %85, %cst_46 [0] : vector<32x2xf32> to vector<2xf32>
    %87 = vector.shape_cast %86 : vector<2xf32> to vector<1x2xf32>
    %c0_47 = arith.constant 0 : index
    %c0_48 = arith.constant 0 : index
    %88 = vector.load %arg11[%c0_47, %c0_48] : memref<1x2xf32, #tpu.memory_space<vmem>>, vector<1x2xf32>
    %89 = arith.addf %87, %88 : vector<1x2xf32>
    %90 = arith.negf %89 : vector<1x2xf32>
    %91 = math.exp %90 : vector<1x2xf32>
    %cst_49 = arith.constant 1.000000e+00 : f32
    %92 = vector.broadcast %cst_49 : f32 to vector<1x2xf32>
    %93 = arith.addf %92, %91 : vector<1x2xf32>
    %94 = arith.divf %92, %93 : vector<1x2xf32>
    %95 = arith.mulf %89, %94 : vector<1x2xf32>
    %c0_50 = arith.constant 0 : index
    %c0_51 = arith.constant 0 : index
    %96 = vector.load %arg12[%c0_50, %c0_51] : memref<32x2xf32, #tpu.memory_space<vmem>>, vector<32x2xf32>
    %97 = vector.broadcast %95 : vector<1x2xf32> to vector<32x2xf32>
    %98 = arith.mulf %96, %97 : vector<32x2xf32>
    %cst_52 = arith.constant dense<0.000000e+00> : vector<32xf32>
    %99 = vector.multi_reduction <add>, %98, %cst_52 [1] : vector<32x2xf32> to vector<32xf32>
    %100 = vector.shape_cast %99 : vector<32xf32> to vector<32x1xf32>
    %c0_53 = arith.constant 0 : index
    %c0_54 = arith.constant 0 : index
    %101 = vector.load %arg13[%c0_53, %c0_54] : memref<32x1xf32, #tpu.memory_space<vmem>>, vector<32x1xf32>
    %102 = arith.addf %100, %101 : vector<32x1xf32>
    %103 = arith.negf %102 : vector<32x1xf32>
    %104 = math.exp %103 : vector<32x1xf32>
    %cst_55 = arith.constant 1.000000e+00 : f32
    %105 = vector.broadcast %cst_55 : f32 to vector<32x1xf32>
    %106 = arith.addf %105, %104 : vector<32x1xf32>
    %107 = arith.divf %105, %106 : vector<32x1xf32>
    %108 = vector.broadcast %107 : vector<32x1xf32> to vector<32x288xf32>
    %109 = arith.mulf %75, %108 : vector<32x288xf32>
    %c0_56 = arith.constant 0 : index
    %c0_57 = arith.constant 0 : index
    %110 = vector.load %arg14[%c0_56, %c0_57] : memref<8x32xf32, #tpu.memory_space<vmem>>, vector<8x32xf32>
    %cst_58 = arith.constant dense<0.000000e+00> : vector<8x288xf32>
    %111 = tpu.matmul %110, %109, %cst_58 {dimension_numbers = #tpu.dot_dimension_numbers<[1], [0], [0], [1], [0, 0, 1, 1], [], []>} : vector<8x32xf32>, vector<32x288xf32>, vector<8x288xf32> -> vector<8x288xf32>
    %c0_59 = arith.constant 0 : index
    %c0_60 = arith.constant 0 : index
    %112 = vector.load %arg15[%c0_59, %c0_60] : memref<8x1xf32, #tpu.memory_space<vmem>>, vector<8x1xf32>
    %113 = vector.broadcast %112 : vector<8x1xf32> to vector<8x288xf32>
    %114 = arith.mulf %111, %113 : vector<8x288xf32>
    %c0_61 = arith.constant 0 : index
    %c0_62 = arith.constant 0 : index
    %115 = vector.load %arg16[%c0_61, %c0_62] : memref<8x1xf32, #tpu.memory_space<vmem>>, vector<8x1xf32>
    %116 = vector.broadcast %115 : vector<8x1xf32> to vector<8x288xf32>
    %117 = arith.addf %114, %116 : vector<8x288xf32>
    %c0_63 = arith.constant 0 : index
    %c0_64 = arith.constant 0 : index
    %c19_65 = arith.constant 19 : index
    %118 = vector.load %arg1[%c0_63, %c0_64, %c19_65] : memref<1x8x342xf32, #tpu.memory_space<vmem>>, vector<1x8x288xf32>
    %119 = vector.shape_cast %118 : vector<1x8x288xf32> to vector<8x288xf32>
    %120 = arith.addf %117, %119 : vector<8x288xf32>
    %c0_66 = arith.constant 0 : index
    %c0_67 = arith.constant 0 : index
    %c0_68 = arith.constant 0 : index
    %121 = vector.load %arg17[%c0_66, %c0_67, %c0_68] : memref<1x8x288xf32, #tpu.memory_space<vmem>>, vector<1x8x288xf32>
    %122 = vector.shape_cast %121 : vector<1x8x288xf32> to vector<8x288xf32>
    %123 = vector.shape_cast %120 : vector<8x288xf32> to vector<1x8x288xf32>
    tpu.vector_store %arg17[%c0_66, %c0_67, %c0_68], %123 {strides = array<i32>} : memref<1x8x288xf32, #tpu.memory_space<vmem>>, vector<1x8x288xf32>,
    return
  }
  func.func @transform_0(%arg0: i32) -> (i32, i32, i32) {
    %c0_i32 = arith.constant 0 : i32
    %c0_i32_0 = arith.constant 0 : i32
    %c0_i32_1 = arith.constant 0 : i32
    return %arg0, %c0_i32, %c0_i32_0 : i32, i32, i32
  }
  func.func @transform_1(%arg0: i32) -> (i32, i32) {
    %c0_i32 = arith.constant 0 : i32
    %c0_i32_0 = arith.constant 0 : i32
    %c0_i32_1 = arith.constant 0 : i32
    return %c0_i32, %c0_i32_0 : i32, i32
  }
  func.func @transform_2(%arg0: i32) -> (i32, i32) {
    %c0_i32 = arith.constant 0 : i32
    %c0_i32_0 = arith.constant 0 : i32
    %c0_i32_1 = arith.constant 0 : i32
    return %c0_i32, %c0_i32_0 : i32, i32
  }
  func.func @transform_3(%arg0: i32) -> (i32, i32) {
    %c0_i32 = arith.constant 0 : i32
    %c0_i32_0 = arith.constant 0 : i32
    %c0_i32_1 = arith.constant 0 : i32
    return %c0_i32, %c0_i32_0 : i32, i32
  }
  func.func @transform_4(%arg0: i32) -> (i32, i32) {
    %c0_i32 = arith.constant 0 : i32
    %c0_i32_0 = arith.constant 0 : i32
    %c0_i32_1 = arith.constant 0 : i32
    return %c0_i32, %c0_i32_0 : i32, i32
  }
  func.func @transform_5(%arg0: i32) -> (i32, i32) {
    %c0_i32 = arith.constant 0 : i32
    %c0_i32_0 = arith.constant 0 : i32
    %c0_i32_1 = arith.constant 0 : i32
    return %c0_i32, %c0_i32_0 : i32, i32
  }
  func.func @transform_6(%arg0: i32) -> (i32, i32) {
    %c0_i32 = arith.constant 0 : i32
    %c0_i32_0 = arith.constant 0 : i32
    %c0_i32_1 = arith.constant 0 : i32
    return %c0_i32, %c0_i32_0 : i32, i32
  }
  func.func @transform_7(%arg0: i32) -> (i32, i32) {
    %c0_i32 = arith.constant 0 : i32
    %c0_i32_0 = arith.constant 0 : i32
    %c0_i32_1 = arith.constant 0 : i32
    return %c0_i32, %c0_i32_0 : i32, i32
  }
  func.func @transform_8(%arg0: i32) -> (i32, i32) {
    %c0_i32 = arith.constant 0 : i32
    %c0_i32_0 = arith.constant 0 : i32
    %c0_i32_1 = arith.constant 0 : i32
    return %c0_i32, %c0_i32_0 : i32, i32
  }
  func.func @transform_9(%arg0: i32) -> (i32, i32) {
    %c0_i32 = arith.constant 0 : i32
    %c0_i32_0 = arith.constant 0 : i32
    %c0_i32_1 = arith.constant 0 : i32
    return %c0_i32, %c0_i32_0 : i32, i32
  }
  func.func @transform_10(%arg0: i32) -> (i32, i32) {
    %c0_i32 = arith.constant 0 : i32
    %c0_i32_0 = arith.constant 0 : i32
    %c0_i32_1 = arith.constant 0 : i32
    return %c0_i32, %c0_i32_0 : i32, i32
  }
  func.func @transform_11(%arg0: i32) -> (i32, i32) {
    %c0_i32 = arith.constant 0 : i32
    %c0_i32_0 = arith.constant 0 : i32
    %c0_i32_1 = arith.constant 0 : i32
    return %c0_i32, %c0_i32_0 : i32, i32
  }
  func.func @transform_12(%arg0: i32) -> (i32, i32) {
    %c0_i32 = arith.constant 0 : i32
    %c0_i32_0 = arith.constant 0 : i32
    %c0_i32_1 = arith.constant 0 : i32
    return %c0_i32, %c0_i32_0 : i32, i32
  }
  func.func @transform_13(%arg0: i32) -> (i32, i32) {
    %c0_i32 = arith.constant 0 : i32
    %c0_i32_0 = arith.constant 0 : i32
    %c0_i32_1 = arith.constant 0 : i32
    return %c0_i32, %c0_i32_0 : i32, i32
  }
  func.func @transform_14(%arg0: i32) -> (i32, i32) {
    %c0_i32 = arith.constant 0 : i32
    %c0_i32_0 = arith.constant 0 : i32
    %c0_i32_1 = arith.constant 0 : i32
    return %c0_i32, %c0_i32_0 : i32, i32
  }
  func.func @transform_15(%arg0: i32) -> (i32, i32) {
    %c0_i32 = arith.constant 0 : i32
    %c0_i32_0 = arith.constant 0 : i32
    %c0_i32_1 = arith.constant 0 : i32
    return %c0_i32, %c0_i32_0 : i32, i32
  }
  func.func @transform_16(%arg0: i32) -> (i32, i32, i32) {
    %c0_i32 = arith.constant 0 : i32
    %c0_i32_0 = arith.constant 0 : i32
    %c0_i32_1 = arith.constant 0 : i32
    return %arg0, %c0_i32, %c0_i32_0 : i32, i32, i32
  }
}

module attributes {stable_mosaic.version = 11 : i64} {
  func.func @kernel(%arg0: i32, %arg1: memref<1x8x342xf32, #tpu.memory_space<vmem>>, %arg2: memref<32x8xf32, #tpu.memory_space<vmem>>, %arg3: memref<32x1xf32, #tpu.memory_space<vmem>>, %arg4: memref<32x1xf32, #tpu.memory_space<vmem>>, %arg5: memref<1x342xf32, #tpu.memory_space<vmem>>, %arg6: memref<32x9xf32, #tpu.memory_space<vmem>>, %arg7: memref<32x1xf32, #tpu.memory_space<vmem>>, %arg8: memref<32x1xf32, #tpu.memory_space<vmem>>, %arg9: memref<1x288xf32, #tpu.memory_space<vmem>>, %arg10: memref<32x2xf32, #tpu.memory_space<vmem>>, %arg11: memref<1x2xf32, #tpu.memory_space<vmem>>, %arg12: memref<32x2xf32, #tpu.memory_space<vmem>>, %arg13: memref<32x1xf32, #tpu.memory_space<vmem>>, %arg14: memref<8x32xf32, #tpu.memory_space<vmem>>, %arg15: memref<8x1xf32, #tpu.memory_space<vmem>>, %arg16: memref<8x1xf32, #tpu.memory_space<vmem>>, %arg17: memref<1x8x288xf32, #tpu.memory_space<vmem>>, %arg18: memref<32x342xf32, #tpu.memory_space<vmem>>) attributes {dimension_semantics = [#tpu.dimension_semantics<parallel>], iteration_bounds = array<i64: 2>, scalar_prefetch = 0 : i64, scratch_operands = 1 : i64, tpu.core_type = #tpu.core_type<tc>, window_params = [{transform_indices = @transform_0, window_bounds = array<i64: 1, 8, 342>}, {pipeline_mode = #tpu.pipeline_mode<synchronous>, transform_indices = @transform_1, window_bounds = array<i64: 32, 8>}, {pipeline_mode = #tpu.pipeline_mode<synchronous>, transform_indices = @transform_2, window_bounds = array<i64: 32, 1>}, {pipeline_mode = #tpu.pipeline_mode<synchronous>, transform_indices = @transform_3, window_bounds = array<i64: 32, 1>}, {pipeline_mode = #tpu.pipeline_mode<synchronous>, transform_indices = @transform_4, window_bounds = array<i64: 1, 342>}, {pipeline_mode = #tpu.pipeline_mode<synchronous>, transform_indices = @transform_5, window_bounds = array<i64: 32, 9>}, {pipeline_mode = #tpu.pipeline_mode<synchronous>, transform_indices = @transform_6, window_bounds = array<i64: 32, 1>}, {pipeline_mode = #tpu.pipeline_mode<synchronous>, transform_indices = @transform_7, window_bounds = array<i64: 32, 1>}, {pipeline_mode = #tpu.pipeline_mode<synchronous>, transform_indices = @transform_8, window_bounds = array<i64: 1, 288>}, {pipeline_mode = #tpu.pipeline_mode<synchronous>, transform_indices = @transform_9, window_bounds = array<i64: 32, 2>}, {pipeline_mode = #tpu.pipeline_mode<synchronous>, transform_indices = @transform_10, window_bounds = array<i64: 1, 2>}, {pipeline_mode = #tpu.pipeline_mode<synchronous>, transform_indices = @transform_11, window_bounds = array<i64: 32, 2>}, {pipeline_mode = #tpu.pipeline_mode<synchronous>, transform_indices = @transform_12, window_bounds = array<i64: 32, 1>}, {pipeline_mode = #tpu.pipeline_mode<synchronous>, transform_indices = @transform_13, window_bounds = array<i64: 8, 32>}, {pipeline_mode = #tpu.pipeline_mode<synchronous>, transform_indices = @transform_14, window_bounds = array<i64: 8, 1>}, {pipeline_mode = #tpu.pipeline_mode<synchronous>, transform_indices = @transform_15, window_bounds = array<i64: 8, 1>}, {transform_indices = @transform_16, window_bounds = array<i64: 1, 8, 288>}]} {
    %c0 = arith.constant 0 : index
    %c0_0 = arith.constant 0 : index
    %c0_1 = arith.constant 0 : index
    %0 = vector.load %arg1[%c0, %c0_0, %c0_1] : memref<1x8x342xf32, #tpu.memory_space<vmem>>, vector<1x8x342xf32>
    %1 = vector.shape_cast %0 : vector<1x8x342xf32> to vector<8x342xf32>
    %c0_2 = arith.constant 0 : index
    %c0_3 = arith.constant 0 : index
    %2 = vector.load %arg2[%c0_2, %c0_3] : memref<32x8xf32, #tpu.memory_space<vmem>>, vector<32x8xf32>
    %cst = arith.constant dense<0.000000e+00> : vector<32x342xf32>
    %3 = tpu.matmul %2, %1, %cst {dimension_numbers = #tpu.dot_dimension_numbers<[1], [0], [0], [1], [0, 0, 1, 1], [], []>} : vector<32x8xf32>, vector<8x342xf32>, vector<32x342xf32> -> vector<32x342xf32>
    %c0_4 = arith.constant 0 : index
    %c0_5 = arith.constant 0 : index
    %4 = vector.load %arg3[%c0_4, %c0_5] : memref<32x1xf32, #tpu.memory_space<vmem>>, vector<32x1xf32>
    %5 = vector.broadcast %4 : vector<32x1xf32> to vector<32x342xf32>
    %6 = arith.mulf %3, %5 : vector<32x342xf32>
    %c0_6 = arith.constant 0 : index
    %c0_7 = arith.constant 0 : index
    %7 = vector.load %arg4[%c0_6, %c0_7] : memref<32x1xf32, #tpu.memory_space<vmem>>, vector<32x1xf32>
    %8 = vector.broadcast %7 : vector<32x1xf32> to vector<32x342xf32>
    %9 = arith.addf %6, %8 : vector<32x342xf32>
    %10 = arith.negf %9 : vector<32x342xf32>
    %11 = math.exp %10 : vector<32x342xf32>
    %cst_8 = arith.constant 1.000000e+00 : f32
    %12 = vector.broadcast %cst_8 : f32 to vector<32x342xf32>
    %13 = arith.addf %12, %11 : vector<32x342xf32>
    %14 = arith.divf %12, %13 : vector<32x342xf32>
    %15 = arith.mulf %9, %14 : vector<32x342xf32>
    %c0_9 = arith.constant 0 : index
    %c0_10 = arith.constant 0 : index
    %16 = vector.load %arg5[%c0_9, %c0_10] : memref<1x342xf32, #tpu.memory_space<vmem>>, vector<1x342xf32>
    %17 = vector.broadcast %16 : vector<1x342xf32> to vector<32x342xf32>
    %18 = arith.mulf %15, %17 : vector<32x342xf32>
    %c0_11 = arith.constant 0 : index
    %c0_12 = arith.constant 0 : index
    %19 = vector.load %arg18[%c0_11, %c0_12] : memref<32x342xf32, #tpu.memory_space<vmem>>, vector<32x342xf32>
    tpu.vector_store %arg18[%c0_11, %c0_12], %18 {strides = array<i32>} : memref<32x342xf32, #tpu.memory_space<vmem>>, vector<32x342xf32>,
    %c0_13 = arith.constant 0 : index
    %c0_14 = arith.constant 0 : index
    %20 = vector.load %arg18[%c0_13, %c0_14] : memref<32x342xf32, #tpu.memory_space<vmem>>, vector<32x288xf32>
    %c0_15 = arith.constant 0 : index
    %c0_16 = arith.constant 0 : index
    %21 = vector.load %arg6[%c0_15, %c0_16] : memref<32x9xf32, #tpu.memory_space<vmem>>, vector<32x1xf32>
    %22 = vector.broadcast %21 : vector<32x1xf32> to vector<32x288xf32>
    %23 = arith.mulf %20, %22 : vector<32x288xf32>
    %c0_17 = arith.constant 0 : index
    %c1 = arith.constant 1 : index
    %24 = vector.load %arg18[%c0_17, %c1] : memref<32x342xf32, #tpu.memory_space<vmem>>, vector<32x288xf32>
    %c0_18 = arith.constant 0 : index
    %c1_19 = arith.constant 1 : index
    %25 = vector.load %arg6[%c0_18, %c1_19] : memref<32x9xf32, #tpu.memory_space<vmem>>, vector<32x1xf32>
    %26 = vector.broadcast %25 : vector<32x1xf32> to vector<32x288xf32>
    %27 = arith.mulf %24, %26 : vector<32x288xf32>
    %28 = arith.addf %23, %27 : vector<32x288xf32>
    %c0_20 = arith.constant 0 : index
    %c2 = arith.constant 2 : index
    %29 = vector.load %arg18[%c0_20, %c2] : memref<32x342xf32, #tpu.memory_space<vmem>>, vector<32x288xf32>
    %c0_21 = arith.constant 0 : index
    %c2_22 = arith.constant 2 : index
    %30 = vector.load %arg6[%c0_21, %c2_22] : memref<32x9xf32, #tpu.memory_space<vmem>>, vector<32x1xf32>
    %31 = vector.broadcast %30 : vector<32x1xf32> to vector<32x288xf32>
    %32 = arith.mulf %29, %31 : vector<32x288xf32>
    %33 = arith.addf %28, %32 : vector<32x288xf32>
    %c0_23 = arith.constant 0 : index
    %c18 = arith.constant 18 : index
    %34 = vector.load %arg18[%c0_23, %c18] : memref<32x342xf32, #tpu.memory_space<vmem>>, vector<32x288xf32>
    %c0_24 = arith.constant 0 : index
    %c3 = arith.constant 3 : index
    %35 = vector.load %arg6[%c0_24, %c3] : memref<32x9xf32, #tpu.memory_space<vmem>>, vector<32x1xf32>
    %36 = vector.broadcast %35 : vector<32x1xf32> to vector<32x288xf32>
    %37 = arith.mulf %34, %36 : vector<32x288xf32>
    %38 = arith.addf %33, %37 : vector<32x288xf32>
    %c0_25 = arith.constant 0 : index
    %c19 = arith.constant 19 : index
    %39 = vector.load %arg18[%c0_25, %c19] : memref<32x342xf32, #tpu.memory_space<vmem>>, vector<32x288xf32>
    %c0_26 = arith.constant 0 : index
    %c4 = arith.constant 4 : index
    %40 = vector.load %arg6[%c0_26, %c4] : memref<32x9xf32, #tpu.memory_space<vmem>>, vector<32x1xf32>
    %41 = vector.broadcast %40 : vector<32x1xf32> to vector<32x288xf32>
    %42 = arith.mulf %39, %41 : vector<32x288xf32>
    %43 = arith.addf %38, %42 : vector<32x288xf32>
    %c0_27 = arith.constant 0 : index
    %c20 = arith.constant 20 : index
    %44 = vector.load %arg18[%c0_27, %c20] : memref<32x342xf32, #tpu.memory_space<vmem>>, vector<32x288xf32>
    %c0_28 = arith.constant 0 : index
    %c5 = arith.constant 5 : index
    %45 = vector.load %arg6[%c0_28, %c5] : memref<32x9xf32, #tpu.memory_space<vmem>>, vector<32x1xf32>
    %46 = vector.broadcast %45 : vector<32x1xf32> to vector<32x288xf32>
    %47 = arith.mulf %44, %46 : vector<32x288xf32>
    %48 = arith.addf %43, %47 : vector<32x288xf32>
    %c0_29 = arith.constant 0 : index
    %c36 = arith.constant 36 : index
    %49 = vector.load %arg18[%c0_29, %c36] : memref<32x342xf32, #tpu.memory_space<vmem>>, vector<32x288xf32>
    %c0_30 = arith.constant 0 : index
    %c6 = arith.constant 6 : index
    %50 = vector.load %arg6[%c0_30, %c6] : memref<32x9xf32, #tpu.memory_space<vmem>>, vector<32x1xf32>
    %51 = vector.broadcast %50 : vector<32x1xf32> to vector<32x288xf32>
    %52 = arith.mulf %49, %51 : vector<32x288xf32>
    %53 = arith.addf %48, %52 : vector<32x288xf32>
    %c0_31 = arith.constant 0 : index
    %c37 = arith.constant 37 : index
    %54 = vector.load %arg18[%c0_31, %c37] : memref<32x342xf32, #tpu.memory_space<vmem>>, vector<32x288xf32>
    %c0_32 = arith.constant 0 : index
    %c7 = arith.constant 7 : index
    %55 = vector.load %arg6[%c0_32, %c7] : memref<32x9xf32, #tpu.memory_space<vmem>>, vector<32x1xf32>
    %56 = vector.broadcast %55 : vector<32x1xf32> to vector<32x288xf32>
    %57 = arith.mulf %54, %56 : vector<32x288xf32>
    %58 = arith.addf %53, %57 : vector<32x288xf32>
    %c0_33 = arith.constant 0 : index
    %c38 = arith.constant 38 : index
    %59 = vector.load %arg18[%c0_33, %c38] : memref<32x342xf32, #tpu.memory_space<vmem>>, vector<32x288xf32>
    %c0_34 = arith.constant 0 : index
    %c8 = arith.constant 8 : index
    %60 = vector.load %arg6[%c0_34, %c8] : memref<32x9xf32, #tpu.memory_space<vmem>>, vector<32x1xf32>
    %61 = vector.broadcast %60 : vector<32x1xf32> to vector<32x288xf32>
    %62 = arith.mulf %59, %61 : vector<32x288xf32>
    %63 = arith.addf %58, %62 : vector<32x288xf32>
    %c0_35 = arith.constant 0 : index
    %c0_36 = arith.constant 0 : index
    %64 = vector.load %arg7[%c0_35, %c0_36] : memref<32x1xf32, #tpu.memory_space<vmem>>, vector<32x1xf32>
    %65 = vector.broadcast %64 : vector<32x1xf32> to vector<32x288xf32>
    %66 = arith.mulf %63, %65 : vector<32x288xf32>
    %c0_37 = arith.constant 0 : index
    %c0_38 = arith.constant 0 : index
    %67 = vector.load %arg8[%c0_37, %c0_38] : memref<32x1xf32, #tpu.memory_space<vmem>>, vector<32x1xf32>
    %68 = vector.broadcast %67 : vector<32x1xf32> to vector<32x288xf32>
    %69 = arith.addf %66, %68 : vector<32x288xf32>
    %70 = arith.negf %69 : vector<32x288xf32>
    %71 = math.exp %70 : vector<32x288xf32>
    %cst_39 = arith.constant 1.000000e+00 : f32
    %72 = vector.broadcast %cst_39 : f32 to vector<32x288xf32>
    %73 = arith.addf %72, %71 : vector<32x288xf32>
    %74 = arith.divf %72, %73 : vector<32x288xf32>
    %75 = arith.mulf %69, %74 : vector<32x288xf32>
    %c0_40 = arith.constant 0 : index
    %c0_41 = arith.constant 0 : index
    %76 = vector.load %arg9[%c0_40, %c0_41] : memref<1x288xf32, #tpu.memory_space<vmem>>, vector<1x288xf32>
    %77 = vector.broadcast %76 : vector<1x288xf32> to vector<32x288xf32>
    %78 = arith.mulf %75, %77 : vector<32x288xf32>
    %cst_42 = arith.constant dense<0.000000e+00> : vector<32xf32>
    %79 = vector.multi_reduction <add>, %78, %cst_42 [1] : vector<32x288xf32> to vector<32xf32>
    %80 = vector.shape_cast %79 : vector<32xf32> to vector<32x1xf32>
    %cst_43 = arith.constant 3.906250e-03 : f32
    %81 = vector.broadcast %cst_43 : f32 to vector<32x1xf32>
    %82 = arith.mulf %80, %81 : vector<32x1xf32>
    %c0_44 = arith.constant 0 : index
    %c0_45 = arith.constant 0 : index
    %83 = vector.load %arg10[%c0_44, %c0_45] : memref<32x2xf32, #tpu.memory_space<vmem>>, vector<32x2xf32>
    %84 = vector.broadcast %82 : vector<32x1xf32> to vector<32x2xf32>
    %85 = arith.mulf %84, %83 : vector<32x2xf32>
    %cst_46 = arith.constant dense<0.000000e+00> : vector<2xf32>
    %86 = vector.multi_reduction <add>, %85, %cst_46 [0] : vector<32x2xf32> to vector<2xf32>
    %87 = vector.shape_cast %86 : vector<2xf32> to vector<1x2xf32>
    %c0_47 = arith.constant 0 : index
    %c0_48 = arith.constant 0 : index
    %88 = vector.load %arg11[%c0_47, %c0_48] : memref<1x2xf32, #tpu.memory_space<vmem>>, vector<1x2xf32>
    %89 = arith.addf %87, %88 : vector<1x2xf32>
    %90 = arith.negf %89 : vector<1x2xf32>
    %91 = math.exp %90 : vector<1x2xf32>
    %cst_49 = arith.constant 1.000000e+00 : f32
    %92 = vector.broadcast %cst_49 : f32 to vector<1x2xf32>
    %93 = arith.addf %92, %91 : vector<1x2xf32>
    %94 = arith.divf %92, %93 : vector<1x2xf32>
    %95 = arith.mulf %89, %94 : vector<1x2xf32>
    %c0_50 = arith.constant 0 : index
    %c0_51 = arith.constant 0 : index
    %96 = vector.load %arg12[%c0_50, %c0_51] : memref<32x2xf32, #tpu.memory_space<vmem>>, vector<32x2xf32>
    %97 = vector.broadcast %95 : vector<1x2xf32> to vector<32x2xf32>
    %98 = arith.mulf %96, %97 : vector<32x2xf32>
    %cst_52 = arith.constant dense<0.000000e+00> : vector<32xf32>
    %99 = vector.multi_reduction <add>, %98, %cst_52 [1] : vector<32x2xf32> to vector<32xf32>
    %100 = vector.shape_cast %99 : vector<32xf32> to vector<32x1xf32>
    %c0_53 = arith.constant 0 : index
    %c0_54 = arith.constant 0 : index
    %101 = vector.load %arg13[%c0_53, %c0_54] : memref<32x1xf32, #tpu.memory_space<vmem>>, vector<32x1xf32>
    %102 = arith.addf %100, %101 : vector<32x1xf32>
    %103 = arith.negf %102 : vector<32x1xf32>
    %104 = math.exp %103 : vector<32x1xf32>
    %cst_55 = arith.constant 1.000000e+00 : f32
    %105 = vector.broadcast %cst_55 : f32 to vector<32x1xf32>
    %106 = arith.addf %105, %104 : vector<32x1xf32>
    %107 = arith.divf %105, %106 : vector<32x1xf32>
    %108 = vector.broadcast %107 : vector<32x1xf32> to vector<32x288xf32>
    %109 = arith.mulf %75, %108 : vector<32x288xf32>
    %c0_56 = arith.constant 0 : index
    %c0_57 = arith.constant 0 : index
    %110 = vector.load %arg14[%c0_56, %c0_57] : memref<8x32xf32, #tpu.memory_space<vmem>>, vector<8x32xf32>
    %cst_58 = arith.constant dense<0.000000e+00> : vector<8x288xf32>
    %111 = tpu.matmul %110, %109, %cst_58 {dimension_numbers = #tpu.dot_dimension_numbers<[1], [0], [0], [1], [0, 0, 1, 1], [], []>} : vector<8x32xf32>, vector<32x288xf32>, vector<8x288xf32> -> vector<8x288xf32>
    %c0_59 = arith.constant 0 : index
    %c0_60 = arith.constant 0 : index
    %112 = vector.load %arg15[%c0_59, %c0_60] : memref<8x1xf32, #tpu.memory_space<vmem>>, vector<8x1xf32>
    %113 = vector.broadcast %112 : vector<8x1xf32> to vector<8x288xf32>
    %114 = arith.mulf %111, %113 : vector<8x288xf32>
    %c0_61 = arith.constant 0 : index
    %c0_62 = arith.constant 0 : index
    %115 = vector.load %arg16[%c0_61, %c0_62] : memref<8x1xf32, #tpu.memory_space<vmem>>, vector<8x1xf32>
    %116 = vector.broadcast %115 : vector<8x1xf32> to vector<8x288xf32>
    %117 = arith.addf %114, %116 : vector<8x288xf32>
    %c0_63 = arith.constant 0 : index
    %c0_64 = arith.constant 0 : index
    %c19_65 = arith.constant 19 : index
    %118 = vector.load %arg1[%c0_63, %c0_64, %c19_65] : memref<1x8x342xf32, #tpu.memory_space<vmem>>, vector<1x8x288xf32>
    %119 = vector.shape_cast %118 : vector<1x8x288xf32> to vector<8x288xf32>
    %120 = arith.addf %117, %119 : vector<8x288xf32>
    %c0_66 = arith.constant 0 : index
    %c0_67 = arith.constant 0 : index
    %c0_68 = arith.constant 0 : index
    %121 = vector.load %arg17[%c0_66, %c0_67, %c0_68] : memref<1x8x288xf32, #tpu.memory_space<vmem>>, vector<1x8x288xf32>
    %122 = vector.shape_cast %121 : vector<1x8x288xf32> to vector<8x288xf32>
    %123 = vector.shape_cast %120 : vector<8x288xf32> to vector<1x8x288xf32>
    tpu.vector_store %arg17[%c0_66, %c0_67, %c0_68], %123 {strides = array<i32>} : memref<1x8x288xf32, #tpu.memory_space<vmem>>, vector<1x8x288xf32>,
    return
  }
  func.func @transform_0(%arg0: i32) -> (i32, i32, i32) {
    %c0_i32 = arith.constant 0 : i32
    %c0_i32_0 = arith.constant 0 : i32
    %c0_i32_1 = arith.constant 0 : i32
    return %arg0, %c0_i32, %c0_i32_0 : i32, i32, i32
  }
  func.func @transform_1(%arg0: i32) -> (i32, i32) {
    %c0_i32 = arith.constant 0 : i32
    %c0_i32_0 = arith.constant 0 : i32
    %c0_i32_1 = arith.constant 0 : i32
    return %c0_i32, %c0_i32_0 : i32, i32
  }
  func.func @transform_2(%arg0: i32) -> (i32, i32) {
    %c0_i32 = arith.constant 0 : i32
    %c0_i32_0 = arith.constant 0 : i32
    %c0_i32_1 = arith.constant 0 : i32
    return %c0_i32, %c0_i32_0 : i32, i32
  }
  func.func @transform_3(%arg0: i32) -> (i32, i32) {
    %c0_i32 = arith.constant 0 : i32
    %c0_i32_0 = arith.constant 0 : i32
    %c0_i32_1 = arith.constant 0 : i32
    return %c0_i32, %c0_i32_0 : i32, i32
  }
  func.func @transform_4(%arg0: i32) -> (i32, i32) {
    %c0_i32 = arith.constant 0 : i32
    %c0_i32_0 = arith.constant 0 : i32
    %c0_i32_1 = arith.constant 0 : i32
    return %c0_i32, %c0_i32_0 : i32, i32
  }
  func.func @transform_5(%arg0: i32) -> (i32, i32) {
    %c0_i32 = arith.constant 0 : i32
    %c0_i32_0 = arith.constant 0 : i32
    %c0_i32_1 = arith.constant 0 : i32
    return %c0_i32, %c0_i32_0 : i32, i32
  }
  func.func @transform_6(%arg0: i32) -> (i32, i32) {
    %c0_i32 = arith.constant 0 : i32
    %c0_i32_0 = arith.constant 0 : i32
    %c0_i32_1 = arith.constant 0 : i32
    return %c0_i32, %c0_i32_0 : i32, i32
  }
  func.func @transform_7(%arg0: i32) -> (i32, i32) {
    %c0_i32 = arith.constant 0 : i32
    %c0_i32_0 = arith.constant 0 : i32
    %c0_i32_1 = arith.constant 0 : i32
    return %c0_i32, %c0_i32_0 : i32, i32
  }
  func.func @transform_8(%arg0: i32) -> (i32, i32) {
    %c0_i32 = arith.constant 0 : i32
    %c0_i32_0 = arith.constant 0 : i32
    %c0_i32_1 = arith.constant 0 : i32
    return %c0_i32, %c0_i32_0 : i32, i32
  }
  func.func @transform_9(%arg0: i32) -> (i32, i32) {
    %c0_i32 = arith.constant 0 : i32
    %c0_i32_0 = arith.constant 0 : i32
    %c0_i32_1 = arith.constant 0 : i32
    return %c0_i32, %c0_i32_0 : i32, i32
  }
  func.func @transform_10(%arg0: i32) -> (i32, i32) {
    %c0_i32 = arith.constant 0 : i32
    %c0_i32_0 = arith.constant 0 : i32
    %c0_i32_1 = arith.constant 0 : i32
    return %c0_i32, %c0_i32_0 : i32, i32
  }
  func.func @transform_11(%arg0: i32) -> (i32, i32) {
    %c0_i32 = arith.constant 0 : i32
    %c0_i32_0 = arith.constant 0 : i32
    %c0_i32_1 = arith.constant 0 : i32
    return %c0_i32, %c0_i32_0 : i32, i32
  }
  func.func @transform_12(%arg0: i32) -> (i32, i32) {
    %c0_i32 = arith.constant 0 : i32
    %c0_i32_0 = arith.constant 0 : i32
    %c0_i32_1 = arith.constant 0 : i32
    return %c0_i32, %c0_i32_0 : i32, i32
  }
  func.func @transform_13(%arg0: i32) -> (i32, i32) {
    %c0_i32 = arith.constant 0 : i32
    %c0_i32_0 = arith.constant 0 : i32
    %c0_i32_1 = arith.constant 0 : i32
    return %c0_i32, %c0_i32_0 : i32, i32
  }
  func.func @transform_14(%arg0: i32) -> (i32, i32) {
    %c0_i32 = arith.constant 0 : i32
    %c0_i32_0 = arith.constant 0 : i32
    %c0_i32_1 = arith.constant 0 : i32
    return %c0_i32, %c0_i32_0 : i32, i32
  }
  func.func @transform_15(%arg0: i32) -> (i32, i32) {
    %c0_i32 = arith.constant 0 : i32
    %c0_i32_0 = arith.constant 0 : i32
    %c0_i32_1 = arith.constant 0 : i32
    return %c0_i32, %c0_i32_0 : i32, i32
  }
  func.func @transform_16(%arg0: i32) -> (i32, i32, i32) {
    %c0_i32 = arith.constant 0 : i32
    %c0_i32_0 = arith.constant 0 : i32
    %c0_i32_1 = arith.constant 0 : i32
    return %arg0, %c0_i32, %c0_i32_0 : i32, i32, i32
  }
}

</mosaic_0001>

<bundles_post_ra>
// kernel: mbconv_forward.1
= control target key start
LH: loop header
LB: loop body
LE: loop exit
PB: predicated region body
PF: predicated region fallthrough
CT: control target
= control target key end

     0   :  { %s2689_s21 = smov 0   ;;  %s3799_s0 = inlined_call_operand.vmem [shape: f32[2,8,342], index: 0, kind: input, shape index: {}]   ;;  %s3800_s1 = inlined_call_operand.vmem [shape: f32[32,8], index: 1, kind: input, shape index: {}]   ;;  %s3801_s2 = inlined_call_operand.vmem [shape: f32[32,1], index: 2, kind: input, shape index: {}]   ;;  %s3802_s3 = inlined_call_operand.vmem [shape: f32[32,1], index: 3, kind: input, shape index: {}]   ;;  %s3803_s4 = inlined_call_operand.vmem [shape: f32[1,342], index: 4, kind: input, shape index: {}]   ;;  %s3804_s5 = inlined_call_operand.vmem [shape: f32[32,9], index: 5, kind: input, shape index: {}]   ;;  %s3805_s6 = inlined_call_operand.vmem [shape: f32[32,1], index: 6, kind: input, shape index: {}]   ;;  %s3806_s7 = inlined_call_operand.vmem [shape: f32[32,1], index: 7, kind: input, shape index: {}]   ;;  %s3807_s8 = inlined_call_operand.vmem [shape: f32[1,288], index: 8, kind: input, shape index: {}]   ;;  %s3808_s9 = inlined_call_operand.vmem [shape: f32[32,2], index: 9, kind: input, shape index: {}]   ;;  %s3809_s10 = inlined_call_operand.vmem [shape: f32[1,2], index: 10, kind: input, shape index: {}]   ;;  %s3810_s11 = inlined_call_operand.vmem [shape: f32[32,2], index: 11, kind: input, shape index: {}]   ;;  %s3811_s12 = inlined_call_operand.vmem [shape: f32[32,1], index: 12, kind: input, shape index: {}]   ;;  %s3812_s13 = inlined_call_operand.vmem [shape: f32[8,32], index: 13, kind: input, shape index: {}]   ;;  %s3813_s14 = inlined_call_operand.vmem [shape: f32[8,1], index: 14, kind: input, shape index: {}]   ;;  %s3814_s15 = inlined_call_operand.vmem [shape: f32[8,1], index: 15, kind: input, shape index: {}]   ;;  %s3815_s16 = inlined_call_operand.vmem [shape: f32[2,8,288], index: 16, kind: output, shape index: {}]  }
   0x1   :  { %3824 = sst [smem:[#allocation7_spill]] %s3799_s0 }
   0x2 LB: > { %s2308_s22 = sadd.s32 4294967295, %s2582_s21   ;;  %p2312_p0 = scmp.ge.s32.totalorder %s2582_s21, 1  ;;  %s2582_s21 = sphi %s2689_s21, %s26_s21  }
   0x3   : > { %p462_p1 = scmp.lt.s32.totalorder %s2582_s21, 3 }
   0x5   : > { %p463_p2 = pnand %p2312_p0, %p462_p1 }
   0x7   : > { %466 = sbr.rel (%p463_p2) target bundleno = 1368 (0x558), region = 84 }
   0xe   : > { %v2700_v0 = vld [vmem:[%s3804_s5] sm:$0xff]  ;;  %p512_p3 = scmp.lt.s32.totalorder %s2308_s22, 1  ;;  %v2584_v1 = vmov 1   ;;  %v3816_v2 = vmov 0.0   ;;  %v718_v3 = vld [vmem:[%s3801_s2 + $0x10] sm:$0xff]  ;;  %v2586_v4 = vmov 0  }
   0xf   : > { %2431 = vset.pattern.permute.xlu0 %v2584_v1  ;;  %606 = vmatprep.mubr.f32.mxu0 %v3816_v2  ;;  %s3825_s30 = sld [smem:[#allocation7_spill]]  ;;  %v2587_v5 = vmov 2   ;;  %v525_v6 = vld [vmem:[%s3800_s1] sm:$0xff]  ;;  %vm529_vm0 = vcmask 64512   ;;  %v528_v9 = vld [vmem:[%s3800_s1 + $0x18] sm:$0xff]  ;;  %v2736_v11 = vld [vmem:[%s3804_s5 + $0x10] sm:$0xff] }
  0x10   : > { %963 = vperm.xlu0 %2431, %v2700_v0   ;;  %s3838_s22 = smov (!%p512_p3, %s2308_s22), 1  ;;  %624 = vmatprep.mubr.f32.mxu1 %v3816_v2  ;;  %v752_v12 = vld [vmem:[%s3802_s3] sm:$0xff]  ;;  %v526_v13 = vld [vmem:[%s3800_s1 + $0x8] sm:$0xff]  ;;  %v527_v14 = vld [vmem:[%s3800_s1 + $0x10] sm:$0xff]  ;;  %v2588_v17 = vmov 3   ;;  %v2589_v19 = vmov 4  }
  0x11   : > { %2430 = vset.pattern.permute.xlu1 %v2586_v4  ;;  %s2401_s27 = smul.u32 24, %s3838_s22  ;;  %v719_v15 = vld [vmem:[%s3801_s2 + $0x18] sm:$0xff]  ;;  %v2760_v16 = vld [vmem:[%s3804_s5 + $0x8] sm:$0xff]  ;;  %v2590_v20 = vmov 5   ;;  %v2591_v21 = vmov 6   ;;  %v2592_v23 = vmov 7  }
  0x12   : > { %732 = vperm.xlu1 %2430, %v718_v3   ;;  %v755_v18 = vld [vmem:[%s3802_s3 + $0x18] sm:$0xff]  ;;  %v2593_v24 = vmov 8   ;;  %v716_v25 = vld [vmem:[%s3801_s2] sm:$0xff]  ;;  %v717_v26 = vld [vmem:[%s3801_s2 + $0x8] sm:$0xff]  ;;  %vm903_vm1 = vcmask 703488   ;;  %s2594_s26 = smov 126  }
  0x13   : > { %v929_v22 = vld [vmem:[%s3804_s5 + $0x18] sm:$0xff]  ;;  %v753_v27 = vld [vmem:[%s3802_s3 + $0x8] sm:$0xff]  ;;  %v754_v28 = vld [vmem:[%s3802_s3 + $0x10] sm:$0xff]  ;;  %s2595_s28 = smov 127   ;;  %s2596_s29 = smov 92   ;;  %vm1026_vm2 = vcmask 1039360  }
  0x14   : > { %2433 = vset.pattern.permute.xlu0 %v2587_v5  ;;  %v1738_v29 = vld [vmem:[%s3805_s6] sm:$0xff]  ;;  %v1740_v30 = vld [vmem:[%s3805_s6 + $0x10] sm:$0xff]  ;;  %v1775_v31 = vld [vmem:[%s3806_s7 + $0x8] sm:$0xff]  ;;  %s2598_s17 = smov 109   ;;  %s2599_s18 = smov 108   ;;  %vm1123_vm3 = vcmask 1031168  }
  0x15   : > { %s2718_s0 = scalar_lea.vmem %s3825_s30, %s2401_s27  ;;  %1060 = vperm.xlu0 %2433, %v2700_v0   ;;  %v1739_v32 = vld [vmem:[%s3805_s6 + $0x8] sm:$0xff]  ;;  %v1774_v33 = vld [vmem:[%s3806_s7] sm:$0xff]  ;;  %s2597_s30 = smov 110   ;;  %vm1220_vm4 = vcmask 900096   ;;  %vm1511_vm5 = vcmask 752640   ;;  %vm1317_vm6 = vcmask 891904  }
  0x16   : > { %v523_v7 = vld [vmem:[%s2718_s0 + $0x8] sm:$0xff]  ;;  %v522_v8 = vld [vmem:[%s2718_s0] sm:$0xff]  ;;  %v524_v10 = vld [vmem:[%s2718_s0 + $0x10] sm:$0xff]  ;;  %758 = vperm.xlu1 %2430, %v752_v12   ;;  %s2600_s19 = smov 91   ;;  %vm1414_vm7 = vcmask 883712   ;;  %s2601_s20 = smov 90  }
  0x17   : > { %542 = vmatprep.subr.mxu0 %v523_v7  ;;  %2399 = vmatprep.subr.mxu1 %v523_v7  ;;  %vm1608_vm8 = vcmask 744448   ;;  %vm1705_vm9 = vcmask 736256   ;;  %vm1924_vm10 = vcmask 261120   ;;  %vm1956_vm11 = vcmask 15360   ;;  %s521_s23 = scalar_lea.vmem %s3815_s16, %s2401_s27 }
  0x18   : > { %543 = vmatpush1.msra.mxu0 %v522_v8  ;;  %2400 = vmatpush1.msra.mxu1 %v522_v8  ;;  %vm2603_vm12 = vmmov 0  }
  0x19   : > { %2315 = vmatmul.mubr.msk.f32.vlgmr.msra.gmra.mrb[0].mxu0 %vm529_vm0, %v525_v6  ;;  %2318 = vmatmul.mubr.msk.f32.vlgmr.msra.gmra.mrb[0].mxu1 %vm529_vm0, %v528_v9 }
  0x1a   : > { %2366 = vmatprep.subr.mxu1 %v524_v10  ;;  %612 = vmatprep.mubr.f32.mxu0 %v3816_v2 }
  0x1b   : > { %2367 = vmatpush3.msra.mxu1 %v524_v10  ;;  %2368 = vmatprep.mubr.msk.f32.mxu1 %vm529_vm0, %v525_v6 }
  0x1c   : > { %1068 = vperm.xlu0 %2433, %v2736_v11   ;;  %737 = vperm.xlu1 %2430, %v719_v15  }
  0x1d   : > { %2316 = vmatmul.mubr.msk.f32.gmra.mrb[2].mxu0 %vm529_vm0, %v526_v13  ;;  %2369 = vmatmul.mubr.msk.f32.vlgmr.msra.gmra.mrb[2].mxu1 %vm529_vm0, %v526_v13 }
  0x1e   : > { %618 = vmatprep.mubr.f32.mxu0 %v3816_v2  ;;  %2371 = vmatprep.mubr.msk.f32.mxu1 %vm529_vm0, %v527_v14 }
  0x20   : > { %2437 = vset.pattern.permute.xlu0 %v2588_v17  ;;  %773 = vperm.xlu1 %2430, %v755_v18  }
  0x21   : > { %2317 = vmatmul.mubr.msk.f32.gmra.mrb[4].mxu0 %vm529_vm0, %v527_v14  ;;  %2372 = vmatmul.mubr.msk.f32.gmra.mrb[4].mxu1 %vm529_vm0, %v528_v9 }
  0x22   : > { %1161 = vperm.xlu0 %2437, %v2760_v16   ;;  %2135 = vmatprep.mubr.f32.mxu1 %v3816_v2 }
  0x24   : > { %2432 = vset.pattern.permute.xlu1 %v2584_v1 }
  0x25   : > { %967 = vperm.xlu1 %2432, %v2760_v16  }
  0x26   : > { %2440 = vset.pattern.permute.xlu0 %v2589_v19 }
  0x27   : > { %1254 = vperm.xlu0 %2440, %v2700_v0  }
  0x29   : > { %971 = vperm.xlu1 %2432, %v2736_v11  }
  0x2b   : > { %1262 = vperm.xlu0 %2440, %v2736_v11  }
  0x2d   : > { %2434 = vset.pattern.permute.xlu1 %v2587_v5 }
  0x2e   : > { %1064 = vperm.xlu1 %2434, %v2760_v16  }
  0x2f   : > { %2444 = vset.pattern.permute.xlu0 %v2590_v20 }
  0x30   : > { %1355 = vperm.xlu0 %2444, %v2760_v16  }
  0x32   : > { %2435 = vset.pattern.permute.xlu1 %v2584_v1 }
  0x33   : > { %975 = vperm.xlu1 %2435, %v929_v22  }
  0x34   : > { %2447 = vset.pattern.permute.xlu0 %v2591_v21 }
  0x35   : > { %1448 = vperm.xlu0 %2447, %v2700_v0  }
  0x37   : > { %2436 = vset.pattern.permute.xlu1 %v2588_v17 }
  0x38   : > { %1157 = vperm.xlu1 %2436, %v2700_v0  }
  0x39   : > { %1456 = vperm.xlu0 %2447, %v2736_v11  }
  0x3c   : > { %2438 = vset.pattern.permute.xlu1 %v2587_v5 }
  0x3d   : > { %2451 = vset.pattern.permute.xlu0 %v2592_v23  ;;  %1072 = vperm.xlu1 %2438, %v929_v22  }
  0x3e   : > { %1549 = vperm.xlu0 %2451, %v2760_v16  }
  0x41   : > { %2439 = vset.pattern.permute.xlu1 %v2588_v17 }
  0x42   : > { %2454 = vset.pattern.permute.xlu0 %v2593_v24  ;;  %1165 = vperm.xlu1 %2439, %v2736_v11  }
  0x43   : > { %1642 = vperm.xlu0 %2454, %v2700_v0  }
  0x46   : > { %2441 = vset.pattern.permute.xlu1 %v2589_v19 }
  0x47   : > { %1650 = vperm.xlu0 %2454, %v2736_v11   ;;  %1258 = vperm.xlu1 %2441, %v2760_v16  }
  0x4b   : > { %2457 = vset.pattern.permute.xlu0 %v2586_v4  ;;  %2442 = vset.pattern.permute.xlu1 %v2588_v17 }
  0x4c   : > { %722 = vperm.xlu0 %2457, %v716_v25   ;;  %1169 = vperm.xlu1 %2442, %v929_v22  }
  0x50   : > { %727 = vperm.xlu0 %2457, %v717_v26   ;;  %2443 = vset.pattern.permute.xlu1 %v2590_v20 }
  0x51   : > { %1351 = vperm.xlu1 %2443, %v2700_v0  }
  0x54   : > { %763 = vperm.xlu0 %2457, %v753_v27  }
  0x55   : > { %2445 = vset.pattern.permute.xlu1 %v2589_v19 }
  0x56   : > { %1266 = vperm.xlu1 %2445, %v929_v22  }
  0x58   : > { %768 = vperm.xlu0 %2457, %v754_v28  }
  0x5a   : > { %2446 = vset.pattern.permute.xlu1 %v2590_v20 }
  0x5b   : > { %1359 = vperm.xlu1 %2446, %v2736_v11  }
  0x5c   : > { %932 = vperm.xlu0 %2457, %v2700_v0  }
  0x5f   : > { %2448 = vset.pattern.permute.xlu1 %v2591_v21 }
  0x60   : > { %947 = vperm.xlu0 %2457, %v929_v22   ;;  %1452 = vperm.xlu1 %2448, %v2760_v16  }
  0x64   : > { %1744 = vperm.xlu0 %2457, %v1738_v29   ;;  %2449 = vset.pattern.permute.xlu1 %v2590_v20 }
  0x65   : > { %1363 = vperm.xlu1 %2449, %v929_v22  }
  0x68   : > { %1754 = vperm.xlu0 %2457, %v1740_v30  }
  0x69   : > { %2450 = vset.pattern.permute.xlu1 %v2592_v23 }
  0x6a   : > { %1545 = vperm.xlu1 %2450, %v2700_v0  }
  0x6c   : > { %1785 = vperm.xlu0 %2457, %v1775_v31  }
  0x6e   : > { %2452 = vset.pattern.permute.xlu1 %v2591_v21 }
  0x6f   : > { %1460 = vperm.xlu1 %2452, %v929_v22  }
  0x73   : > { %2453 = vset.pattern.permute.xlu1 %v2592_v23 }
  0x74   : > { %1553 = vperm.xlu1 %2453, %v2736_v11  }
  0x78   : > { %2455 = vset.pattern.permute.xlu1 %v2593_v24 }
  0x79   : > { %1646 = vperm.xlu1 %2455, %v2760_v16  }
  0x7d   : > { %2456 = vset.pattern.permute.xlu1 %v2592_v23 }
  0x7e   : > { %1557 = vperm.xlu1 %2456, %v929_v22  }
  0x82   : > { %2458 = vset.pattern.permute.xlu1 %v2593_v24 }
  0x83   : > { %1654 = vperm.xlu1 %2458, %v929_v22  }
  0x87   : > { %2459 = vset.pattern.permute.xlu1 %v2586_v4 }
  0x88   : > { %937 = vperm.xlu1 %2459, %v2760_v16  }
  0x8c   : > { %942 = vperm.xlu1 %2459, %v2736_v11  }
  0x8f   : > { %v2828_v34 = vpop.permute.xlu0 %963 }
  0x90   : > { %1749 = vperm.xlu1 %2459, %v1739_v32  }
  0x91   : > { %v2830_v35 = vpop.permute.xlu1 %732 }
  0x94   : > { %1780 = vperm.xlu1 %2459, %v1774_v33   ;;  %v2832_v36 = vpop.permute.xlu0 %1060 }
  0x95   : > { %v759_v37 = vpop.permute.xlu1 %758 }
  0x9b   : > { %v2834_v38 = vpop.permute.xlu0 %1068  ;;  %v2836_v39 = vpop.permute.xlu1 %737 }
  0x9f   : > { %v2840_v41 = vpop.permute.xlu1 %773 }
  0xa1   : > { %v2838_v40 = vpop.permute.xlu0 %1161 }
  0xa4   : > { %v2844_v43 = vpop.permute.xlu1 %967 }
  0xa6   : > { %v2842_v42 = vpop.permute.xlu0 %1254 }
  0xa8   : > { %v2848_v45 = vpop.permute.xlu1 %971 }
  0xaa   : > { %v2846_v44 = vpop.permute.xlu0 %1262 }
  0xad   : > { %v2852_v47 = vpop.permute.xlu1 %1064 }
  0xaf   : > { %v2850_v46 = vpop.permute.xlu0 %1355 }
  0xb2   : > { %v2856_v49 = vpop.permute.xlu1 %975 }
  0xb4   : > { %v2854_v48 = vpop.permute.xlu0 %1448 }
  0xb7   : > { %v2860_v51 = vpop.permute.xlu1 %1157 }
  0xb8   : > { %v2858_v50 = vpop.permute.xlu0 %1456 }
  0xbc   : > { %v2864_v53 = vpop.permute.xlu1 %1072 }
  0xbd   : > { %v2862_v52 = vpop.permute.xlu0 %1549 }
  0xc1   : > { %v2868_v55 = vpop.permute.xlu1 %1165 }
  0xc2   : > { %v2866_v54 = vpop.permute.xlu0 %1642 }
  0xc6   : > { %v2870_v56 = vpop.permute.xlu0 %1650  ;;  %v2872_v57 = vpop.permute.xlu1 %1258 }
  0xcb   : > { %v723_v58 = vpop.permute.xlu0 %722  ;;  %v2874_v59 = vpop.permute.xlu1 %1169 }
  0xcf   : > { %v728_v60 = vpop.permute.xlu0 %727 }
  0xd0   : > { %v2876_v61 = vpop.permute.xlu1 %1351 }
  0xd3   : > { %v764_v7 = vpop.permute.xlu0 %763 }
  0xd5   : > { %v2898_v26 = vpop.permute.xlu1 %1266 }
  0xec   : > { %v608_v62 = vpop.f32.mrb[0].mxu0  ;;  %v626_v63 = vpop.f32.mrb[0].mxu1 }
  0xed   : > { %v740_v0 = vmul.f32 %v723_v58, %v608_v62  ;;  %v749_v1 = vmul.f32 %v2836_v39, %v626_v63  ;;  %v610_v3 = vpop.f32.mrb[1].mxu0  ;;  %v628_v4 = vpop.f32.mrb[1].mxu1 }
  0xee   : > { %v741_v5 = vmul.f32 %v723_v58, %v610_v3  ;;  %v750_v6 = vmul.f32 %v2836_v39, %v628_v4  ;;  %v769_v62 = vpop.permute.xlu0 %768 }
  0xef   : > { %v2880_v8 = vadd.f32 %v759_v37, %v740_v0  ;;  %v2883_v9 = vadd.f32 %v2840_v41, %v749_v1 }
  0xf0   : > { %v2885_v10 = vadd.f32 %v759_v37, %v741_v5  ;;  %v2888_v11 = vadd.f32 %v2840_v41, %v750_v6  ;;  %v614_v12 = vpop.f32.mrb[2].mxu0  ;;  %v2370_v13 = vpop.f32.mrb[2].mxu1 }
  0xf1   : > { %v2323_v14 = vmul.f32 -1.442695, %v2880_v8  ;;  %v2332_v15 = vmul.f32 -1.442695, %v2883_v9  ;;  %v743_v16 = vmul.f32 %v728_v60, %v614_v12  ;;  %v745_v17 = vmul.f32 %v2370_v13, %v728_v60  ;;  %v616_v18 = vpop.f32.mrb[3].mxu0  ;;  %v697_v19 = vpop.f32.mrb[3].mxu1 }
  0xf2   : > { %v2324_v20 = vmul.f32 -1.442695, %v2885_v10  ;;  %v2333_v21 = vmul.f32 -1.442695, %v2888_v11  ;;  %v744_v22 = vmul.f32 %v728_v60, %v616_v18  ;;  %v742_v23 = vmul.f32 %v723_v58, %v697_v19 }
  0xf3   : > { %2460 = vpow2.f32 %v2323_v14  ;;  %v2894_v24 = vadd.f32 %v764_v7, %v743_v16  ;;  %v2896_v25 = vadd.f32 %v764_v7, %v745_v17 }
  0xf4   : > { %2462 = vpow2.f32 %v2332_v15  ;;  %v2900_v27 = vadd.f32 %v764_v7, %v744_v22  ;;  %v2902_v28 = vadd.f32 %v759_v37, %v742_v23  ;;  %v620_v29 = vpop.f32.mrb[4].mxu0  ;;  %v2373_v30 = vpop.f32.mrb[4].mxu1  ;;  %v874_v15 = vlaneseq }
  0xf5   : > { %2464 = vpow2.f32 %v2324_v20  ;;  %v2326_v31 = vmul.f32 -1.442695, %v2894_v24  ;;  %v2328_v32 = vmul.f32 -1.442695, %v2896_v25  ;;  %v746_v33 = vmul.f32 %v2830_v35, %v620_v29  ;;  %v622_v58 = vpop.f32.mrb[5].mxu0  ;;  %v707_v60 = vpop.f32.mrb[5].mxu1 }
  0xf6   : > { %2466 = vpow2.f32 %v2333_v21  ;;  %v2327_v63 = vmul.f32 -1.442695, %v2900_v27  ;;  %v2325_v0 = vmul.f32 -1.442695, %v2902_v28  ;;  %v751_v37 = vmul.f32 %v2373_v30, %v2836_v39 }
  0xf7   : > { %2468 = vpow2.f32 %v2326_v31  ;;  %v2910_v1 = vadd.f32 %v769_v62, %v746_v33  ;;  %v747_v3 = vmul.f32 %v2830_v35, %v622_v58  ;;  %v748_v4 = vmul.f32 %v2830_v35, %v707_v60  ;;  %v2925_v35 = vpop.permute.xlu1 %1359 }
  0xf8   : > { %2470 = vpow2.f32 %v2328_v32  ;;  %v2915_v5 = vadd.f32 %v2840_v41, %v751_v37  ;;  %v2927_v23 = vshrl.u32 %v874_v15, 7 }
  0xf9   : > { %2472 = vpow2.f32 %v2327_v63  ;;  %v2329_v6 = vmul.f32 -1.442695, %v2910_v1  ;;  %v2918_v7 = vadd.f32 %v769_v62, %v747_v3  ;;  %v2920_v12 = vadd.f32 %v769_v62, %v748_v4  ;;  %v872_v4 = vld [vmem:[%s3803_s4] sm:$0x7] }
  0xfa   : > { %2474 = vpow2.f32 %v2325_v0  ;;  %v2334_v39 = vmul.f32 -1.442695, %v2915_v5  ;;  %3826 = vst [vmem:[#allocation3_spill] sm:$0xff] %v2927_v23  ;;  %v2932_v0 = vsub.s32 0, %v2927_v23 }
  0xfb   : > { %2476 = vpow2.f32 %v2329_v6  ;;  %v2330_v13 = vmul.f32 -1.442695, %v2918_v7  ;;  %v2331_v14 = vmul.f32 -1.442695, %v2920_v12  ;;  %v2929_v30 = vpop.permute.xlu1 %1452 }
  0xfc   : > { %2478 = vpow2.f32 %v2334_v39  ;;  %3827 = vst [vmem:[#allocation4_spill] sm:$0xff] %v2932_v0 }
  0xfd   : > { %v2461_v41 = vpop.eup %2460  ;;  %2480 = vpow2.f32 %v2330_v13  ;;  %v3817_v13 = vsub.s32 1, %v2927_v23 }
  0xfe   : > { %v2463_v16 = vpop.eup %2462  ;;  %v824_v17 = vadd.f32 1.0, %v2461_v41  ;;  %2482 = vpow2.f32 %v2331_v14 }
  0xff   : > { %v2465_v18 = vpop.eup %2464  ;;  %v833_v19 = vadd.f32 1.0, %v2463_v16  ;;  %v2938_v41 = vpop.permute.xlu1 %1363 }
 0x100   : > { %v2467_v20 = vpop.eup %2466  ;;  %2484 = vrcp.f32 %v824_v17  ;;  %v825_v21 = vadd.f32 1.0, %v2465_v18  ;;  %v877_v17 = vrot.slane %v872_v4, %v2932_v0 }
 0x101   : > { %v2469_v22 = vpop.eup %2468  ;;  %2486 = vrcp.f32 %v833_v19  ;;  %v834_v29 = vadd.f32 1.0, %v2467_v20  ;;  %v3818_v20 = vsub.s32 2, %v2927_v23 }
 0x102   : > { %v2471_v31 = vpop.eup %2470  ;;  %2488 = vrcp.f32 %v825_v21  ;;  %v827_v32 = vadd.f32 1.0, %v2469_v22 }
 0x103   : > { %v2473_v33 = vpop.eup %2472  ;;  %2490 = vrcp.f32 %v834_v29  ;;  %v829_v58 = vadd.f32 1.0, %v2471_v31  ;;  %v881_v29 = vrot.slane %v872_v4, %v3817_v13 }
 0x104   : > { %v2475_v60 = vpop.eup %2474  ;;  %2492 = vrcp.f32 %v827_v32  ;;  %v828_v62 = vadd.f32 1.0, %v2473_v33 }
 0x105   : > { %v2477_v63 = vpop.eup %2476  ;;  %2494 = vrcp.f32 %v829_v58  ;;  %v826_v37 = vadd.f32 1.0, %v2475_v60 }
 0x106   : > { %v2479_v3 = vpop.eup %2478  ;;  %2496 = vrcp.f32 %v828_v62  ;;  %v830_v6 = vadd.f32 1.0, %v2477_v63  ;;  %v2949_v62 = vpop.permute.xlu1 %1545 }
 0x107   : > { %v2481_v39 = vpop.eup %2480  ;;  %2498 = vrcp.f32 %v826_v37  ;;  %v835_v14 = vadd.f32 1.0, %v2479_v3 }
 0x108   : > { %v2483_v15 = vpop.eup %2482  ;;  %2500 = vrcp.f32 %v830_v6  ;;  %v831_v16 = vadd.f32 1.0, %v2481_v39 }
 0x109   : > { %2502 = vrcp.f32 %v835_v14  ;;  %v832_v18 = vadd.f32 1.0, %v2483_v15 }
 0x10a   : > { %v2485_v19 = vpop.eup %2484  ;;  %2504 = vrcp.f32 %v831_v16 }
 0x10b   : > { %v2487_v21 = vpop.eup %2486  ;;  %v860_v22 = vmul.f32 %v2485_v19, %v2880_v8  ;;  %2506 = vrcp.f32 %v832_v18  ;;  %v885_v8 = vrot.slane %v872_v4, %v3818_v20 }
 0x10c   : > { %v2489_v31 = vpop.eup %2488  ;;  %v869_v32 = vmul.f32 %v2487_v21, %v2883_v9 }
 0x10d   : > { %v2491_v33 = vpop.eup %2490  ;;  %v2946_v58 = vmul.f32 %v877_v17, %v860_v22  ;;  %v861_v60 = vmul.f32 %v2489_v31, %v2885_v10 }
 0x10e   : > { %v2493_v63 = vpop.eup %2492  ;;  %v2951_v37 = vmul.f32 %v877_v17, %v869_v32  ;;  %v870_v3 = vmul.f32 %v2491_v33, %v2888_v11  ;;  %v2975_v33 = vpop.permute.xlu1 %1460 }
 0x10f   : > { %v2495_v6 = vpop.eup %2494  ;;  %v2956_v39 = vmul.f32 %v881_v29, %v861_v60  ;;  %v863_v9 = vmul.f32 %v2493_v63, %v2894_v24  ;;  %v1075_v14 = vmul.f32 %v2832_v36, %v2946_v58  ;;  %v978_v10 = vmul.f32 %v2828_v34, %v2946_v58 }
 0x110   : > { %v2497_v15 = vpop.eup %2496  ;;  %v2963_v16 = vmul.f32 %v881_v29, %v870_v3  ;;  %v865_v18 = vmul.f32 %v2495_v6, %v2896_v25  ;;  %v1472_v6 = vmul.f32 %v2975_v33, %v2951_v37 }
 0x111   : > { %v2499_v11 = vpop.eup %2498  ;;  %v2966_v19 = vmul.f32 %v877_v17, %v863_v9  ;;  %v864_v4 = vmul.f32 %v2497_v15, %v2900_v27  ;;  %1099 = vrot.lane.b32.xlu0 %v1075_v14, %s2594_s26  ;;  %1002 = vrot.lane.b32.xlu1 %v978_v10, %s2595_s28  ;;  %v987_v27 = vmul.f32 %v2856_v49, %v2951_v37 }
 0x112   : > { %v2501_v24 = vpop.eup %2500  ;;  %v894_v21 = vmul.f32 %v885_v8, %v865_v18  ;;  %v862_v22 = vmul.f32 %v2499_v11, %v2902_v28  ;;  %v1173_v18 = vmul.f32 %v2860_v51, %v2956_v39  ;;  %v1181_v11 = vmul.f32 %v2874_v59, %v2951_v37 }
 0x113   : > { %v2503_v31 = vpop.eup %2502  ;;  %v2972_v32 = vmul.f32 %v881_v29, %v864_v4  ;;  %v866_v25 = vmul.f32 %v2501_v24, %v2910_v1  ;;  %v1085_v4 = vmul.f32 %v2864_v53, %v2963_v16  ;;  %v1366_v24 = vmul.f32 %v2876_v61, %v2946_v58 }
 0x114   : > { %v2505_v60 = vpop.eup %2504  ;;  %907 = vst.msk [vmem:[#allocation2 + $0x28] sm:$0xff] %vm903_vm1, %v894_v21  ;;  %v891_v63 = vmul.f32 %v885_v8, %v862_v22  ;;  %v871_v3 = vmul.f32 %v2503_v31, %v2915_v5  ;;  %v1172_v5 = vmul.f32 %v2860_v51, %v2946_v58  ;;  %v1270_v21 = vmul.f32 %v2842_v42, %v2956_v39 }
 0x115   : > { %v2507_v28 = vpop.eup %2506  ;;  %v2983_v9 = vmul.f32 %v877_v17, %v866_v25  ;;  %v867_v14 = vmul.f32 %v2505_v60, %v2918_v7  ;;  %1020 = vrot.lane.b32.xlu0 %v987_v27, %s2595_s28  ;;  %1505 = vrot.lane.b32.xlu1 %v1472_v6, %s2596_s29  ;;  %v1076_v7 = vmul.f32 %v2832_v36, %v2956_v39 }
 0x116   : > { %904 = vst.msk [vmem:[#allocation2 + $0x10] sm:$0xff] %vm903_vm1, %v891_v63  ;;  %v900_v1 = vmul.f32 %v885_v8, %v871_v3  ;;  %v868_v10 = vmul.f32 %v2507_v28, %v2920_v12  ;;  %v1084_v12 = vmul.f32 %v2864_v53, %v2951_v37  ;;  %v1278_v22 = vmul.f32 %v2898_v26, %v2951_v37 }
 0x117   : > { %v2990_v15 = vmul.f32 %v881_v29, %v867_v14  ;;  %v988_v29 = vmul.f32 %v2856_v49, %v2963_v16  ;;  %v1182_v31 = vmul.f32 %v2874_v59, %v2963_v16  ;;  %v1463_v25 = vmul.f32 %v2854_v48, %v2946_v58 }
 0x118   : > { %913 = vst.msk [vmem:[#allocation2 + $0x58] sm:$0xff] %vm903_vm1, %v900_v1  ;;  %v897_v17 = vmul.f32 %v885_v8, %v868_v10  ;;  %v1269_v8 = vmul.f32 %v2842_v42, %v2946_v58  ;;  %v1367_v27 = vmul.f32 %v2876_v61, %v2956_v39  ;;  %v1375_v60 = vmul.f32 %v2938_v41, %v2951_v37 }
 0x119   : > { %1196 = vrot.lane.b32.xlu0 %v1172_v5, %s2597_s30  ;;  %1101 = vrot.lane.b32.xlu1 %v1076_v7, %s2594_s26  ;;  %v1279_v63 = vmul.f32 %v2898_v26, %v2963_v16  ;;  %v1560_v3 = vmul.f32 %v2949_v62, %v2946_v58  ;;  %v1464_v6 = vmul.f32 %v2854_v48, %v2956_v39 }
 0x11a   : > { %910 = vst.msk [vmem:[#allocation2 + $0x40] sm:$0xff] %vm903_vm1, %v897_v17  ;;  %v979_v28 = vmul.f32 %v2828_v34, %v2956_v39  ;;  %v1376_v14 = vmul.f32 %v2938_v41, %v2963_v16  ;;  %v1473_v1 = vmul.f32 %v2975_v33, %v2963_v16  ;;  %v1561_v10 = vmul.f32 %v2949_v62, %v2956_v39 }
 0x11b   : > { %v981_v5 = vmul.f32 %v2844_v43, %v2966_v19  ;;  %v3062_v17 = vld [vmem:[#allocation2 + $0x28] sm:$0xff]  ;;  %v1078_v7 = vmul.f32 %v2852_v47, %v2966_v19 }
 0x11d   : > { %1117 = vrot.lane.b32.xlu0 %v1084_v12, %s2594_s26  ;;  %1022 = vrot.lane.b32.xlu1 %v988_v29, %s2595_s28  ;;  %v983_v12 = vmul.f32 %v2844_v43, %v3062_v17  ;;  %v1080_v29 = vmul.f32 %v2852_v47, %v3062_v17 }
 0x121   : > { %1293 = vrot.lane.b32.xlu0 %v1269_v8, %s2598_s17  ;;  %1198 = vrot.lane.b32.xlu1 %v1173_v18, %s2597_s30  ;;  %v3072_v8 = vld [vmem:[#allocation2 + $0x10] sm:$0xff] }
 0x122   : > { %v1077_v18 = vmul.f32 %v2832_v36, %v3072_v8  ;;  %v1174_v36 = vmul.f32 %v2860_v51, %v3072_v8 }
 0x125   : > { %1214 = vrot.lane.b32.xlu0 %v1181_v11, %s2597_s30  ;;  %1119 = vrot.lane.b32.xlu1 %v1085_v4, %s2594_s26  ;;  %v1175_v11 = vmul.f32 %v2838_v40, %v2966_v19  ;;  %v1079_v4 = vmul.f32 %v2852_v47, %v2972_v32  ;;  %v1176_v47 = vmul.f32 %v2838_v40, %v2972_v32 }
 0x129   : > { %1390 = vrot.lane.b32.xlu0 %v1366_v24, %s2599_s18  ;;  %1295 = vrot.lane.b32.xlu1 %v1270_v21, %s2598_s17  ;;  %v1177_v24 = vmul.f32 %v2838_v40, %v3062_v17  ;;  %v1272_v21 = vmul.f32 %v2872_v57, %v2966_v19  ;;  %v1273_v40 = vmul.f32 %v2872_v57, %v2972_v32 }
 0x12d   : > { %1311 = vrot.lane.b32.xlu0 %v1278_v22, %s2598_s17  ;;  %1216 = vrot.lane.b32.xlu1 %v1182_v31, %s2597_s30  ;;  %v3092_v22 = vpop.permute.xlu1 %1553  ;;  %v1274_v31 = vmul.f32 %v2872_v57, %v3062_v17  ;;  %v3124_v57 = vpop.permute.xlu0 %932 }
 0x131   : > { %1487 = vrot.lane.b32.xlu0 %v1463_v25, %s2596_s29  ;;  %1392 = vrot.lane.b32.xlu1 %v1367_v27, %s2599_s18  ;;  %v3102_v51 = vpop.permute.xlu1 %1646  ;;  %v1271_v25 = vmul.f32 %v2842_v42, %v3072_v8  ;;  %v1369_v27 = vmul.f32 %v2850_v46, %v2966_v19  ;;  %v1368_v42 = vmul.f32 %v2876_v61, %v3072_v8 }
 0x132   : > { %v1465_v61 = vmul.f32 %v2854_v48, %v3072_v8 }
 0x135   : > { %1408 = vrot.lane.b32.xlu0 %v1375_v60, %s2599_s18  ;;  %1313 = vrot.lane.b32.xlu1 %v1279_v63, %s2598_s17  ;;  %v1371_v60 = vmul.f32 %v2850_v46, %v3062_v17  ;;  %v3114_v63 = vpop.permute.xlu1 %1557 }
 0x139   : > { %1584 = vrot.lane.b32.xlu0 %v1560_v3, %s2600_s19  ;;  %1489 = vrot.lane.b32.xlu1 %v1464_v6, %s2596_s29  ;;  %v1466_v3 = vmul.f32 %v2929_v30, %v2966_v19  ;;  %v3126_v6 = vpop.permute.xlu1 %1654 }
 0x13d   : > { %1004 = vrot.lane.b32.xlu0 %v979_v28, %s2595_s28  ;;  %1410 = vrot.lane.b32.xlu1 %v1376_v14, %s2599_s18  ;;  %v1370_v28 = vmul.f32 %v2850_v46, %v2972_v32  ;;  %v1468_v14 = vmul.f32 %v2929_v30, %v3062_v17  ;;  %v1467_v46 = vmul.f32 %v2929_v30, %v2972_v32 }
 0x13e   : > { %v1564_v30 = vmul.f32 %v2862_v52, %v2972_v32 }
 0x141   : > { %1507 = vrot.lane.b32.xlu0 %v1473_v1, %s2596_s29  ;;  %1586 = vrot.lane.b32.xlu1 %v1561_v10, %s2600_s19  ;;  %v1563_v1 = vmul.f32 %v2862_v52, %v2966_v19  ;;  %v3138_v10 = vpop.permute.xlu0 %947 }
 0x145   : > { %1008 = vrot.lane.b32.xlu0 %v981_v5, %s2595_s28  ;;  %1105 = vrot.lane.b32.xlu1 %v1078_v7, %s2594_s26  ;;  %v3140_v5 = vpop.permute.xlu1 %937  ;;  %v1565_v7 = vmul.f32 %v2862_v52, %v3062_v17  ;;  %v3150_v48 = vpop.permute.xlu0 %1744 }
 0x149   : > { %1012 = vrot.lane.b32.xlu0 %v983_v12, %s2595_s28  ;;  %1109 = vrot.lane.b32.xlu1 %v1080_v29, %s2594_s26  ;;  %v3152_v12 = vpop.permute.xlu1 %942  ;;  %v1562_v29 = vmul.f32 %v2949_v62, %v3072_v8  ;;  %v984_v62 = vmul.f32 %v2848_v45, %v2983_v9 }
 0x14d   : > { %1103 = vrot.lane.b32.xlu0 %v1077_v18, %s2594_s26  ;;  %1202 = vrot.lane.b32.xlu1 %v1175_v11, %s2597_s30  ;;  %v980_v18 = vmul.f32 %v2828_v34, %v3072_v8  ;;  %v3162_v11 = vpop.permute.xlu1 %1749 }
 0x151   : > { %1107 = vrot.lane.b32.xlu0 %v1079_v4, %s2594_s26  ;;  %1206 = vrot.lane.b32.xlu1 %v1177_v24, %s2597_s30  ;;  %v3164_v4 = vld [vmem:[#allocation2 + $0x58] sm:$0xff]  ;;  %v982_v24 = vmul.f32 %v2844_v43, %v2972_v32  ;;  %v3177_v52 = vpop.permute.xlu1 %1780 }
 0x152   : > { %v989_v34 = vmul.f32 %v2856_v49, %v3164_v4  ;;  %v1086_v43 = vmul.f32 %v2864_v53, %v3164_v4 }
 0x155   : > { %1200 = vrot.lane.b32.xlu0 %v1174_v36, %s2597_s30  ;;  %1299 = vrot.lane.b32.xlu1 %v1272_v21, %s2598_s17  ;;  %v3168_v36 = vpop.permute.xlu0 %1754 }
 0x156   : > { %3828 = vst [vmem:[#allocation5_spill] sm:$0xff] %v3168_v36 }
 0x159   : > { %1204 = vrot.lane.b32.xlu0 %v1176_v47, %s2597_s30  ;;  %1303 = vrot.lane.b32.xlu1 %v1274_v31, %s2598_s17  ;;  %v3180_v21 = vpop.permute.xlu0 %1785  ;;  %v1081_v47 = vmul.f32 %v2834_v38, %v2983_v9 }
 0x15d   : > { %1297 = vrot.lane.b32.xlu0 %v1271_v25, %s2598_s17  ;;  %1396 = vrot.lane.b32.xlu1 %v1369_v27, %s2599_s18  ;;  %v1183_v25 = vmul.f32 %v2874_v59, %v3164_v4  ;;  %v1178_v27 = vmul.f32 %v2868_v55, %v2983_v9  ;;  %v1377_v59 = vmul.f32 %v2938_v41, %v3164_v4 }
 0x15e   : > { %v1469_v41 = vmul.f32 %v2858_v50, %v2983_v9 }
 0x161   : > { %1301 = vrot.lane.b32.xlu0 %v1273_v40, %s2598_s17  ;;  %1400 = vrot.lane.b32.xlu1 %v1371_v60, %s2599_s18  ;;  %v1280_v40 = vmul.f32 %v2898_v26, %v3164_v4  ;;  %v1566_v26 = vmul.f32 %v3092_v22, %v2983_v9 }
 0x165   : > { %1394 = vrot.lane.b32.xlu0 %v1368_v42, %s2599_s18  ;;  %1493 = vrot.lane.b32.xlu1 %v1466_v3, %s2596_s29  ;;  %v1275_v42 = vmul.f32 %v2846_v44, %v2983_v9 }
 0x169   : > { %1398 = vrot.lane.b32.xlu0 %v1370_v28, %s2599_s18  ;;  %1497 = vrot.lane.b32.xlu1 %v1468_v14, %s2596_s29  ;;  %v1372_v28 = vmul.f32 %v2925_v35, %v2983_v9 }
 0x16d   : > { %1491 = vrot.lane.b32.xlu0 %v1465_v61, %s2596_s29  ;;  %1590 = vrot.lane.b32.xlu1 %v1563_v1, %s2600_s19 }
 0x171   : > { %1495 = vrot.lane.b32.xlu0 %v1467_v46, %s2596_s29  ;;  %1594 = vrot.lane.b32.xlu1 %v1565_v7, %s2600_s19  ;;  %v985_v7 = vmul.f32 %v2848_v45, %v2990_v15 }
 0x175   : > { %1588 = vrot.lane.b32.xlu0 %v1562_v29, %s2600_s19  ;;  %1006 = vrot.lane.b32.xlu1 %v980_v18, %s2595_s28  ;;  %v1474_v29 = vmul.f32 %v2975_v33, %v3164_v4 }
 0x179   : > { %1592 = vrot.lane.b32.xlu0 %v1564_v30, %s2600_s19  ;;  %1010 = vrot.lane.b32.xlu1 %v982_v24, %s2595_s28  ;;  %v3232_v30 = vld [vmem:[#allocation2 + $0x40] sm:$0xff] }
 0x17d   : > { %1024 = vrot.lane.b32.xlu0 %v989_v34, %s2595_s28  ;;  %1014 = vrot.lane.b32.xlu1 %v984_v62, %s2595_s28  ;;  %v1082_v34 = vmul.f32 %v2834_v38, %v2990_v15 }
 0x181   : > { %1121 = vrot.lane.b32.xlu0 %v1086_v43, %s2594_s26  ;;  %1111 = vrot.lane.b32.xlu1 %v1081_v47, %s2594_s26  ;;  %v986_v43 = vmul.f32 %v2848_v45, %v3232_v30  ;;  %v1179_v47 = vmul.f32 %v2868_v55, %v2990_v15  ;;  %v1276_v45 = vmul.f32 %v2846_v44, %v2990_v15 }
 0x183   : > { %v3188_v49 = vpop.permute.xlu0 %1099  ;;  %v3190_v31 = vpop.permute.xlu1 %1002 }
 0x185   : > { %1218 = vrot.lane.b32.xlu0 %v1183_v25, %s2597_s30  ;;  %1208 = vrot.lane.b32.xlu1 %v1178_v27, %s2597_s30  ;;  %v1083_v27 = vmul.f32 %v2834_v38, %v3232_v30  ;;  %v1373_v38 = vmul.f32 %v2925_v35, %v2990_v15 }
 0x187   : > { %v1021_v53 = vpop.permute.xlu0 %1020  ;;  %v3200_v60 = vpop.permute.xlu1 %1505 }
 0x189   : > { %1315 = vrot.lane.b32.xlu0 %v1280_v40, %s2598_s17  ;;  %1305 = vrot.lane.b32.xlu1 %v1275_v42, %s2598_s17 }
 0x18b   : > { %v3208_v3 = vpop.permute.xlu0 %1196  ;;  %v3212_v14 = vpop.permute.xlu1 %1101 }
 0x18d   : > { %1412 = vrot.lane.b32.xlu0 %v1377_v59, %s2599_s18  ;;  %1402 = vrot.lane.b32.xlu1 %v1372_v28, %s2599_s18  ;;  %v1180_v59 = vmul.f32 %v2868_v55, %v3232_v30 }
 0x18f   : > { %v1118_v61 = vpop.permute.xlu0 %1117  ;;  %v3218_v1 = vpop.permute.xlu1 %1022 }
 0x190   : > { %v1033_v55 = vsel %vm1026_vm2, %v1021_v53, %v3218_v1  ;;  %v1568_v53 = vmul.f32 %v3092_v22, %v3232_v30 }
 0x191   : > { %1596 = vrot.lane.b32.xlu0 %v1566_v26, %s2600_s19  ;;  %1499 = vrot.lane.b32.xlu1 %v1469_v41, %s2596_s29  ;;  %v1277_v41 = vmul.f32 %v2846_v44, %v3232_v30 }
 0x193   : > { %v3224_v46 = vpop.permute.xlu0 %1293  ;;  %v3230_v18 = vpop.permute.xlu1 %1198 }
 0x195   : > { %1016 = vrot.lane.b32.xlu0 %v985_v7, %s2595_s28  ;;  %1509 = vrot.lane.b32.xlu1 %v1474_v29, %s2596_s29  ;;  %v1470_v29 = vmul.f32 %v2858_v50, %v2990_v15 }
 0x197   : > { %v1215_v24 = vpop.permute.xlu0 %1214  ;;  %v3238_v62 = vpop.permute.xlu1 %1119 }
 0x198   : > { %v1130_v44 = vsel %vm1123_vm3, %v1118_v61, %v3238_v62  ;;  %v1471_v61 = vmul.f32 %v2858_v50, %v3232_v30  ;;  %v1567_v50 = vmul.f32 %v3092_v22, %v2990_v15 }
 0x199   : > { %1113 = vrot.lane.b32.xlu0 %v1082_v34, %s2594_s26  ;;  %1018 = vrot.lane.b32.xlu1 %v986_v43, %s2595_s28  ;;  %v1374_v34 = vmul.f32 %v2925_v35, %v3232_v30  ;;  %v959_v43 = vmul.f32 %v3138_v10, %v2951_v37 }
 0x19b   : > { %v3244_v33 = vpop.permute.xlu0 %1390  ;;  %v3248_v25 = vpop.permute.xlu1 %1295 }
 0x19d   : > { %1210 = vrot.lane.b32.xlu0 %v1179_v47, %s2597_s30  ;;  %1115 = vrot.lane.b32.xlu1 %v1083_v27, %s2594_s26  ;;  %v1056_v27 = vadd.f32 %v1033_v55, %v959_v43  ;;  %v1658_v43 = vmul.f32 %v2866_v54, %v2956_v39 }
 0x19f   : > { %v1312_v40 = vpop.permute.xlu0 %1311  ;;  %v3256_v42 = vpop.permute.xlu1 %1216 }
 0x1a0   : > { %v1227_v35 = vsel %vm1220_vm4, %v1215_v24, %v3256_v42  ;;  %v950_v24 = vmul.f32 %v3124_v57, %v2946_v58 }
 0x1a1   : > { %1307 = vrot.lane.b32.xlu0 %v1276_v45, %s2598_s17  ;;  %1212 = vrot.lane.b32.xlu1 %v1180_v59, %s2597_s30  ;;  %v1153_v59 = vadd.f32 %v1130_v44, %v1056_v27 }
 0x1a3   : > { %v1488_v28 = vpop.permute.xlu0 %1487  ;;  %v3264_v26 = vpop.permute.xlu1 %1392 }
 0x1a5   : > { %1404 = vrot.lane.b32.xlu0 %v1373_v38, %s2599_s18  ;;  %1309 = vrot.lane.b32.xlu1 %v1277_v41, %s2598_s17 }
 0x1a7   : > { %v1409_v7 = vpop.permute.xlu0 %1408  ;;  %v3278_v47 = vpop.permute.xlu1 %1313 }
 0x1a8   : > { %v1324_v41 = vsel %vm1317_vm6, %v1312_v40, %v3278_v47 }
 0x1a9   : > { %1501 = vrot.lane.b32.xlu0 %v1470_v29, %s2596_s29  ;;  %1406 = vrot.lane.b32.xlu1 %v1374_v34, %s2599_s18  ;;  %v1250_v29 = vadd.f32 %v1227_v35, %v1153_v59  ;;  %v1124_v35 = vsel %vm1123_vm3, %v3188_v49, %v3212_v14  ;;  %v1660_v59 = vmul.f32 %v3102_v51, %v2966_v19 }
 0x1aa   : > { %v1657_v49 = vmul.f32 %v2866_v54, %v2946_v58  ;;  %v1415_v58 = vsel %vm1414_vm7, %v3244_v33, %v3264_v26  ;;  %v1661_v33 = vmul.f32 %v3102_v51, %v2972_v32 }
 0x1ab   : > { %v1585_v45 = vpop.permute.xlu0 %1584  ;;  %v3288_v38 = vpop.permute.xlu1 %1489  ;;  %v1347_v40 = vadd.f32 %v1324_v41, %v1250_v29 }
 0x1ac   : > { %v1512_v55 = vsel %vm1511_vm5, %v1488_v28, %v3288_v38 }
 0x1ad   : > { %1600 = vrot.lane.b32.xlu0 %v1568_v53, %s2600_s19  ;;  %1503 = vrot.lane.b32.xlu1 %v1471_v61, %s2596_s29 }
 0x1af   : > { %v3300_v34 = vpop.permute.xlu0 %1004  ;;  %v3306_v44 = vpop.permute.xlu1 %1410 }
 0x1b0   : > { %v1027_v28 = vsel %vm1026_vm2, %v3190_v31, %v3300_v34  ;;  %v1421_v27 = vsel %vm1414_vm7, %v1409_v7, %v3306_v44  ;;  %v1221_v7 = vsel %vm1220_vm4, %v3208_v3, %v3230_v18  ;;  %v1662_v3 = vmul.f32 %v3102_v51, %v3062_v17 }
 0x1b1   : > { %v1047_v53 = vadd.f32 %v1027_v28, %v950_v24  ;;  %1683 = vrot.lane.b32.xlu0 %v1658_v43, %s2601_s20  ;;  %v3317_v22 = vadd.f32 %v1421_v27, %v1347_v40  ;;  %1598 = vrot.lane.b32.xlu1 %v1567_v50, %s2600_s19  ;;  %v1318_v43 = vsel %vm1317_vm6, %v3224_v46, %v3248_v25 }
 0x1b2   : > { %v955_v46 = vmul.f32 %v3140_v5, %v3062_v17  ;;  %v1570_v17 = vmul.f32 %v3114_v63, %v2963_v16 }
 0x1b3   : > { %3829 = vst [vmem:[#allocation6_spill] sm:$0xff] %v3317_v22  ;;  %v1144_v31 = vadd.f32 %v1124_v35, %v1047_v53  ;;  %v3322_v61 = vpop.permute.xlu0 %1507  ;;  %v3327_v41 = vpop.permute.xlu1 %1586  ;;  %v1776_v53 = vld [vmem:[%s3806_s7 + $0x10] sm:$0xff] }
 0x1b4   : > { %v1609_v24 = vsel %vm1608_vm8, %v1585_v45, %v3327_v41  ;;  %v1659_v45 = vmul.f32 %v2866_v54, %v3072_v8 }
 0x1b5   : > { %v1241_v29 = vadd.f32 %v1221_v7, %v1144_v31  ;;  %1687 = vrot.lane.b32.xlu0 %v1660_v59, %s2601_s20  ;;  %1681 = vrot.lane.b32.xlu1 %v1657_v49, %s2601_s20 }
 0x1b7   : > { %v1338_v50 = vadd.f32 %v1318_v43, %v1241_v29  ;;  %v3340_v40 = vpop.permute.xlu0 %1008  ;;  %v1106_v28 = vpop.permute.xlu1 %1105 }
 0x1b9   : > { %v1435_v27 = vadd.f32 %v1415_v58, %v1338_v50  ;;  %1691 = vrot.lane.b32.xlu0 %v1662_v3, %s2601_s20  ;;  %1685 = vrot.lane.b32.xlu1 %v1659_v45, %s2601_s20  ;;  %v1569_v3 = vmul.f32 %v3114_v63, %v2951_v37 }
 0x1bb   : > { %v1532_v35 = vadd.f32 %v1512_v55, %v1435_v27  ;;  %v3354_v59 = vpop.permute.xlu0 %1012  ;;  %v1110_v31 = vpop.permute.xlu1 %1109  ;;  %v1741_v55 = vld [vmem:[%s3805_s6 + $0x18] sm:$0xff] }
 0x1bc   : > { %v1052_v54 = vadd.f32 %v3354_v59, %v955_v46 }
 0x1bd   : > { %v3359_v7 = vadd.f32 %v1609_v24, %v1532_v35  ;;  %1790 = vperm.xlu0 %2457, %v1776_v53   ;;  %1689 = vrot.lane.b32.xlu1 %v1661_v33, %s2601_s20  ;;  %v1663_v24 = vmul.f32 %v2870_v56, %v2983_v9  ;;  %v1665_v53 = vmul.f32 %v2870_v56, %v3232_v30 }
 0x1be   : > { %v1149_v49 = vadd.f32 %v1110_v31, %v1052_v54  ;;  %v1571_v35 = vmul.f32 %v3114_v63, %v3164_v4 }
 0x1bf   : > { %v3364_v29 = vpop.permute.xlu0 %1103  ;;  %v1203_v43 = vpop.permute.xlu1 %1202 }
 0x1c1   : > { %1604 = vrot.lane.b32.xlu0 %v1570_v17, %s2600_s19  ;;  %1759 = vperm.xlu1 %2459, %v1741_v55   ;;  %v1664_v55 = vmul.f32 %v2870_v56, %v2990_v15  ;;  %v1667_v56 = vmul.f32 %v3126_v6, %v2963_v16 }
 0x1c3   : > { %v1108_v51 = vpop.permute.xlu0 %1107  ;;  %v1207_v50 = vpop.permute.xlu1 %1206 }
 0x1c4   : > { %v3375_v58 = vsel %vm1123_vm3, %v1106_v28, %v1108_v51  ;;  %v3378_v45 = vsel %vm1123_vm3, %v1108_v51, %v1110_v31  ;;  %v1246_v27 = vadd.f32 %v1207_v50, %v1149_v49  ;;  %v1666_v28 = vmul.f32 %v3126_v6, %v2951_v37 }
 0x1c5   : > { %1693 = vrot.lane.b32.xlu0 %v1663_v24, %s2601_s20  ;;  %1602 = vrot.lane.b32.xlu1 %v1569_v3, %s2600_s19  ;;  %v1668_v51 = vmul.f32 %v3126_v6, %v3164_v4 }
 0x1c7   : > { %v1201_v46 = vpop.permute.xlu0 %1200  ;;  %v1300_v33 = vpop.permute.xlu1 %1299 }
 0x1c9   : > { %1697 = vrot.lane.b32.xlu0 %v1665_v53, %s2601_s20  ;;  %1606 = vrot.lane.b32.xlu1 %v1571_v35, %s2600_s19 }
 0x1cb   : > { %v1205_v31 = vpop.permute.xlu0 %1204  ;;  %v1304_v54 = vpop.permute.xlu1 %1303 }
 0x1cc   : > { %v3391_v49 = vsel %vm1220_vm4, %v1203_v43, %v1205_v31  ;;  %v3394_v17 = vsel %vm1220_vm4, %v1205_v31, %v1207_v50  ;;  %v1343_v63 = vadd.f32 %v1304_v54, %v1246_v27  ;;  %v1777_v43 = vld [vmem:[%s3806_s7 + $0x18] sm:$0xff] }
 0x1cd   : > { %1699 = vrot.lane.b32.xlu0 %v1666_v28, %s2601_s20  ;;  %1695 = vrot.lane.b32.xlu1 %v1664_v55, %s2601_s20 }
 0x1cf   : > { %v1298_v37 = vpop.permute.xlu0 %1297  ;;  %v1397_v24 = vpop.permute.xlu1 %1396 }
 0x1d1   : > { %1703 = vrot.lane.b32.xlu0 %v1668_v51, %s2601_s20  ;;  %1795 = vperm.xlu1 %2459, %v1777_v43  }
 0x1d3   : > { %v1302_v3 = vpop.permute.xlu0 %1301  ;;  %v1401_v50 = vpop.permute.xlu1 %1400 }
 0x1d4   : > { %v1320_v27 = vsel %vm1317_vm6, %v1300_v33, %v1302_v3  ;;  %v1321_v53 = vsel %vm1317_vm6, %v1302_v3, %v1304_v54  ;;  %v1440_v35 = vadd.f32 %v1401_v50, %v1343_v63 }
 0x1d5   : > { %1701 = vrot.lane.b32.xlu1 %v1667_v56, %s2601_s20 }
 0x1d7   : > { %v1395_v28 = vpop.permute.xlu0 %1394  ;;  %v1494_v31 = vpop.permute.xlu1 %1493 }
 0x1db   : > { %v1399_v55 = vpop.permute.xlu0 %1398  ;;  %v1498_v2 = vpop.permute.xlu1 %1497 }
 0x1dc   : > { %v1417_v13 = vsel %vm1414_vm7, %v1397_v24, %v1399_v55  ;;  %v1418_v51 = vsel %vm1414_vm7, %v1399_v55, %v1401_v50  ;;  %v1537_v43 = vadd.f32 %v1498_v2, %v1440_v35  ;;  %v952_v24 = vmul.f32 %v3124_v57, %v3072_v8 }
 0x1dd   : > { %v951_v35 = vmul.f32 %v3124_v57, %v2956_v39  ;;  %v953_v8 = vmul.f32 %v3140_v5, %v2966_v19  ;;  %v954_v39 = vmul.f32 %v3140_v5, %v2972_v32  ;;  %v1222_v57 = vsel %vm1220_vm4, %v3230_v18, %v1201_v46 }
 0x1de   : > { %v1319_v19 = vsel %vm1317_vm6, %v3248_v25, %v1298_v37  ;;  %v960_v32 = vmul.f32 %v3138_v10, %v2963_v16  ;;  %v961_v5 = vmul.f32 %v3138_v10, %v3164_v4  ;;  %v1416_v25 = vsel %vm1414_vm7, %v3264_v26, %v1395_v28 }
 0x1df   : > { %v1492_v20 = vpop.permute.xlu0 %1491  ;;  %v3413_v0 = vpop.permute.xlu1 %1590 }
 0x1e0   : > { %v1513_v6 = vsel %vm1511_vm5, %v3288_v38, %v1492_v20 }
 0x1e3   : > { %v1496_v33 = vpop.permute.xlu0 %1495  ;;  %v3417_v54 = vpop.permute.xlu1 %1594 }
 0x1e4   : > { %v1514_v63 = vsel %vm1511_vm5, %v1494_v31, %v1496_v33  ;;  %v1515_v3 = vsel %vm1511_vm5, %v1496_v33, %v1498_v2  ;;  %v3422_v56 = vadd.f32 %v3417_v54, %v1537_v43  ;;  %v1125_v2 = vsel %vm1123_vm3, %v3212_v14, %v3364_v29 }
 0x1e7   : > { %v3426_v50 = vpop.permute.xlu0 %1588  ;;  %v1007_v55 = vpop.permute.xlu1 %1006 }
 0x1e8   : > { %v1028_v38 = vsel %vm1026_vm2, %v3300_v34, %v1007_v55  ;;  %v1049_v23 = vadd.f32 %v1007_v55, %v952_v24  ;;  %v1610_v26 = vsel %vm1608_vm8, %v3327_v41, %v3426_v50 }
 0x1e9   : > { %v1048_v36 = vadd.f32 %v1028_v38, %v951_v35 }
 0x1ea   : > { %v1146_v31 = vadd.f32 %v3364_v29, %v1049_v23 }
 0x1eb   : > { %v1593_v43 = vpop.permute.xlu0 %1592  ;;  %v1145_v33 = vadd.f32 %v1125_v2, %v1048_v36  ;;  %v1011_v22 = vpop.permute.xlu1 %1010 }
 0x1ec   : > { %v1243_v34 = vadd.f32 %v1201_v46, %v1146_v31  ;;  %v1029_v24 = vsel %vm1026_vm2, %v3340_v40, %v1011_v22  ;;  %v1030_v14 = vsel %vm1026_vm2, %v1011_v22, %v3354_v59  ;;  %v1612_v41 = vsel %vm1608_vm8, %v1593_v43, %v3417_v54 }
 0x1ed   : > { %v1242_v23 = vadd.f32 %v1222_v57, %v1145_v33  ;;  %v1050_v29 = vadd.f32 %v1029_v24, %v953_v8  ;;  %v1051_v36 = vadd.f32 %v1030_v14, %v954_v39 }
 0x1ee   : > { %v1340_v35 = vadd.f32 %v1298_v37, %v1243_v34 }
 0x1ef   : > { %v1025_v18 = vpop.permute.xlu0 %1024  ;;  %v1339_v46 = vadd.f32 %v1319_v19, %v1242_v23  ;;  %v1147_v40 = vadd.f32 %v3375_v58, %v1050_v29  ;;  %v1148_v55 = vadd.f32 %v3378_v45, %v1051_v36  ;;  %v1015_v59 = vpop.permute.xlu1 %1014 }
 0x1f0   : > { %v1034_v22 = vsel %vm1026_vm2, %v3218_v1, %v1025_v18  ;;  %v1437_v37 = vadd.f32 %v1395_v28, %v1340_v35  ;;  %v1058_v2 = vadd.f32 %v1025_v18, %v961_v5  ;;  %v956_v18 = vmul.f32 %v3152_v12, %v2983_v9 }
 0x1f1   : > { %v1057_v38 = vadd.f32 %v1034_v22, %v960_v32  ;;  %v1436_v16 = vadd.f32 %v1416_v25, %v1339_v46  ;;  %v1244_v31 = vadd.f32 %v3391_v49, %v1147_v40  ;;  %v1245_v10 = vadd.f32 %v3394_v17, %v1148_v55 }
 0x1f2   : > { %v3460_v4 = vadd.f32 %v1492_v20, %v1437_v37 }
 0x1f3   : > { %v1122_v58 = vpop.permute.xlu0 %1121  ;;  %v1533_v33 = vadd.f32 %v1513_v6, %v1436_v16  ;;  %v1341_v45 = vadd.f32 %v1320_v27, %v1244_v31  ;;  %v1342_v8 = vadd.f32 %v1321_v53, %v1245_v10  ;;  %v1112_v39 = vpop.permute.xlu1 %1111 }
 0x1f4   : > { %v1131_v1 = vsel %vm1123_vm3, %v3238_v62, %v1122_v58  ;;  %v1155_v57 = vadd.f32 %v1122_v58, %v1058_v2  ;;  %v1611_v62 = vsel %vm1608_vm8, %v3413_v0, %v1593_v43 }
 0x1f5   : > { %v1154_v28 = vadd.f32 %v1131_v1, %v1057_v38  ;;  %v3467_v34 = vadd.f32 %v1610_v26, %v1533_v33  ;;  %v1438_v49 = vadd.f32 %v1417_v13, %v1341_v45  ;;  %v1439_v17 = vadd.f32 %v1418_v51, %v1342_v8 }
 0x1f7   : > { %v1219_v20 = vpop.permute.xlu0 %1218  ;;  %v1209_v53 = vpop.permute.xlu1 %1208  ;;  %v1535_v24 = vadd.f32 %v1514_v63, %v1438_v49  ;;  %v1536_v14 = vadd.f32 %v1515_v3, %v1439_v17 }
 0x1f8   : > { %v1228_v6 = vsel %vm1220_vm4, %v3256_v42, %v1219_v20  ;;  %v1252_v27 = vadd.f32 %v1219_v20, %v1155_v57 }
 0x1f9   : > { %v1251_v23 = vadd.f32 %v1228_v6, %v1154_v28  ;;  %v3475_v29 = vadd.f32 %v1611_v62, %v1535_v24  ;;  %v3477_v36 = vadd.f32 %v1612_v41, %v1536_v14 }
 0x1fb   : > { %v1316_v13 = vpop.permute.xlu0 %1315  ;;  %v1306_v19 = vpop.permute.xlu1 %1305 }
 0x1fc   : > { %v1325_v51 = vsel %vm1317_vm6, %v3278_v47, %v1316_v13  ;;  %v1349_v42 = vadd.f32 %v1316_v13, %v1252_v27 }
 0x1fd   : > { %v1348_v35 = vadd.f32 %v1325_v51, %v1251_v23 }
 0x1ff   : > { %v1413_v63 = vpop.permute.xlu0 %1412  ;;  %v1403_v32 = vpop.permute.xlu1 %1402 }
 0x200   : > { %v1422_v3 = vsel %vm1414_vm7, %v3306_v44, %v1413_v63  ;;  %v1446_v0 = vadd.f32 %v1413_v63, %v1349_v42  ;;  %v1631_v42 = vadd.f32 %v3426_v50, %v3460_v4 }
 0x201   : > { %v1445_v5 = vadd.f32 %v1422_v3, %v1348_v35 }
 0x203   : > { %v1597_v54 = vpop.permute.xlu0 %1596  ;;  %v1500_v43 = vpop.permute.xlu1 %1499 }
 0x207   : > { %v3485_v46 = vpop.permute.xlu0 %1016  ;;  %v1510_v40 = vpop.permute.xlu1 %1509 }
 0x208   : > { %v1031_v47 = vsel %vm1026_vm2, %v1015_v59, %v3485_v46  ;;  %v1519_v55 = vsel %vm1511_vm5, %v3322_v61, %v1510_v40  ;;  %v3491_v22 = vadd.f32 %v1510_v40, %v1446_v0 }
 0x209   : > { %v1053_v44 = vadd.f32 %v1031_v47, %v956_v18  ;;  %v3493_v25 = vadd.f32 %v1519_v55, %v1445_v5 }
 0x20b   : > { %v3495_v37 = vpop.permute.xlu0 %1113  ;;  %v3497_v38 = vpop.permute.xlu1 %1018 }
 0x20c   : > { %v1128_v9 = vsel %vm1123_vm3, %v1112_v39, %v3495_v37 }
 0x20d   : > { %v1150_v2 = vadd.f32 %v1128_v9, %v1053_v44 }
 0x20f   : > { %v3501_v16 = vpop.permute.xlu0 %1210  ;;  %v3503_v31 = vpop.permute.xlu1 %1115 }
 0x210   : > { %v1225_v59 = vsel %vm1220_vm4, %v1209_v53, %v3501_v16 }
 0x211   : > { %v1247_v10 = vadd.f32 %v1225_v59, %v1150_v2 }
 0x213   : > { %v3507_v58 = vpop.permute.xlu0 %1307  ;;  %v3509_v33 = vpop.permute.xlu1 %1212 }
 0x214   : > { %v1322_v45 = vsel %vm1317_vm6, %v1306_v19, %v3507_v58 }
 0x215   : > { %v1344_v8 = vadd.f32 %v1322_v45, %v1247_v10 }
 0x217   : > { %v3513_v1 = vpop.permute.xlu0 %1404  ;;  %v3515_v39 = vpop.permute.xlu1 %1309 }
 0x218   : > { %v1419_v26 = vsel %vm1414_vm7, %v1403_v32, %v3513_v1 }
 0x219   : > { %v1441_v28 = vadd.f32 %v1419_v26, %v1344_v8  ;;  %v958_v8 = vmul.f32 %v3152_v12, %v3232_v30 }
 0x21b   : > { %v3519_v57 = vpop.permute.xlu0 %1501  ;;  %v3521_v49 = vpop.permute.xlu1 %1406  ;;  %v1055_v26 = vadd.f32 %v3497_v38, %v958_v8 }
 0x21c   : > { %v1516_v17 = vsel %vm1511_vm5, %v1500_v43, %v3519_v57 }
 0x21d   : > { %v1538_v20 = vadd.f32 %v1516_v17, %v1441_v28  ;;  %v1152_v17 = vadd.f32 %v3503_v31, %v1055_v26 }
 0x21f   : > { %v3525_v6 = vpop.permute.xlu0 %1600  ;;  %v3527_v27 = vpop.permute.xlu1 %1503 }
 0x223   : > { %v1684_v53 = vpop.permute.xlu0 %1683  ;;  %v3529_v24 = vpop.permute.xlu1 %1598 }
 0x224   : > { %v1613_v14 = vsel %vm1608_vm8, %v1597_v54, %v3529_v24 }
 0x225   : > { %v3533_v62 = vadd.f32 %v1613_v14, %v1538_v20 }
 0x227   : > { %v1688_v41 = vpop.permute.xlu0 %1687  ;;  %v1682_v23 = vpop.permute.xlu1 %1681 }
 0x228   : > { %v1706_v13 = vsel %vm1705_vm9, %v1682_v23, %v1684_v53  ;;  %v957_v23 = vmul.f32 %v3152_v12, %v2990_v15  ;;  %v1226_v15 = vsel %vm1220_vm4, %v3501_v16, %v3509_v33 }
 0x229   : > { %v1726_v51 = vadd.f32 %v1706_v13, %v3359_v7 }
 0x22b   : > { %v1692_v19 = vpop.permute.xlu0 %1691  ;;  %v1762_v35 = vmul.f32 %v3150_v48, %v1726_v51  ;;  %v1686_v63 = vpop.permute.xlu1 %1685 }
 0x22c   : > { %v1731_v3 = vadd.f32 %v1692_v19, %v3422_v56  ;;  %v1707_v0 = vsel %vm1705_vm9, %v1684_v53, %v1686_v63  ;;  %v1728_v32 = vadd.f32 %v1686_v63, %v1631_v42  ;;  %v1249_v53 = vadd.f32 %v3509_v33, %v1152_v17 }
 0x22d   : > { %v3543_v5 = vadd.f32 %v3177_v52, %v1762_v35  ;;  %v1727_v54 = vadd.f32 %v1707_v0, %v3467_v34 }
 0x22e   : > { %v1767_v43 = vmul.f32 %v3162_v11, %v1731_v3  ;;  %v1764_v7 = vmul.f32 %v3150_v48, %v1728_v32  ;;  %v1346_v13 = vadd.f32 %v3515_v39, %v1249_v53 }
 0x22f   : > { %v2335_v50 = vmul.f32 -1.442695, %v3543_v5  ;;  %v1763_v4 = vmul.f32 %v3150_v48, %v1727_v54  ;;  %v1690_v56 = vpop.permute.xlu1 %1689 }
 0x230   : > { %v3551_v18 = vadd.f32 %v3180_v21, %v1767_v43  ;;  %v3554_v40 = vadd.f32 %v3177_v52, %v1764_v7  ;;  %v1708_v47 = vsel %vm1705_vm9, %v1688_v41, %v1690_v56  ;;  %v1709_v55 = vsel %vm1705_vm9, %v1690_v56, %v1692_v19 }
 0x231   : > { %2508 = vpow2.f32 %v2335_v50  ;;  %v3559_v34 = vadd.f32 %v3177_v52, %v1763_v4  ;;  %v1729_v9 = vadd.f32 %v1708_v47, %v3475_v29  ;;  %v1730_v2 = vadd.f32 %v1709_v55, %v3477_v36 }
 0x232   : > { %v2340_v44 = vmul.f32 -1.442695, %v3551_v18  ;;  %v2337_v48 = vmul.f32 -1.442695, %v3554_v40  ;;  %v1129_v19 = vsel %vm1123_vm3, %v3495_v37, %v3503_v31  ;;  %v1443_v0 = vadd.f32 %v3521_v49, %v1346_v13 }
 0x233   : > { %v2336_v59 = vmul.f32 -1.442695, %v3559_v34  ;;  %v1765_v10 = vmul.f32 %v3162_v11, %v1729_v9  ;;  %v1766_v45 = vmul.f32 %v3162_v11, %v1730_v2  ;;  %v1323_v37 = vsel %vm1317_vm6, %v3507_v58, %v3515_v39 }
 0x234   : > { %2510 = vpow2.f32 %v2340_v44  ;;  %v1420_v56 = vsel %vm1414_vm7, %v3513_v1, %v3521_v49  ;;  %v1518_v55 = vsel %vm1511_vm5, %v3200_v60, %v3322_v61  ;;  %v1517_v58 = vsel %vm1511_vm5, %v3519_v57, %v3527_v27  ;;  %v1894_v1 = vld [vmem:[%s3807_s8] sm:$0x7]  ;;  %v3830_v60 = vld [vmem:[#allocation6_spill] sm:$0xff] }
 0x235   : > { %2512 = vpow2.f32 %v2337_v48  ;;  %v3569_v52 = vadd.f32 %v3180_v21, %v1765_v10  ;;  %v3574_v29 = vadd.f32 %v3180_v21, %v1766_v45  ;;  %v1032_v21 = vsel %vm1026_vm2, %v3485_v46, %v3497_v38  ;;  %v3831_v45 = vld [vmem:[#allocation5_spill] sm:$0xff] }
 0x236   : > { %2514 = vpow2.f32 %v2336_v59  ;;  %v1054_v3 = vadd.f32 %v1032_v21, %v957_v23  ;;  %v1540_v38 = vadd.f32 %v3527_v27, %v1443_v0  ;;  %v1614_v49 = vsel %vm1608_vm8, %v3529_v24, %v3525_v6  ;;  %v3832_v27 = vld [vmem:[#allocation3_spill] sm:$0xff] }
 0x237   : > { %v2338_v36 = vmul.f32 -1.442695, %v3569_v52  ;;  %v2339_v28 = vmul.f32 -1.442695, %v3574_v29  ;;  %v1541_v61 = vadd.f32 %v1518_v55, %v3830_v60  ;;  %v3833_v8 = vsub.s32 2, %v3832_v27 }
 0x238   : > { %v1151_v12 = vadd.f32 %v1129_v19, %v1054_v3  ;;  %v1637_v47 = vadd.f32 %v3525_v6, %v1540_v38  ;;  %v3835_v6 = vsub.s32 1, %v3832_v27 }
 0x239   : > { %2516 = vpow2.f32 %v2338_v36  ;;  %v3622_v36 = vrot.slane %v1894_v1, %v3833_v8 }
 0x23a   : > { %2518 = vpow2.f32 %v2339_v28  ;;  %v1248_v7 = vadd.f32 %v1226_v15, %v1151_v12  ;;  %v3632_v24 = vrot.slane %v1894_v1, %v3835_v6 }
 0x23b   : > { %v2509_v11 = vpop.eup %2508 }
 0x23c   : > { %v3580_v20 = vpop.permute.xlu0 %1790  ;;  %v1846_v14 = vadd.f32 1.0, %v2509_v11  ;;  %v1345_v33 = vadd.f32 %v1323_v37, %v1248_v7  ;;  %v3834_v11 = vld [vmem:[#allocation4_spill] sm:$0xff] }
 0x23d   : > { %v3628_v53 = vrot.slane %v1894_v1, %v3834_v11 }
 0x23e   : > { %v2511_v30 = vpop.eup %2510  ;;  %2520 = vrcp.f32 %v1846_v14  ;;  %v1442_v9 = vadd.f32 %v1420_v56, %v1345_v33 }
 0x23f   : > { %v2513_v41 = vpop.eup %2512  ;;  %v1851_v51 = vadd.f32 1.0, %v2511_v30 }
 0x240   : > { %v2515_v42 = vpop.eup %2514  ;;  %v1848_v35 = vadd.f32 1.0, %v2513_v41  ;;  %v1605_v63 = vpop.permute.xlu0 %1604  ;;  %v1539_v10 = vadd.f32 %v1517_v58, %v1442_v9 }
 0x241   : > { %v1847_v32 = vadd.f32 1.0, %v2515_v42  ;;  %2522 = vrcp.f32 %v1851_v51  ;;  %v3593_v46 = vpop.permute.xlu1 %1759 }
 0x242   : > { %2524 = vrcp.f32 %v1848_v35  ;;  %v1636_v30 = vadd.f32 %v1614_v49, %v1539_v10 }
 0x243   : > { %2526 = vrcp.f32 %v1847_v32  ;;  %v2517_v54 = vpop.eup %2516 }
 0x244   : > { %v1694_v31 = vpop.permute.xlu0 %1693  ;;  %v2519_v43 = vpop.eup %2518  ;;  %v1849_v50 = vadd.f32 1.0, %v2517_v54 }
 0x245   : > { %v1603_v4 = vpop.permute.xlu1 %1602  ;;  %v1850_v16 = vadd.f32 1.0, %v2519_v43 }
 0x246   : > { %2528 = vrcp.f32 %v1849_v50  ;;  %v1615_v41 = vsel %vm1608_vm8, %v1603_v4, %v1605_v63 }
 0x247   : > { %2530 = vrcp.f32 %v1850_v16 }
 0x248   : > { %v1698_v39 = vpop.permute.xlu0 %1697  ;;  %v2521_v44 = vpop.eup %2520 }
 0x249   : > { %v1607_v48 = vpop.permute.xlu1 %1606  ;;  %v1734_v2 = vadd.f32 %v1698_v39, %v1637_v47  ;;  %v3625_v28 = vmul.f32 %v2521_v44, %v3543_v5 }
 0x24a   : > { %v1640_v51 = vadd.f32 %v1607_v48, %v3491_v22 }
 0x24b   : > { %v2523_v59 = vpop.eup %2522  ;;  %v1770_v57 = vmul.f32 %v3831_v45, %v1734_v2  ;;  %v1911_v22 = vmul.f32 %v3628_v53, %v3625_v28 }
 0x24c   : > { %v2525_v26 = vpop.eup %2524  ;;  %v1700_v17 = vpop.permute.xlu0 %1699  ;;  %v3652_v32 = vmul.f32 %v2523_v59, %v3551_v18 }
 0x24d   : > { %v2527_v14 = vpop.eup %2526  ;;  %v3635_v21 = vmul.f32 %v2525_v26, %v3554_v40  ;;  %v3639_v23 = vadd.f32 %v3580_v20, %v1770_v57  ;;  %v1696_v5 = vpop.permute.xlu1 %1695 }
 0x24e   : > { %v3642_v13 = vmul.f32 %v2527_v14, %v3559_v34  ;;  %v1710_v42 = vsel %vm1705_vm9, %v1694_v31, %v1696_v5  ;;  %v1711_v19 = vsel %vm1705_vm9, %v1696_v5, %v1698_v39  ;;  %v1616_v34 = vsel %vm1608_vm8, %v1605_v63, %v1607_v48 }
 0x24f   : > { %v2343_v35 = vmul.f32 -1.442695, %v3639_v23  ;;  %v1732_v40 = vadd.f32 %v1710_v42, %v3533_v62  ;;  %v1733_v3 = vadd.f32 %v1711_v19, %v1636_v30  ;;  %v1913_v0 = vmul.f32 %v3622_v36, %v3635_v21 }
 0x250   : > { %v1704_v15 = vpop.permute.xlu0 %1703  ;;  %v1912_v12 = vmul.f32 %v3632_v24, %v3642_v13  ;;  %v2529_v38 = vpop.eup %2528  ;;  %v1638_v63 = vadd.f32 %v1615_v41, %v1541_v61  ;;  %v1639_v47 = vadd.f32 %v1616_v34, %v3493_v25  ;;  %v1916_v58 = vmul.f32 %v3622_v36, %v3652_v32 }
 0x251   : > { %2532 = vpow2.f32 %v2343_v35  ;;  %v1768_v62 = vmul.f32 %v3831_v45, %v1732_v40  ;;  %v1769_v54 = vmul.f32 %v3831_v45, %v1733_v3  ;;  %v1796_v37 = vpop.permute.xlu1 %1795  ;;  %v1737_v31 = vadd.f32 %v1704_v15, %v1640_v51  ;;  %v2531_v43 = vpop.eup %2530 }
 0x252   : > { %v3662_v18 = vmul.f32 %v2529_v38, %v3569_v52  ;;  %v1923_v7 = vadd.f32 %v1912_v12, %v1911_v22  ;;  %v1925_v50 = vsel %vm1924_vm10, %v1913_v0, 0.0  ;;  %v3666_v4 = vmul.f32 %v2531_v43, %v3574_v29 }
 0x253   : > { %v1804_v56 = vadd.f32 %v3580_v20, %v1768_v62  ;;  %v1805_v16 = vadd.f32 %v3580_v20, %v1769_v54  ;;  %v1773_v33 = vmul.f32 %v3593_v46, %v1737_v31  ;;  %v1930_v10 = vsel %vm1924_vm10, %v1916_v58, 0.0 }
 0x254   : > { %v1926_v55 = vadd.f32 %v1925_v50, %v1923_v7  ;;  %v1914_v52 = vmul.f32 %v3628_v53, %v3662_v18  ;;  %v1915_v48 = vmul.f32 %v3632_v24, %v3666_v4 }
 0x255   : > { %v2341_v39 = vmul.f32 -1.442695, %v1804_v56  ;;  %v2342_v44 = vmul.f32 -1.442695, %v1805_v16  ;;  %v1809_v9 = vadd.f32 %v1796_v37, %v1773_v33  ;;  %v1702_v29 = vpop.permute.xlu1 %1701 }
 0x256   : > { %v1712_v20 = vsel %vm1705_vm9, %v1700_v17, %v1702_v29  ;;  %v1713_v2 = vsel %vm1705_vm9, %v1702_v29, %v1704_v15  ;;  %1927 = vadd.xlane.f32.xlu1 %v1926_v55  ;;  %v1929_v59 = vadd.f32 %v1915_v48, %v1914_v52  ;;  %v1949_v48 = vld [vmem:[%s3808_s9 + $0x8] sm:$0xff] }
 0x257   : > { %2534 = vpow2.f32 %v2341_v39  ;;  %v2346_v25 = vmul.f32 -1.442695, %v1809_v9  ;;  %v1735_v1 = vadd.f32 %v1712_v20, %v1638_v63  ;;  %v1736_v49 = vadd.f32 %v1713_v2, %v1639_v47 }
 0x258   : > { %2536 = vpow2.f32 %v2342_v44  ;;  %v1931_v45 = vadd.f32 %v1930_v10, %v1929_v59 }
 0x259   : > { %2538 = vpow2.f32 %v2346_v25  ;;  %v1771_v60 = vmul.f32 %v3593_v46, %v1735_v1  ;;  %v1772_v61 = vmul.f32 %v3593_v46, %v1736_v49 }
 0x25a   : > { %1932 = vadd.xlane.f32.xlu0 %v1931_v45 }
 0x25b   : > { %v2533_v57 = vpop.eup %2532  ;;  %v1807_v27 = vadd.f32 %v1796_v37, %v1771_v60  ;;  %v1808_v8 = vadd.f32 %v1796_v37, %v1772_v61  ;;  %v1951_v60 = vld [vmem:[%s3808_s9 + $0x18] sm:$0xff] }
 0x25c   : > { %v1854_v26 = vadd.f32 1.0, %v2533_v57 }
 0x25d   : > { %v2344_v17 = vmul.f32 -1.442695, %v1807_v27  ;;  %v2345_v6 = vmul.f32 -1.442695, %v1808_v8 }
 0x25e   : > { %2540 = vrcp.f32 %v1854_v26 }
 0x25f   : > { %2542 = vpow2.f32 %v2344_v17 }
 0x260   : > { %2544 = vpow2.f32 %v2345_v6 }
 0x261   : > { %v2535_v14 = vpop.eup %2534 }
 0x262   : > { %v2537_v30 = vpop.eup %2536  ;;  %v1852_v41 = vadd.f32 1.0, %v2535_v14 }
 0x263   : > { %v2539_v5 = vpop.eup %2538  ;;  %v1853_v51 = vadd.f32 1.0, %v2537_v30 }
 0x264   : > { %2546 = vrcp.f32 %v1852_v41  ;;  %v1857_v46 = vadd.f32 1.0, %v2539_v5 }
 0x265   : > { %2548 = vrcp.f32 %v1853_v51 }
 0x266   : > { %2550 = vrcp.f32 %v1857_v46  ;;  %v1970_v46 = vld [vmem:[%s3809_s10] sm:$0x1] }
 0x268   : > { %v2541_v42 = vpop.eup %2540 }
 0x269   : > { %v2543_v19 = vpop.eup %2542  ;;  %v3684_v0 = vmul.f32 %v2541_v42, %v3639_v23 }
 0x26a   : > { %v2545_v35 = vpop.eup %2544  ;;  %v1855_v40 = vadd.f32 1.0, %v2543_v19 }
 0x26b   : > { %v1856_v3 = vadd.f32 1.0, %v2545_v35  ;;  %v1919_v62 = vmul.f32 %v3622_v36, %v3684_v0 }
 0x26c   : > { %2552 = vrcp.f32 %v1855_v40 }
 0x26d   : > { %2554 = vrcp.f32 %v1856_v3  ;;  %v1935_v43 = vsel %vm1924_vm10, %v1919_v62, 0.0  ;;  %v1979_v62 = vld [vmem:[%s3810_s11] sm:$0xff] }
 0x26e   : > { %v2547_v34 = vpop.eup %2546 }
 0x26f   : > { %v2549_v15 = vpop.eup %2548  ;;  %v3686_v22 = vmul.f32 %v2547_v34, %v1804_v56 }
 0x270   : > { %v3688_v12 = vmul.f32 %v2549_v15, %v1805_v16  ;;  %v2551_v54 = vpop.eup %2550 }
 0x271   : > { %v1917_v38 = vmul.f32 %v3628_v53, %v3686_v22  ;;  %v3696_v23 = vmul.f32 %v2551_v54, %v1809_v9 }
 0x272   : > { %v1918_v37 = vmul.f32 %v3632_v24, %v3688_v12 }
 0x273   : > { %v1922_v47 = vmul.f32 %v3622_v36, %v3696_v23  ;;  %v1948_v36 = vld [vmem:[%s3808_s9] sm:$0xff] }
 0x274   : > { %v1934_v31 = vadd.f32 %v1918_v37, %v1917_v38  ;;  %v1980_v38 = vld [vmem:[%s3810_s11 + $0x8] sm:$0xff]  ;;  %v1982_v37 = vld [vmem:[%s3810_s11 + $0x18] sm:$0xff] }
 0x275   : > { %v1940_v58 = vsel %vm1924_vm10, %v1922_v47, 0.0 }
 0x276   : > { %v2553_v63 = vpop.eup %2552  ;;  %v1936_v7 = vadd.f32 %v1935_v43, %v1934_v31  ;;  %v1981_v31 = vld [vmem:[%s3810_s11 + $0x10] sm:$0xff] }
 0x277   : > { %v2555_v50 = vpop.eup %2554  ;;  %v3699_v56 = vmul.f32 %v2553_v63, %v1807_v27 }
 0x278   : > { %v3701_v16 = vmul.f32 %v2555_v50, %v1808_v8  ;;  %1937 = vadd.xlane.f32.xlu0 %v1936_v7 }
 0x279   : > { %v1920_v33 = vmul.f32 %v3628_v53, %v3699_v56 }
 0x27a   : > { %v1921_v55 = vmul.f32 %v3632_v24, %v3701_v16  ;;  %v1950_v24 = vld [vmem:[%s3808_s9 + $0x10] sm:$0xff] }
 0x27c   : > { %v1939_v52 = vadd.f32 %v1921_v55, %v1920_v33 }
 0x27e   : > { %v1941_v39 = vadd.f32 %v1940_v58, %v1939_v52  ;;  %v2004_v52 = vld [vmem:[%s3811_s12 + $0x8] sm:$0xff]  ;;  %v2003_v58 = vld [vmem:[%s3811_s12] sm:$0xff] }
 0x280   : > { %1942 = vadd.xlane.f32.xlu1 %v1941_v39 }
 0x2e3   : > { %v1928_v9 = vpop.xlane.xlu1 %1927 }
 0x2e4   : > { %v1944_v53 = vmul.f32 0.00390625, %v1928_v9 }
 0x2e6   : > { %v1952_v1 = vmul.f32 %v1948_v36, %v1944_v53 }
 0x2e7   : > { %v1933_v44 = vpop.xlane.xlu0 %1932 }
 0x2e8   : > { %v1945_v29 = vmul.f32 0.00390625, %v1933_v44  ;;  %v1957_v10 = vsel %vm1956_vm11, %v1952_v1, 0.0 }
 0x2ea   : > { %v1953_v25 = vmul.f32 %v1949_v48, %v1945_v29  ;;  %v2006_v48 = vld [vmem:[%s3811_s12 + $0x18] sm:$0xff] }
 0x2ec   : > { %v1958_v59 = vsel %vm1956_vm11, %v1953_v25, 0.0 }
 0x2ed   : > { %v1959_v27 = vadd.f32 %v1958_v59, %v1957_v10 }
 0x305   : > { %v1938_v20 = vpop.xlane.xlu0 %1937 }
 0x306   : > { %v1946_v2 = vmul.f32 0.00390625, %v1938_v20  ;;  %v2005_v20 = vld [vmem:[%s3811_s12 + $0x10] sm:$0xff] }
 0x308   : > { %v1954_v49 = vmul.f32 %v1950_v24, %v1946_v2 }
 0x30a   : > { %v1960_v45 = vsel %vm1956_vm11, %v1954_v49, 0.0 }
 0x30b   : > { %v1961_v26 = vadd.f32 %v1960_v45, %v1959_v27 }
 0x30d   : > { %v1943_v61 = vpop.xlane.xlu1 %1942 }
 0x30e   : > { %v1947_v57 = vmul.f32 0.00390625, %v1943_v61 }
 0x310   : > { %v1955_v8 = vmul.f32 %v1951_v60, %v1947_v57 }
 0x312   : > { %v1962_v17 = vsel %vm1956_vm11, %v1955_v8, 0.0 }
 0x313   : > { %v1963_v6 = vadd.f32 %v1962_v17, %v1961_v26 }
 0x315   : > { %v1964_v14 = vrot.slane %v1963_v6, 4 }
 0x317   : > { %v1965_v30 = vadd.f32 %v1964_v14, %v1963_v6 }
 0x319   : > { %v1966_v41 = vrot.slane %v1965_v30, 2 }
 0x31b   : > { %v1967_v5 = vadd.f32 %v1966_v41, %v1965_v30  ;;  %v2602_v41 = vmov 0.0|0.0  }
 0x31c   : > { %2393 = vmatprep.subr.bf16.mxu0 %v2602_v41 }
 0x31d   : > { %v1968_v51 = vrot.slane %v1967_v5, 1 }
 0x31f   : > { %v1969_v42 = vadd.f32 %v1968_v51, %v1967_v5  ;;  %v2221_v5 = vld [vmem:[%s3814_s15] sm:$0xff] }
 0x320   : > { %v2212_v51 = vld [vmem:[%s3813_s14] sm:$0xff] }
 0x321   : > { %v1971_v19 = vadd.f32 %v1970_v46, %v1969_v42  ;;  %v3836_v46 = vmov 0.0   ;;  %v2230_v42 = vld [vmem:[%s2718_s0] sm:$0xff] }
 0x322   : > { %2382 = vmatprep.mubr.msk.f32.mxu0 %vm2603_vm12, %v3836_v46 }
 0x323   : > { %v2347_v35 = vmul.f32 -1.442695, %v1971_v19 }
 0x325   : > { %2556 = vpow2.f32 %v2347_v35  ;;  %v2232_v35 = vld [vmem:[%s2718_s0 + $0x10] sm:$0xff] }
 0x32f   : > { %v2557_v40 = vpop.eup %2556 }
 0x330   : > { %v1975_v3 = vadd.f32 1.0, %v2557_v40 }
 0x332   : > { %2558 = vrcp.f32 %v1975_v3 }
 0x33c   : > { %v2559_v34 = vpop.eup %2558 }
 0x33d   : > { %v1978_v15 = vmul.f32 %v2559_v34, %v1971_v19  ;;  %v2231_v19 = vld [vmem:[%s2718_s0 + $0x8] sm:$0xff] }
 0x33f   : > { %v1986_v54 = vrot.slane %v1978_v15, %v3834_v11 }
 0x341   : > { %v1988_v43 = vmul.f32 %v1986_v54, %v1980_v38  ;;  %v1987_v63 = vmul.f32 %v1986_v54, %v1979_v62  ;;  %v1990_v33 = vmul.f32 %v1986_v54, %v1982_v37  ;;  %v1989_v47 = vmul.f32 %v1986_v54, %v1981_v31 }
 0x343   : > { %v1994_v7 = vsel %vm1956_vm11, %v1988_v43, 0.0  ;;  %v1991_v50 = vsel %vm1956_vm11, %v1987_v63, 0.0  ;;  %v2000_v11 = vsel %vm1956_vm11, %v1990_v33, 0.0  ;;  %v1997_v55 = vsel %vm1956_vm11, %v1989_v47, 0.0 }
 0x344   : > { %1995 = vadd.xlane.f32.xlu1 %v1994_v7  ;;  %1992 = vadd.xlane.f32.xlu0 %v1991_v50 }
 0x348   : > { %2001 = vadd.xlane.f32.xlu1 %v2000_v11  ;;  %1998 = vadd.xlane.f32.xlu0 %v1997_v55 }
 0x3d1   : > { %v1996_v39 = vpop.xlane.xlu1 %1995  ;;  %v1993_v44 = vpop.xlane.xlu0 %1992 }
 0x3d2   : > { %v2008_v9 = vadd.f32 %v2004_v52, %v1996_v39  ;;  %v2007_v29 = vadd.f32 %v2003_v58, %v1993_v44 }
 0x3d4   : > { %v2349_v53 = vmul.f32 -1.442695, %v2008_v9  ;;  %v2348_v2 = vmul.f32 -1.442695, %v2007_v29 }
 0x3d5   : > { %v2002_v36 = vpop.xlane.xlu1 %2001  ;;  %v1999_v24 = vpop.xlane.xlu0 %1998 }
 0x3d6   : > { %2560 = vpow2.f32 %v2349_v53  ;;  %v2010_v25 = vadd.f32 %v2006_v48, %v2002_v36  ;;  %v2009_v1 = vadd.f32 %v2005_v20, %v1999_v24 }
 0x3d7   : > { %2562 = vpow2.f32 %v2348_v2 }
 0x3d8   : > { %v2351_v49 = vmul.f32 -1.442695, %v2010_v25  ;;  %v2350_v59 = vmul.f32 -1.442695, %v2009_v1 }
 0x3da   : > { %2564 = vpow2.f32 %v2351_v49 }
 0x3db   : > { %2566 = vpow2.f32 %v2350_v59 }
 0x3e0   : > { %v2561_v60 = vpop.eup %2560 }
 0x3e1   : > { %v2563_v61 = vpop.eup %2562  ;;  %v2024_v10 = vadd.f32 1.0, %v2561_v60 }
 0x3e2   : > { %v2023_v45 = vadd.f32 1.0, %v2563_v61 }
 0x3e3   : > { %2568 = vrcp.f32 %v2024_v10 }
 0x3e4   : > { %v2565_v57 = vpop.eup %2564  ;;  %2570 = vrcp.f32 %v2023_v45 }
 0x3e5   : > { %v2567_v27 = vpop.eup %2566  ;;  %v2026_v8 = vadd.f32 1.0, %v2565_v57 }
 0x3e6   : > { %v2025_v26 = vadd.f32 1.0, %v2567_v27 }
 0x3e7   : > { %2572 = vrcp.f32 %v2026_v8 }
 0x3e8   : > { %2574 = vrcp.f32 %v2025_v26 }
 0x3ed   : > { %v2569_v17 = vpop.eup %2568 }
 0x3ee   : > { %v2571_v6 = vpop.eup %2570  ;;  %2042 = vperm.xlu1 %2459, %v2569_v17  }
 0x3ef   : > { %2037 = vperm.xlu0 %2457, %v2571_v6  }
 0x3f1   : > { %v2573_v14 = vpop.eup %2572 }
 0x3f2   : > { %v2575_v30 = vpop.eup %2574 }
 0x3f3   : > { %2052 = vperm.xlu0 %2457, %v2573_v14   ;;  %2047 = vperm.xlu1 %2459, %v2575_v30  }
 0x3f7   : > { %2224 = vperm.xlu0 %2457, %v2221_v5   ;;  %2215 = vperm.xlu1 %2459, %v2212_v51  }
 0x3fb   : > { %2236 = vrot.lane.b32.xlu1 %v2230_v42, %s2598_s17  ;;  %2238 = vrot.lane.b32.xlu0 %v2231_v19, %s2598_s17 }
 0x3ff   : > { %2240 = vrot.lane.b32.xlu1 %v2232_v35, %s2598_s17 }
 0x46d   : > { %v2043_v40 = vpop.permute.xlu1 %2042 }
 0x46e   : > { %v2058_v3 = vmul.f32 %v2043_v40, %v3662_v18  ;;  %v2059_v34 = vmul.f32 %v2043_v40, %v3666_v4  ;;  %v2060_v15 = vmul.f32 %v2043_v40, %v3652_v32  ;;  %v2038_v38 = vpop.permute.xlu0 %2037 }
 0x46f   : > { %v2055_v62 = vmul.f32 %v2038_v38, %v3625_v28  ;;  %v2056_v54 = vmul.f32 %v2038_v38, %v3642_v13  ;;  %v2057_v37 = vmul.f32 %v2038_v38, %v3635_v21 }
 0x471   : > { %v2387_v31 = vpack.c.bf16 %v2058_v3, %v2055_v62  ;;  %v2394_v43 = vpack.c.bf16 %v2060_v15, %v2057_v37  ;;  %v2385_v63 = vpack.c.bf16 %v2059_v34, %v2056_v54 }
 0x472   : > { %v2048_v7 = vpop.permute.xlu1 %2047  ;;  %v2053_v50 = vpop.permute.xlu0 %2052 }
 0x473   : > { %v2061_v33 = vmul.f32 %v2048_v7, %v3686_v22  ;;  %v2062_v18 = vmul.f32 %v2048_v7, %v3688_v12  ;;  %v2063_v4 = vmul.f32 %v2048_v7, %v3684_v0  ;;  %v2064_v32 = vmul.f32 %v2053_v50, %v3699_v56  ;;  %2386 = vmatprep.subr.bf16.mxu1 %v2385_v63  ;;  %v2067_v22 = vld [vmem:[%s3812_s13] sm:$0xff] }
 0x474   : > { %v2065_v28 = vmul.f32 %v2053_v50, %v3701_v16  ;;  %v2066_v13 = vmul.f32 %v2053_v50, %v3696_v23  ;;  %2395 = vmatpush3.bf16.msra.mxu0 %v2394_v43  ;;  %2388 = vmatpush1.bf16.msra.mxu1 %v2387_v31 }
 0x475   : > { %v2391_v21 = vpack.c.bf16 %v2064_v32, %v2061_v33  ;;  %2396 = vmatprep.subr.bf16.mxu0 %v2602_v41 }
 0x476   : > { %v2397_v47 = vpack.c.bf16 %v2066_v13, %v2063_v4  ;;  %v2389_v11 = vpack.c.bf16 %v2065_v28, %v2062_v18  ;;  %v2216_v0 = vpop.permute.xlu1 %2215  ;;  %v2225_v23 = vpop.permute.xlu0 %2224 }
 0x478   : > { %2390 = vmatprep.subr.bf16.mxu1 %v2389_v11  ;;  %2398 = vmatpush3.bf16.msra.mxu0 %v2397_v47 }
 0x479   : > { %2392 = vmatpush1.bf16.msra.mxu1 %v2391_v21 }
 0x47a   : > { %v2237_v12 = vpop.permute.xlu1 %2236  ;;  %v2239_v9 = vpop.permute.xlu0 %2238 }
 0x47b   : > { %2383 = vmatmul.mubr.msk.f32.vlgmr.msra.gmra.mrb[6].mxu0 %vm1924_vm10, %v2067_v22  ;;  %v2242_v24 = vsel %vm1317_vm6, %v2237_v12, %v2239_v9 }
 0x47c   : > { %2352 = vmatmul.mubr.msk.f32.vlgmr.msra.gmra.mrb[6].mxu1 %vm1924_vm10, %v2067_v22 }
 0x47e   : > { %v2241_v16 = vpop.permute.xlu1 %2240 }
 0x47f   : > { %v2243_v53 = vsel %vm1317_vm6, %v2239_v9, %v2241_v16 }
 0x54e   : > { %v2208_v56 = vpop.f32.mrb[6].mxu0 }
 0x54f   : > { %v2220_v55 = vmul.f32 %v2216_v0, %v2208_v56  ;;  %v2137_v52 = vpop.f32.mrb[6].mxu1  ;;  %v2384_v58 = vpop.f32.mrb[7].mxu0 }
 0x550   : > { %v2218_v39 = vmul.f32 %v2216_v0, %v2137_v52  ;;  %v2139_v44 = vpop.f32.mrb[7].mxu1 }
 0x551   : > { %v2219_v29 = vmul.f32 %v2216_v0, %v2139_v44  ;;  %v2229_v48 = vadd.f32 %v2225_v23, %v2220_v55 }
 0x552   : > { %v2227_v20 = vadd.f32 %v2225_v23, %v2218_v39 }
 0x553   : > { %v2228_v2 = vadd.f32 %v2225_v23, %v2219_v29  ;;  %v2249_v36 = vadd.f32 %v2241_v16, %v2229_v48 }
 0x554   : > { %v2247_v25 = vadd.f32 %v2242_v24, %v2227_v20 }
 0x555   : > { %2252 = vst.msk [vmem:[%s521_s23 + $0x10] sm:$0xff] %vm1924_vm10, %v2249_v36  ;;  %v2248_v1 = vadd.f32 %v2243_v53, %v2228_v2 }
 0x556   : > { %2250 = vst [vmem:[%s521_s23] sm:$0xff] %v2247_v25 }
 0x557   : > { %2251 = vst [vmem:[%s521_s23 + $0x8] sm:$0xff] %v2248_v1 }
 0x558 PF: > { %s26_s21 = sadd.s32 1, %s2582_s21  }
 0x559   : > { %p23_p4 = scmp.ge.s32.totalorder %s26_s21, 4  }
 0x55b   :  { %25 = sbr.rel (!%p23_p4) target bundleno = 2 (0x2), region = 114 }

// kernel: mbconv_forward.1
= control target key start
LH: loop header
LB: loop body
LE: loop exit
PB: predicated region body
PF: predicated region fallthrough
CT: control target
= control target key end

     0   :  { %s2689_s21 = smov 0   ;;  %s3799_s0 = inlined_call_operand.vmem [shape: f32[2,8,342], index: 0, kind: input, shape index: {}]   ;;  %s3800_s1 = inlined_call_operand.vmem [shape: f32[32,8], index: 1, kind: input, shape index: {}]   ;;  %s3801_s2 = inlined_call_operand.vmem [shape: f32[32,1], index: 2, kind: input, shape index: {}]   ;;  %s3802_s3 = inlined_call_operand.vmem [shape: f32[32,1], index: 3, kind: input, shape index: {}]   ;;  %s3803_s4 = inlined_call_operand.vmem [shape: f32[1,342], index: 4, kind: input, shape index: {}]   ;;  %s3804_s5 = inlined_call_operand.vmem [shape: f32[32,9], index: 5, kind: input, shape index: {}]   ;;  %s3805_s6 = inlined_call_operand.vmem [shape: f32[32,1], index: 6, kind: input, shape index: {}]   ;;  %s3806_s7 = inlined_call_operand.vmem [shape: f32[32,1], index: 7, kind: input, shape index: {}]   ;;  %s3807_s8 = inlined_call_operand.vmem [shape: f32[1,288], index: 8, kind: input, shape index: {}]   ;;  %s3808_s9 = inlined_call_operand.vmem [shape: f32[32,2], index: 9, kind: input, shape index: {}]   ;;  %s3809_s10 = inlined_call_operand.vmem [shape: f32[1,2], index: 10, kind: input, shape index: {}]   ;;  %s3810_s11 = inlined_call_operand.vmem [shape: f32[32,2], index: 11, kind: input, shape index: {}]   ;;  %s3811_s12 = inlined_call_operand.vmem [shape: f32[32,1], index: 12, kind: input, shape index: {}]   ;;  %s3812_s13 = inlined_call_operand.vmem [shape: f32[8,32], index: 13, kind: input, shape index: {}]   ;;  %s3813_s14 = inlined_call_operand.vmem [shape: f32[8,1], index: 14, kind: input, shape index: {}]   ;;  %s3814_s15 = inlined_call_operand.vmem [shape: f32[8,1], index: 15, kind: input, shape index: {}]   ;;  %s3815_s16 = inlined_call_operand.vmem [shape: f32[2,8,288], index: 16, kind: output, shape index: {}]  }
   0x1   :  { %3824 = sst [smem:[#allocation7_spill]] %s3799_s0 }
   0x2 LB: > { %s2308_s22 = sadd.s32 4294967295, %s2582_s21   ;;  %p2312_p0 = scmp.ge.s32.totalorder %s2582_s21, 1  ;;  %s2582_s21 = sphi %s2689_s21, %s26_s21  }
   0x3   : > { %p462_p1 = scmp.lt.s32.totalorder %s2582_s21, 3 }
   0x5   : > { %p463_p2 = pnand %p2312_p0, %p462_p1 }
   0x7   : > { %466 = sbr.rel (%p463_p2) target bundleno = 1368 (0x558), region = 84 }
   0xe   : > { %v2700_v0 = vld [vmem:[%s3804_s5] sm:$0xff]  ;;  %p512_p3 = scmp.lt.s32.totalorder %s2308_s22, 1  ;;  %v2584_v1 = vmov 1   ;;  %v3816_v2 = vmov 0.0   ;;  %v718_v3 = vld [vmem:[%s3801_s2 + $0x10] sm:$0xff]  ;;  %v2586_v4 = vmov 0  }
   0xf   : > { %2431 = vset.pattern.permute.xlu0 %v2584_v1  ;;  %606 = vmatprep.mubr.f32.mxu0 %v3816_v2  ;;  %s3825_s30 = sld [smem:[#allocation7_spill]]  ;;  %v2587_v5 = vmov 2   ;;  %v525_v6 = vld [vmem:[%s3800_s1] sm:$0xff]  ;;  %vm529_vm0 = vcmask 64512   ;;  %v528_v9 = vld [vmem:[%s3800_s1 + $0x18] sm:$0xff]  ;;  %v2736_v11 = vld [vmem:[%s3804_s5 + $0x10] sm:$0xff] }
  0x10   : > { %963 = vperm.xlu0 %2431, %v2700_v0   ;;  %s3838_s22 = smov (!%p512_p3, %s2308_s22), 1  ;;  %624 = vmatprep.mubr.f32.mxu1 %v3816_v2  ;;  %v752_v12 = vld [vmem:[%s3802_s3] sm:$0xff]  ;;  %v526_v13 = vld [vmem:[%s3800_s1 + $0x8] sm:$0xff]  ;;  %v527_v14 = vld [vmem:[%s3800_s1 + $0x10] sm:$0xff]  ;;  %v2588_v17 = vmov 3   ;;  %v2589_v19 = vmov 4  }
  0x11   : > { %2430 = vset.pattern.permute.xlu1 %v2586_v4  ;;  %s2401_s27 = smul.u32 24, %s3838_s22  ;;  %v719_v15 = vld [vmem:[%s3801_s2 + $0x18] sm:$0xff]  ;;  %v2760_v16 = vld [vmem:[%s3804_s5 + $0x8] sm:$0xff]  ;;  %v2590_v20 = vmov 5   ;;  %v2591_v21 = vmov 6   ;;  %v2592_v23 = vmov 7  }
  0x12   : > { %732 = vperm.xlu1 %2430, %v718_v3   ;;  %v755_v18 = vld [vmem:[%s3802_s3 + $0x18] sm:$0xff]  ;;  %v2593_v24 = vmov 8   ;;  %v716_v25 = vld [vmem:[%s3801_s2] sm:$0xff]  ;;  %v717_v26 = vld [vmem:[%s3801_s2 + $0x8] sm:$0xff]  ;;  %vm903_vm1 = vcmask 703488   ;;  %s2594_s26 = smov 126  }
  0x13   : > { %v929_v22 = vld [vmem:[%s3804_s5 + $0x18] sm:$0xff]  ;;  %v753_v27 = vld [vmem:[%s3802_s3 + $0x8] sm:$0xff]  ;;  %v754_v28 = vld [vmem:[%s3802_s3 + $0x10] sm:$0xff]  ;;  %s2595_s28 = smov 127   ;;  %s2596_s29 = smov 92   ;;  %vm1026_vm2 = vcmask 1039360  }
  0x14   : > { %2433 = vset.pattern.permute.xlu0 %v2587_v5  ;;  %v1738_v29 = vld [vmem:[%s3805_s6] sm:$0xff]  ;;  %v1740_v30 = vld [vmem:[%s3805_s6 + $0x10] sm:$0xff]  ;;  %v1775_v31 = vld [vmem:[%s3806_s7 + $0x8] sm:$0xff]  ;;  %s2598_s17 = smov 109   ;;  %s2599_s18 = smov 108   ;;  %vm1123_vm3 = vcmask 1031168  }
  0x15   : > { %s2718_s0 = scalar_lea.vmem %s3825_s30, %s2401_s27  ;;  %1060 = vperm.xlu0 %2433, %v2700_v0   ;;  %v1739_v32 = vld [vmem:[%s3805_s6 + $0x8] sm:$0xff]  ;;  %v1774_v33 = vld [vmem:[%s3806_s7] sm:$0xff]  ;;  %s2597_s30 = smov 110   ;;  %vm1220_vm4 = vcmask 900096   ;;  %vm1511_vm5 = vcmask 752640   ;;  %vm1317_vm6 = vcmask 891904  }
  0x16   : > { %v523_v7 = vld [vmem:[%s2718_s0 + $0x8] sm:$0xff]  ;;  %v522_v8 = vld [vmem:[%s2718_s0] sm:$0xff]  ;;  %v524_v10 = vld [vmem:[%s2718_s0 + $0x10] sm:$0xff]  ;;  %758 = vperm.xlu1 %2430, %v752_v12   ;;  %s2600_s19 = smov 91   ;;  %vm1414_vm7 = vcmask 883712   ;;  %s2601_s20 = smov 90  }
  0x17   : > { %542 = vmatprep.subr.mxu0 %v523_v7  ;;  %2399 = vmatprep.subr.mxu1 %v523_v7  ;;  %vm1608_vm8 = vcmask 744448   ;;  %vm1705_vm9 = vcmask 736256   ;;  %vm1924_vm10 = vcmask 261120   ;;  %vm1956_vm11 = vcmask 15360   ;;  %s521_s23 = scalar_lea.vmem %s3815_s16, %s2401_s27 }
  0x18   : > { %543 = vmatpush1.msra.mxu0 %v522_v8  ;;  %2400 = vmatpush1.msra.mxu1 %v522_v8  ;;  %vm2603_vm12 = vmmov 0  }
  0x19   : > { %2315 = vmatmul.mubr.msk.f32.vlgmr.msra.gmra.mrb[0].mxu0 %vm529_vm0, %v525_v6  ;;  %2318 = vmatmul.mubr.msk.f32.vlgmr.msra.gmra.mrb[0].mxu1 %vm529_vm0, %v528_v9 }
  0x1a   : > { %2366 = vmatprep.subr.mxu1 %v524_v10  ;;  %612 = vmatprep.mubr.f32.mxu0 %v3816_v2 }
  0x1b   : > { %2367 = vmatpush3.msra.mxu1 %v524_v10  ;;  %2368 = vmatprep.mubr.msk.f32.mxu1 %vm529_vm0, %v525_v6 }
  0x1c   : > { %1068 = vperm.xlu0 %2433, %v2736_v11   ;;  %737 = vperm.xlu1 %2430, %v719_v15  }
  0x1d   : > { %2316 = vmatmul.mubr.msk.f32.gmra.mrb[2].mxu0 %vm529_vm0, %v526_v13  ;;  %2369 = vmatmul.mubr.msk.f32.vlgmr.msra.gmra.mrb[2].mxu1 %vm529_vm0, %v526_v13 }
  0x1e   : > { %618 = vmatprep.mubr.f32.mxu0 %v3816_v2  ;;  %2371 = vmatprep.mubr.msk.f32.mxu1 %vm529_vm0, %v527_v14 }
  0x20   : > { %2437 = vset.pattern.permute.xlu0 %v2588_v17  ;;  %773 = vperm.xlu1 %2430, %v755_v18  }
  0x21   : > { %2317 = vmatmul.mubr.msk.f32.gmra.mrb[4].mxu0 %vm529_vm0, %v527_v14  ;;  %2372 = vmatmul.mubr.msk.f32.gmra.mrb[4].mxu1 %vm529_vm0, %v528_v9 }
  0x22   : > { %1161 = vperm.xlu0 %2437, %v2760_v16   ;;  %2135 = vmatprep.mubr.f32.mxu1 %v3816_v2 }
  0x24   : > { %2432 = vset.pattern.permute.xlu1 %v2584_v1 }
  0x25   : > { %967 = vperm.xlu1 %2432, %v2760_v16  }
  0x26   : > { %2440 = vset.pattern.permute.xlu0 %v2589_v19 }
  0x27   : > { %1254 = vperm.xlu0 %2440, %v2700_v0  }
  0x29   : > { %971 = vperm.xlu1 %2432, %v2736_v11  }
  0x2b   : > { %1262 = vperm.xlu0 %2440, %v2736_v11  }
  0x2d   : > { %2434 = vset.pattern.permute.xlu1 %v2587_v5 }
  0x2e   : > { %1064 = vperm.xlu1 %2434, %v2760_v16  }
  0x2f   : > { %2444 = vset.pattern.permute.xlu0 %v2590_v20 }
  0x30   : > { %1355 = vperm.xlu0 %2444, %v2760_v16  }
  0x32   : > { %2435 = vset.pattern.permute.xlu1 %v2584_v1 }
  0x33   : > { %975 = vperm.xlu1 %2435, %v929_v22  }
  0x34   : > { %2447 = vset.pattern.permute.xlu0 %v2591_v21 }
  0x35   : > { %1448 = vperm.xlu0 %2447, %v2700_v0  }
  0x37   : > { %2436 = vset.pattern.permute.xlu1 %v2588_v17 }
  0x38   : > { %1157 = vperm.xlu1 %2436, %v2700_v0  }
  0x39   : > { %1456 = vperm.xlu0 %2447, %v2736_v11  }
  0x3c   : > { %2438 = vset.pattern.permute.xlu1 %v2587_v5 }
  0x3d   : > { %2451 = vset.pattern.permute.xlu0 %v2592_v23  ;;  %1072 = vperm.xlu1 %2438, %v929_v22  }
  0x3e   : > { %1549 = vperm.xlu0 %2451, %v2760_v16  }
  0x41   : > { %2439 = vset.pattern.permute.xlu1 %v2588_v17 }
  0x42   : > { %2454 = vset.pattern.permute.xlu0 %v2593_v24  ;;  %1165 = vperm.xlu1 %2439, %v2736_v11  }
  0x43   : > { %1642 = vperm.xlu0 %2454, %v2700_v0  }
  0x46   : > { %2441 = vset.pattern.permute.xlu1 %v2589_v19 }
  0x47   : > { %1650 = vperm.xlu0 %2454, %v2736_v11   ;;  %1258 = vperm.xlu1 %2441, %v2760_v16  }
  0x4b   : > { %2457 = vset.pattern.permute.xlu0 %v2586_v4  ;;  %2442 = vset.pattern.permute.xlu1 %v2588_v17 }
  0x4c   : > { %722 = vperm.xlu0 %2457, %v716_v25   ;;  %1169 = vperm.xlu1 %2442, %v929_v22  }
  0x50   : > { %727 = vperm.xlu0 %2457, %v717_v26   ;;  %2443 = vset.pattern.permute.xlu1 %v2590_v20 }
  0x51   : > { %1351 = vperm.xlu1 %2443, %v2700_v0  }
  0x54   : > { %763 = vperm.xlu0 %2457, %v753_v27  }
  0x55   : > { %2445 = vset.pattern.permute.xlu1 %v2589_v19 }
  0x56   : > { %1266 = vperm.xlu1 %2445, %v929_v22  }
  0x58   : > { %768 = vperm.xlu0 %2457, %v754_v28  }
  0x5a   : > { %2446 = vset.pattern.permute.xlu1 %v2590_v20 }
  0x5b   : > { %1359 = vperm.xlu1 %2446, %v2736_v11  }
  0x5c   : > { %932 = vperm.xlu0 %2457, %v2700_v0  }
  0x5f   : > { %2448 = vset.pattern.permute.xlu1 %v2591_v21 }
  0x60   : > { %947 = vperm.xlu0 %2457, %v929_v22   ;;  %1452 = vperm.xlu1 %2448, %v2760_v16  }
  0x64   : > { %1744 = vperm.xlu0 %2457, %v1738_v29   ;;  %2449 = vset.pattern.permute.xlu1 %v2590_v20 }
  0x65   : > { %1363 = vperm.xlu1 %2449, %v929_v22  }
  0x68   : > { %1754 = vperm.xlu0 %2457, %v1740_v30  }
  0x69   : > { %2450 = vset.pattern.permute.xlu1 %v2592_v23 }
  0x6a   : > { %1545 = vperm.xlu1 %2450, %v2700_v0  }
  0x6c   : > { %1785 = vperm.xlu0 %2457, %v1775_v31  }
  0x6e   : > { %2452 = vset.pattern.permute.xlu1 %v2591_v21 }
  0x6f   : > { %1460 = vperm.xlu1 %2452, %v929_v22  }
  0x73   : > { %2453 = vset.pattern.permute.xlu1 %v2592_v23 }
  0x74   : > { %1553 = vperm.xlu1 %2453, %v2736_v11  }
  0x78   : > { %2455 = vset.pattern.permute.xlu1 %v2593_v24 }
  0x79   : > { %1646 = vperm.xlu1 %2455, %v2760_v16  }
  0x7d   : > { %2456 = vset.pattern.permute.xlu1 %v2592_v23 }
  0x7e   : > { %1557 = vperm.xlu1 %2456, %v929_v22  }
  0x82   : > { %2458 = vset.pattern.permute.xlu1 %v2593_v24 }
  0x83   : > { %1654 = vperm.xlu1 %2458, %v929_v22  }
  0x87   : > { %2459 = vset.pattern.permute.xlu1 %v2586_v4 }
  0x88   : > { %937 = vperm.xlu1 %2459, %v2760_v16  }
  0x8c   : > { %942 = vperm.xlu1 %2459, %v2736_v11  }
  0x8f   : > { %v2828_v34 = vpop.permute.xlu0 %963 }
  0x90   : > { %1749 = vperm.xlu1 %2459, %v1739_v32  }
  0x91   : > { %v2830_v35 = vpop.permute.xlu1 %732 }
  0x94   : > { %1780 = vperm.xlu1 %2459, %v1774_v33   ;;  %v2832_v36 = vpop.permute.xlu0 %1060 }
  0x95   : > { %v759_v37 = vpop.permute.xlu1 %758 }
  0x9b   : > { %v2834_v38 = vpop.permute.xlu0 %1068  ;;  %v2836_v39 = vpop.permute.xlu1 %737 }
  0x9f   : > { %v2840_v41 = vpop.permute.xlu1 %773 }
  0xa1   : > { %v2838_v40 = vpop.permute.xlu0 %1161 }
  0xa4   : > { %v2844_v43 = vpop.permute.xlu1 %967 }
  0xa6   : > { %v2842_v42 = vpop.permute.xlu0 %1254 }
  0xa8   : > { %v2848_v45 = vpop.permute.xlu1 %971 }
  0xaa   : > { %v2846_v44 = vpop.permute.xlu0 %1262 }
  0xad   : > { %v2852_v47 = vpop.permute.xlu1 %1064 }
  0xaf   : > { %v2850_v46 = vpop.permute.xlu0 %1355 }
  0xb2   : > { %v2856_v49 = vpop.permute.xlu1 %975 }
  0xb4   : > { %v2854_v48 = vpop.permute.xlu0 %1448 }
  0xb7   : > { %v2860_v51 = vpop.permute.xlu1 %1157 }
  0xb8   : > { %v2858_v50 = vpop.permute.xlu0 %1456 }
  0xbc   : > { %v2864_v53 = vpop.permute.xlu1 %1072 }
  0xbd   : > { %v2862_v52 = vpop.permute.xlu0 %1549 }
  0xc1   : > { %v2868_v55 = vpop.permute.xlu1 %1165 }
  0xc2   : > { %v2866_v54 = vpop.permute.xlu0 %1642 }
  0xc6   : > { %v2870_v56 = vpop.permute.xlu0 %1650  ;;  %v2872_v57 = vpop.permute.xlu1 %1258 }
  0xcb   : > { %v723_v58 = vpop.permute.xlu0 %722  ;;  %v2874_v59 = vpop.permute.xlu1 %1169 }
  0xcf   : > { %v728_v60 = vpop.permute.xlu0 %727 }
  0xd0   : > { %v2876_v61 = vpop.permute.xlu1 %1351 }
  0xd3   : > { %v764_v7 = vpop.permute.xlu0 %763 }
  0xd5   : > { %v2898_v26 = vpop.permute.xlu1 %1266 }
  0xec   : > { %v608_v62 = vpop.f32.mrb[0].mxu0  ;;  %v626_v63 = vpop.f32.mrb[0].mxu1 }
  0xed   : > { %v740_v0 = vmul.f32 %v723_v58, %v608_v62  ;;  %v749_v1 = vmul.f32 %v2836_v39, %v626_v63  ;;  %v610_v3 = vpop.f32.mrb[1].mxu0  ;;  %v628_v4 = vpop.f32.mrb[1].mxu1 }
  0xee   : > { %v741_v5 = vmul.f32 %v723_v58, %v610_v3  ;;  %v750_v6 = vmul.f32 %v2836_v39, %v628_v4  ;;  %v769_v62 = vpop.permute.xlu0 %768 }
  0xef   : > { %v2880_v8 = vadd.f32 %v759_v37, %v740_v0  ;;  %v2883_v9 = vadd.f32 %v2840_v41, %v749_v1 }
  0xf0   : > { %v2885_v10 = vadd.f32 %v759_v37, %v741_v5  ;;  %v2888_v11 = vadd.f32 %v2840_v41, %v750_v6  ;;  %v614_v12 = vpop.f32.mrb[2].mxu0  ;;  %v2370_v13 = vpop.f32.mrb[2].mxu1 }
  0xf1   : > { %v2323_v14 = vmul.f32 -1.442695, %v2880_v8  ;;  %v2332_v15 = vmul.f32 -1.442695, %v2883_v9  ;;  %v743_v16 = vmul.f32 %v728_v60, %v614_v12  ;;  %v745_v17 = vmul.f32 %v2370_v13, %v728_v60  ;;  %v616_v18 = vpop.f32.mrb[3].mxu0  ;;  %v697_v19 = vpop.f32.mrb[3].mxu1 }
  0xf2   : > { %v2324_v20 = vmul.f32 -1.442695, %v2885_v10  ;;  %v2333_v21 = vmul.f32 -1.442695, %v2888_v11  ;;  %v744_v22 = vmul.f32 %v728_v60, %v616_v18  ;;  %v742_v23 = vmul.f32 %v723_v58, %v697_v19 }
  0xf3   : > { %2460 = vpow2.f32 %v2323_v14  ;;  %v2894_v24 = vadd.f32 %v764_v7, %v743_v16  ;;  %v2896_v25 = vadd.f32 %v764_v7, %v745_v17 }
  0xf4   : > { %2462 = vpow2.f32 %v2332_v15  ;;  %v2900_v27 = vadd.f32 %v764_v7, %v744_v22  ;;  %v2902_v28 = vadd.f32 %v759_v37, %v742_v23  ;;  %v620_v29 = vpop.f32.mrb[4].mxu0  ;;  %v2373_v30 = vpop.f32.mrb[4].mxu1  ;;  %v874_v15 = vlaneseq }
  0xf5   : > { %2464 = vpow2.f32 %v2324_v20  ;;  %v2326_v31 = vmul.f32 -1.442695, %v2894_v24  ;;  %v2328_v32 = vmul.f32 -1.442695, %v2896_v25  ;;  %v746_v33 = vmul.f32 %v2830_v35, %v620_v29  ;;  %v622_v58 = vpop.f32.mrb[5].mxu0  ;;  %v707_v60 = vpop.f32.mrb[5].mxu1 }
  0xf6   : > { %2466 = vpow2.f32 %v2333_v21  ;;  %v2327_v63 = vmul.f32 -1.442695, %v2900_v27  ;;  %v2325_v0 = vmul.f32 -1.442695, %v2902_v28  ;;  %v751_v37 = vmul.f32 %v2373_v30, %v2836_v39 }
  0xf7   : > { %2468 = vpow2.f32 %v2326_v31  ;;  %v2910_v1 = vadd.f32 %v769_v62, %v746_v33  ;;  %v747_v3 = vmul.f32 %v2830_v35, %v622_v58  ;;  %v748_v4 = vmul.f32 %v2830_v35, %v707_v60  ;;  %v2925_v35 = vpop.permute.xlu1 %1359 }
  0xf8   : > { %2470 = vpow2.f32 %v2328_v32  ;;  %v2915_v5 = vadd.f32 %v2840_v41, %v751_v37  ;;  %v2927_v23 = vshrl.u32 %v874_v15, 7 }
  0xf9   : > { %2472 = vpow2.f32 %v2327_v63  ;;  %v2329_v6 = vmul.f32 -1.442695, %v2910_v1  ;;  %v2918_v7 = vadd.f32 %v769_v62, %v747_v3  ;;  %v2920_v12 = vadd.f32 %v769_v62, %v748_v4  ;;  %v872_v4 = vld [vmem:[%s3803_s4] sm:$0x7] }
  0xfa   : > { %2474 = vpow2.f32 %v2325_v0  ;;  %v2334_v39 = vmul.f32 -1.442695, %v2915_v5  ;;  %3826 = vst [vmem:[#allocation3_spill] sm:$0xff] %v2927_v23  ;;  %v2932_v0 = vsub.s32 0, %v2927_v23 }
  0xfb   : > { %2476 = vpow2.f32 %v2329_v6  ;;  %v2330_v13 = vmul.f32 -1.442695, %v2918_v7  ;;  %v2331_v14 = vmul.f32 -1.442695, %v2920_v12  ;;  %v2929_v30 = vpop.permute.xlu1 %1452 }
  0xfc   : > { %2478 = vpow2.f32 %v2334_v39  ;;  %3827 = vst [vmem:[#allocation4_spill] sm:$0xff] %v2932_v0 }
  0xfd   : > { %v2461_v41 = vpop.eup %2460  ;;  %2480 = vpow2.f32 %v2330_v13  ;;  %v3817_v13 = vsub.s32 1, %v2927_v23 }
  0xfe   : > { %v2463_v16 = vpop.eup %2462  ;;  %v824_v17 = vadd.f32 1.0, %v2461_v41  ;;  %2482 = vpow2.f32 %v2331_v14 }
  0xff   : > { %v2465_v18 = vpop.eup %2464  ;;  %v833_v19 = vadd.f32 1.0, %v2463_v16  ;;  %v2938_v41 = vpop.permute.xlu1 %1363 }
 0x100   : > { %v2467_v20 = vpop.eup %2466  ;;  %2484 = vrcp.f32 %v824_v17  ;;  %v825_v21 = vadd.f32 1.0, %v2465_v18  ;;  %v877_v17 = vrot.slane %v872_v4, %v2932_v0 }
 0x101   : > { %v2469_v22 = vpop.eup %2468  ;;  %2486 = vrcp.f32 %v833_v19  ;;  %v834_v29 = vadd.f32 1.0, %v2467_v20  ;;  %v3818_v20 = vsub.s32 2, %v2927_v23 }
 0x102   : > { %v2471_v31 = vpop.eup %2470  ;;  %2488 = vrcp.f32 %v825_v21  ;;  %v827_v32 = vadd.f32 1.0, %v2469_v22 }
 0x103   : > { %v2473_v33 = vpop.eup %2472  ;;  %2490 = vrcp.f32 %v834_v29  ;;  %v829_v58 = vadd.f32 1.0, %v2471_v31  ;;  %v881_v29 = vrot.slane %v872_v4, %v3817_v13 }
 0x104   : > { %v2475_v60 = vpop.eup %2474  ;;  %2492 = vrcp.f32 %v827_v32  ;;  %v828_v62 = vadd.f32 1.0, %v2473_v33 }
 0x105   : > { %v2477_v63 = vpop.eup %2476  ;;  %2494 = vrcp.f32 %v829_v58  ;;  %v826_v37 = vadd.f32 1.0, %v2475_v60 }
 0x106   : > { %v2479_v3 = vpop.eup %2478  ;;  %2496 = vrcp.f32 %v828_v62  ;;  %v830_v6 = vadd.f32 1.0, %v2477_v63  ;;  %v2949_v62 = vpop.permute.xlu1 %1545 }
 0x107   : > { %v2481_v39 = vpop.eup %2480  ;;  %2498 = vrcp.f32 %v826_v37  ;;  %v835_v14 = vadd.f32 1.0, %v2479_v3 }
 0x108   : > { %v2483_v15 = vpop.eup %2482  ;;  %2500 = vrcp.f32 %v830_v6  ;;  %v831_v16 = vadd.f32 1.0, %v2481_v39 }
 0x109   : > { %2502 = vrcp.f32 %v835_v14  ;;  %v832_v18 = vadd.f32 1.0, %v2483_v15 }
 0x10a   : > { %v2485_v19 = vpop.eup %2484  ;;  %2504 = vrcp.f32 %v831_v16 }
 0x10b   : > { %v2487_v21 = vpop.eup %2486  ;;  %v860_v22 = vmul.f32 %v2485_v19, %v2880_v8  ;;  %2506 = vrcp.f32 %v832_v18  ;;  %v885_v8 = vrot.slane %v872_v4, %v3818_v20 }
 0x10c   : > { %v2489_v31 = vpop.eup %2488  ;;  %v869_v32 = vmul.f32 %v2487_v21, %v2883_v9 }
 0x10d   : > { %v2491_v33 = vpop.eup %2490  ;;  %v2946_v58 = vmul.f32 %v877_v17, %v860_v22  ;;  %v861_v60 = vmul.f32 %v2489_v31, %v2885_v10 }
 0x10e   : > { %v2493_v63 = vpop.eup %2492  ;;  %v2951_v37 = vmul.f32 %v877_v17, %v869_v32  ;;  %v870_v3 = vmul.f32 %v2491_v33, %v2888_v11  ;;  %v2975_v33 = vpop.permute.xlu1 %1460 }
 0x10f   : > { %v2495_v6 = vpop.eup %2494  ;;  %v2956_v39 = vmul.f32 %v881_v29, %v861_v60  ;;  %v863_v9 = vmul.f32 %v2493_v63, %v2894_v24  ;;  %v1075_v14 = vmul.f32 %v2832_v36, %v2946_v58  ;;  %v978_v10 = vmul.f32 %v2828_v34, %v2946_v58 }
 0x110   : > { %v2497_v15 = vpop.eup %2496  ;;  %v2963_v16 = vmul.f32 %v881_v29, %v870_v3  ;;  %v865_v18 = vmul.f32 %v2495_v6, %v2896_v25  ;;  %v1472_v6 = vmul.f32 %v2975_v33, %v2951_v37 }
 0x111   : > { %v2499_v11 = vpop.eup %2498  ;;  %v2966_v19 = vmul.f32 %v877_v17, %v863_v9  ;;  %v864_v4 = vmul.f32 %v2497_v15, %v2900_v27  ;;  %1099 = vrot.lane.b32.xlu0 %v1075_v14, %s2594_s26  ;;  %1002 = vrot.lane.b32.xlu1 %v978_v10, %s2595_s28  ;;  %v987_v27 = vmul.f32 %v2856_v49, %v2951_v37 }
 0x112   : > { %v2501_v24 = vpop.eup %2500  ;;  %v894_v21 = vmul.f32 %v885_v8, %v865_v18  ;;  %v862_v22 = vmul.f32 %v2499_v11, %v2902_v28  ;;  %v1173_v18 = vmul.f32 %v2860_v51, %v2956_v39  ;;  %v1181_v11 = vmul.f32 %v2874_v59, %v2951_v37 }
 0x113   : > { %v2503_v31 = vpop.eup %2502  ;;  %v2972_v32 = vmul.f32 %v881_v29, %v864_v4  ;;  %v866_v25 = vmul.f32 %v2501_v24, %v2910_v1  ;;  %v1085_v4 = vmul.f32 %v2864_v53, %v2963_v16  ;;  %v1366_v24 = vmul.f32 %v2876_v61, %v2946_v58 }
 0x114   : > { %v2505_v60 = vpop.eup %2504  ;;  %907 = vst.msk [vmem:[#allocation2 + $0x28] sm:$0xff] %vm903_vm1, %v894_v21  ;;  %v891_v63 = vmul.f32 %v885_v8, %v862_v22  ;;  %v871_v3 = vmul.f32 %v2503_v31, %v2915_v5  ;;  %v1172_v5 = vmul.f32 %v2860_v51, %v2946_v58  ;;  %v1270_v21 = vmul.f32 %v2842_v42, %v2956_v39 }
 0x115   : > { %v2507_v28 = vpop.eup %2506  ;;  %v2983_v9 = vmul.f32 %v877_v17, %v866_v25  ;;  %v867_v14 = vmul.f32 %v2505_v60, %v2918_v7  ;;  %1020 = vrot.lane.b32.xlu0 %v987_v27, %s2595_s28  ;;  %1505 = vrot.lane.b32.xlu1 %v1472_v6, %s2596_s29  ;;  %v1076_v7 = vmul.f32 %v2832_v36, %v2956_v39 }
 0x116   : > { %904 = vst.msk [vmem:[#allocation2 + $0x10] sm:$0xff] %vm903_vm1, %v891_v63  ;;  %v900_v1 = vmul.f32 %v885_v8, %v871_v3  ;;  %v868_v10 = vmul.f32 %v2507_v28, %v2920_v12  ;;  %v1084_v12 = vmul.f32 %v2864_v53, %v2951_v37  ;;  %v1278_v22 = vmul.f32 %v2898_v26, %v2951_v37 }
 0x117   : > { %v2990_v15 = vmul.f32 %v881_v29, %v867_v14  ;;  %v988_v29 = vmul.f32 %v2856_v49, %v2963_v16  ;;  %v1182_v31 = vmul.f32 %v2874_v59, %v2963_v16  ;;  %v1463_v25 = vmul.f32 %v2854_v48, %v2946_v58 }
 0x118   : > { %913 = vst.msk [vmem:[#allocation2 + $0x58] sm:$0xff] %vm903_vm1, %v900_v1  ;;  %v897_v17 = vmul.f32 %v885_v8, %v868_v10  ;;  %v1269_v8 = vmul.f32 %v2842_v42, %v2946_v58  ;;  %v1367_v27 = vmul.f32 %v2876_v61, %v2956_v39  ;;  %v1375_v60 = vmul.f32 %v2938_v41, %v2951_v37 }
 0x119   : > { %1196 = vrot.lane.b32.xlu0 %v1172_v5, %s2597_s30  ;;  %1101 = vrot.lane.b32.xlu1 %v1076_v7, %s2594_s26  ;;  %v1279_v63 = vmul.f32 %v2898_v26, %v2963_v16  ;;  %v1560_v3 = vmul.f32 %v2949_v62, %v2946_v58  ;;  %v1464_v6 = vmul.f32 %v2854_v48, %v2956_v39 }
 0x11a   : > { %910 = vst.msk [vmem:[#allocation2 + $0x40] sm:$0xff] %vm903_vm1, %v897_v17  ;;  %v979_v28 = vmul.f32 %v2828_v34, %v2956_v39  ;;  %v1376_v14 = vmul.f32 %v2938_v41, %v2963_v16  ;;  %v1473_v1 = vmul.f32 %v2975_v33, %v2963_v16  ;;  %v1561_v10 = vmul.f32 %v2949_v62, %v2956_v39 }
 0x11b   : > { %v981_v5 = vmul.f32 %v2844_v43, %v2966_v19  ;;  %v3062_v17 = vld [vmem:[#allocation2 + $0x28] sm:$0xff]  ;;  %v1078_v7 = vmul.f32 %v2852_v47, %v2966_v19 }
 0x11d   : > { %1117 = vrot.lane.b32.xlu0 %v1084_v12, %s2594_s26  ;;  %1022 = vrot.lane.b32.xlu1 %v988_v29, %s2595_s28  ;;  %v983_v12 = vmul.f32 %v2844_v43, %v3062_v17  ;;  %v1080_v29 = vmul.f32 %v2852_v47, %v3062_v17 }
 0x121   : > { %1293 = vrot.lane.b32.xlu0 %v1269_v8, %s2598_s17  ;;  %1198 = vrot.lane.b32.xlu1 %v1173_v18, %s2597_s30  ;;  %v3072_v8 = vld [vmem:[#allocation2 + $0x10] sm:$0xff] }
 0x122   : > { %v1077_v18 = vmul.f32 %v2832_v36, %v3072_v8  ;;  %v1174_v36 = vmul.f32 %v2860_v51, %v3072_v8 }
 0x125   : > { %1214 = vrot.lane.b32.xlu0 %v1181_v11, %s2597_s30  ;;  %1119 = vrot.lane.b32.xlu1 %v1085_v4, %s2594_s26  ;;  %v1175_v11 = vmul.f32 %v2838_v40, %v2966_v19  ;;  %v1079_v4 = vmul.f32 %v2852_v47, %v2972_v32  ;;  %v1176_v47 = vmul.f32 %v2838_v40, %v2972_v32 }
 0x129   : > { %1390 = vrot.lane.b32.xlu0 %v1366_v24, %s2599_s18  ;;  %1295 = vrot.lane.b32.xlu1 %v1270_v21, %s2598_s17  ;;  %v1177_v24 = vmul.f32 %v2838_v40, %v3062_v17  ;;  %v1272_v21 = vmul.f32 %v2872_v57, %v2966_v19  ;;  %v1273_v40 = vmul.f32 %v2872_v57, %v2972_v32 }
 0x12d   : > { %1311 = vrot.lane.b32.xlu0 %v1278_v22, %s2598_s17  ;;  %1216 = vrot.lane.b32.xlu1 %v1182_v31, %s2597_s30  ;;  %v3092_v22 = vpop.permute.xlu1 %1553  ;;  %v1274_v31 = vmul.f32 %v2872_v57, %v3062_v17  ;;  %v3124_v57 = vpop.permute.xlu0 %932 }
 0x131   : > { %1487 = vrot.lane.b32.xlu0 %v1463_v25, %s2596_s29  ;;  %1392 = vrot.lane.b32.xlu1 %v1367_v27, %s2599_s18  ;;  %v3102_v51 = vpop.permute.xlu1 %1646  ;;  %v1271_v25 = vmul.f32 %v2842_v42, %v3072_v8  ;;  %v1369_v27 = vmul.f32 %v2850_v46, %v2966_v19  ;;  %v1368_v42 = vmul.f32 %v2876_v61, %v3072_v8 }
 0x132   : > { %v1465_v61 = vmul.f32 %v2854_v48, %v3072_v8 }
 0x135   : > { %1408 = vrot.lane.b32.xlu0 %v1375_v60, %s2599_s18  ;;  %1313 = vrot.lane.b32.xlu1 %v1279_v63, %s2598_s17  ;;  %v1371_v60 = vmul.f32 %v2850_v46, %v3062_v17  ;;  %v3114_v63 = vpop.permute.xlu1 %1557 }
 0x139   : > { %1584 = vrot.lane.b32.xlu0 %v1560_v3, %s2600_s19  ;;  %1489 = vrot.lane.b32.xlu1 %v1464_v6, %s2596_s29  ;;  %v1466_v3 = vmul.f32 %v2929_v30, %v2966_v19  ;;  %v3126_v6 = vpop.permute.xlu1 %1654 }
 0x13d   : > { %1004 = vrot.lane.b32.xlu0 %v979_v28, %s2595_s28  ;;  %1410 = vrot.lane.b32.xlu1 %v1376_v14, %s2599_s18  ;;  %v1370_v28 = vmul.f32 %v2850_v46, %v2972_v32  ;;  %v1468_v14 = vmul.f32 %v2929_v30, %v3062_v17  ;;  %v1467_v46 = vmul.f32 %v2929_v30, %v2972_v32 }
 0x13e   : > { %v1564_v30 = vmul.f32 %v2862_v52, %v2972_v32 }
 0x141   : > { %1507 = vrot.lane.b32.xlu0 %v1473_v1, %s2596_s29  ;;  %1586 = vrot.lane.b32.xlu1 %v1561_v10, %s2600_s19  ;;  %v1563_v1 = vmul.f32 %v2862_v52, %v2966_v19  ;;  %v3138_v10 = vpop.permute.xlu0 %947 }
 0x145   : > { %1008 = vrot.lane.b32.xlu0 %v981_v5, %s2595_s28  ;;  %1105 = vrot.lane.b32.xlu1 %v1078_v7, %s2594_s26  ;;  %v3140_v5 = vpop.permute.xlu1 %937  ;;  %v1565_v7 = vmul.f32 %v2862_v52, %v3062_v17  ;;  %v3150_v48 = vpop.permute.xlu0 %1744 }
 0x149   : > { %1012 = vrot.lane.b32.xlu0 %v983_v12, %s2595_s28  ;;  %1109 = vrot.lane.b32.xlu1 %v1080_v29, %s2594_s26  ;;  %v3152_v12 = vpop.permute.xlu1 %942  ;;  %v1562_v29 = vmul.f32 %v2949_v62, %v3072_v8  ;;  %v984_v62 = vmul.f32 %v2848_v45, %v2983_v9 }
 0x14d   : > { %1103 = vrot.lane.b32.xlu0 %v1077_v18, %s2594_s26  ;;  %1202 = vrot.lane.b32.xlu1 %v1175_v11, %s2597_s30  ;;  %v980_v18 = vmul.f32 %v2828_v34, %v3072_v8  ;;  %v3162_v11 = vpop.permute.xlu1 %1749 }
 0x151   : > { %1107 = vrot.lane.b32.xlu0 %v1079_v4, %s2594_s26  ;;  %1206 = vrot.lane.b32.xlu1 %v1177_v24, %s2597_s30  ;;  %v3164_v4 = vld [vmem:[#allocation2 + $0x58] sm:$0xff]  ;;  %v982_v24 = vmul.f32 %v2844_v43, %v2972_v32  ;;  %v3177_v52 = vpop.permute.xlu1 %1780 }
 0x152   : > { %v989_v34 = vmul.f32 %v2856_v49, %v3164_v4  ;;  %v1086_v43 = vmul.f32 %v2864_v53, %v3164_v4 }
 0x155   : > { %1200 = vrot.lane.b32.xlu0 %v1174_v36, %s2597_s30  ;;  %1299 = vrot.lane.b32.xlu1 %v1272_v21, %s2598_s17  ;;  %v3168_v36 = vpop.permute.xlu0 %1754 }
 0x156   : > { %3828 = vst [vmem:[#allocation5_spill] sm:$0xff] %v3168_v36 }
 0x159   : > { %1204 = vrot.lane.b32.xlu0 %v1176_v47, %s2597_s30  ;;  %1303 = vrot.lane.b32.xlu1 %v1274_v31, %s2598_s17  ;;  %v3180_v21 = vpop.permute.xlu0 %1785  ;;  %v1081_v47 = vmul.f32 %v2834_v38, %v2983_v9 }
 0x15d   : > { %1297 = vrot.lane.b32.xlu0 %v1271_v25, %s2598_s17  ;;  %1396 = vrot.lane.b32.xlu1 %v1369_v27, %s2599_s18  ;;  %v1183_v25 = vmul.f32 %v2874_v59, %v3164_v4  ;;  %v1178_v27 = vmul.f32 %v2868_v55, %v2983_v9  ;;  %v1377_v59 = vmul.f32 %v2938_v41, %v3164_v4 }
 0x15e   : > { %v1469_v41 = vmul.f32 %v2858_v50, %v2983_v9 }
 0x161   : > { %1301 = vrot.lane.b32.xlu0 %v1273_v40, %s2598_s17  ;;  %1400 = vrot.lane.b32.xlu1 %v1371_v60, %s2599_s18  ;;  %v1280_v40 = vmul.f32 %v2898_v26, %v3164_v4  ;;  %v1566_v26 = vmul.f32 %v3092_v22, %v2983_v9 }
 0x165   : > { %1394 = vrot.lane.b32.xlu0 %v1368_v42, %s2599_s18  ;;  %1493 = vrot.lane.b32.xlu1 %v1466_v3, %s2596_s29  ;;  %v1275_v42 = vmul.f32 %v2846_v44, %v2983_v9 }
 0x169   : > { %1398 = vrot.lane.b32.xlu0 %v1370_v28, %s2599_s18  ;;  %1497 = vrot.lane.b32.xlu1 %v1468_v14, %s2596_s29  ;;  %v1372_v28 = vmul.f32 %v2925_v35, %v2983_v9 }
 0x16d   : > { %1491 = vrot.lane.b32.xlu0 %v1465_v61, %s2596_s29  ;;  %1590 = vrot.lane.b32.xlu1 %v1563_v1, %s2600_s19 }
 0x171   : > { %1495 = vrot.lane.b32.xlu0 %v1467_v46, %s2596_s29  ;;  %1594 = vrot.lane.b32.xlu1 %v1565_v7, %s2600_s19  ;;  %v985_v7 = vmul.f32 %v2848_v45, %v2990_v15 }
 0x175   : > { %1588 = vrot.lane.b32.xlu0 %v1562_v29, %s2600_s19  ;;  %1006 = vrot.lane.b32.xlu1 %v980_v18, %s2595_s28  ;;  %v1474_v29 = vmul.f32 %v2975_v33, %v3164_v4 }
 0x179   : > { %1592 = vrot.lane.b32.xlu0 %v1564_v30, %s2600_s19  ;;  %1010 = vrot.lane.b32.xlu1 %v982_v24, %s2595_s28  ;;  %v3232_v30 = vld [vmem:[#allocation2 + $0x40] sm:$0xff] }
 0x17d   : > { %1024 = vrot.lane.b32.xlu0 %v989_v34, %s2595_s28  ;;  %1014 = vrot.lane.b32.xlu1 %v984_v62, %s2595_s28  ;;  %v1082_v34 = vmul.f32 %v2834_v38, %v2990_v15 }
 0x181   : > { %1121 = vrot.lane.b32.xlu0 %v1086_v43, %s2594_s26  ;;  %1111 = vrot.lane.b32.xlu1 %v1081_v47, %s2594_s26  ;;  %v986_v43 = vmul.f32 %v2848_v45, %v3232_v30  ;;  %v1179_v47 = vmul.f32 %v2868_v55, %v2990_v15  ;;  %v1276_v45 = vmul.f32 %v2846_v44, %v2990_v15 }
 0x183   : > { %v3188_v49 = vpop.permute.xlu0 %1099  ;;  %v3190_v31 = vpop.permute.xlu1 %1002 }
 0x185   : > { %1218 = vrot.lane.b32.xlu0 %v1183_v25, %s2597_s30  ;;  %1208 = vrot.lane.b32.xlu1 %v1178_v27, %s2597_s30  ;;  %v1083_v27 = vmul.f32 %v2834_v38, %v3232_v30  ;;  %v1373_v38 = vmul.f32 %v2925_v35, %v2990_v15 }
 0x187   : > { %v1021_v53 = vpop.permute.xlu0 %1020  ;;  %v3200_v60 = vpop.permute.xlu1 %1505 }
 0x189   : > { %1315 = vrot.lane.b32.xlu0 %v1280_v40, %s2598_s17  ;;  %1305 = vrot.lane.b32.xlu1 %v1275_v42, %s2598_s17 }
 0x18b   : > { %v3208_v3 = vpop.permute.xlu0 %1196  ;;  %v3212_v14 = vpop.permute.xlu1 %1101 }
 0x18d   : > { %1412 = vrot.lane.b32.xlu0 %v1377_v59, %s2599_s18  ;;  %1402 = vrot.lane.b32.xlu1 %v1372_v28, %s2599_s18  ;;  %v1180_v59 = vmul.f32 %v2868_v55, %v3232_v30 }
 0x18f   : > { %v1118_v61 = vpop.permute.xlu0 %1117  ;;  %v3218_v1 = vpop.permute.xlu1 %1022 }
 0x190   : > { %v1033_v55 = vsel %vm1026_vm2, %v1021_v53, %v3218_v1  ;;  %v1568_v53 = vmul.f32 %v3092_v22, %v3232_v30 }
 0x191   : > { %1596 = vrot.lane.b32.xlu0 %v1566_v26, %s2600_s19  ;;  %1499 = vrot.lane.b32.xlu1 %v1469_v41, %s2596_s29  ;;  %v1277_v41 = vmul.f32 %v2846_v44, %v3232_v30 }
 0x193   : > { %v3224_v46 = vpop.permute.xlu0 %1293  ;;  %v3230_v18 = vpop.permute.xlu1 %1198 }
 0x195   : > { %1016 = vrot.lane.b32.xlu0 %v985_v7, %s2595_s28  ;;  %1509 = vrot.lane.b32.xlu1 %v1474_v29, %s2596_s29  ;;  %v1470_v29 = vmul.f32 %v2858_v50, %v2990_v15 }
 0x197   : > { %v1215_v24 = vpop.permute.xlu0 %1214  ;;  %v3238_v62 = vpop.permute.xlu1 %1119 }
 0x198   : > { %v1130_v44 = vsel %vm1123_vm3, %v1118_v61, %v3238_v62  ;;  %v1471_v61 = vmul.f32 %v2858_v50, %v3232_v30  ;;  %v1567_v50 = vmul.f32 %v3092_v22, %v2990_v15 }
 0x199   : > { %1113 = vrot.lane.b32.xlu0 %v1082_v34, %s2594_s26  ;;  %1018 = vrot.lane.b32.xlu1 %v986_v43, %s2595_s28  ;;  %v1374_v34 = vmul.f32 %v2925_v35, %v3232_v30  ;;  %v959_v43 = vmul.f32 %v3138_v10, %v2951_v37 }
 0x19b   : > { %v3244_v33 = vpop.permute.xlu0 %1390  ;;  %v3248_v25 = vpop.permute.xlu1 %1295 }
 0x19d   : > { %1210 = vrot.lane.b32.xlu0 %v1179_v47, %s2597_s30  ;;  %1115 = vrot.lane.b32.xlu1 %v1083_v27, %s2594_s26  ;;  %v1056_v27 = vadd.f32 %v1033_v55, %v959_v43  ;;  %v1658_v43 = vmul.f32 %v2866_v54, %v2956_v39 }
 0x19f   : > { %v1312_v40 = vpop.permute.xlu0 %1311  ;;  %v3256_v42 = vpop.permute.xlu1 %1216 }
 0x1a0   : > { %v1227_v35 = vsel %vm1220_vm4, %v1215_v24, %v3256_v42  ;;  %v950_v24 = vmul.f32 %v3124_v57, %v2946_v58 }
 0x1a1   : > { %1307 = vrot.lane.b32.xlu0 %v1276_v45, %s2598_s17  ;;  %1212 = vrot.lane.b32.xlu1 %v1180_v59, %s2597_s30  ;;  %v1153_v59 = vadd.f32 %v1130_v44, %v1056_v27 }
 0x1a3   : > { %v1488_v28 = vpop.permute.xlu0 %1487  ;;  %v3264_v26 = vpop.permute.xlu1 %1392 }
 0x1a5   : > { %1404 = vrot.lane.b32.xlu0 %v1373_v38, %s2599_s18  ;;  %1309 = vrot.lane.b32.xlu1 %v1277_v41, %s2598_s17 }
 0x1a7   : > { %v1409_v7 = vpop.permute.xlu0 %1408  ;;  %v3278_v47 = vpop.permute.xlu1 %1313 }
 0x1a8   : > { %v1324_v41 = vsel %vm1317_vm6, %v1312_v40, %v3278_v47 }
 0x1a9   : > { %1501 = vrot.lane.b32.xlu0 %v1470_v29, %s2596_s29  ;;  %1406 = vrot.lane.b32.xlu1 %v1374_v34, %s2599_s18  ;;  %v1250_v29 = vadd.f32 %v1227_v35, %v1153_v59  ;;  %v1124_v35 = vsel %vm1123_vm3, %v3188_v49, %v3212_v14  ;;  %v1660_v59 = vmul.f32 %v3102_v51, %v2966_v19 }
 0x1aa   : > { %v1657_v49 = vmul.f32 %v2866_v54, %v2946_v58  ;;  %v1415_v58 = vsel %vm1414_vm7, %v3244_v33, %v3264_v26  ;;  %v1661_v33 = vmul.f32 %v3102_v51, %v2972_v32 }
 0x1ab   : > { %v1585_v45 = vpop.permute.xlu0 %1584  ;;  %v3288_v38 = vpop.permute.xlu1 %1489  ;;  %v1347_v40 = vadd.f32 %v1324_v41, %v1250_v29 }
 0x1ac   : > { %v1512_v55 = vsel %vm1511_vm5, %v1488_v28, %v3288_v38 }
 0x1ad   : > { %1600 = vrot.lane.b32.xlu0 %v1568_v53, %s2600_s19  ;;  %1503 = vrot.lane.b32.xlu1 %v1471_v61, %s2596_s29 }
 0x1af   : > { %v3300_v34 = vpop.permute.xlu0 %1004  ;;  %v3306_v44 = vpop.permute.xlu1 %1410 }
 0x1b0   : > { %v1027_v28 = vsel %vm1026_vm2, %v3190_v31, %v3300_v34  ;;  %v1421_v27 = vsel %vm1414_vm7, %v1409_v7, %v3306_v44  ;;  %v1221_v7 = vsel %vm1220_vm4, %v3208_v3, %v3230_v18  ;;  %v1662_v3 = vmul.f32 %v3102_v51, %v3062_v17 }
 0x1b1   : > { %v1047_v53 = vadd.f32 %v1027_v28, %v950_v24  ;;  %1683 = vrot.lane.b32.xlu0 %v1658_v43, %s2601_s20  ;;  %v3317_v22 = vadd.f32 %v1421_v27, %v1347_v40  ;;  %1598 = vrot.lane.b32.xlu1 %v1567_v50, %s2600_s19  ;;  %v1318_v43 = vsel %vm1317_vm6, %v3224_v46, %v3248_v25 }
 0x1b2   : > { %v955_v46 = vmul.f32 %v3140_v5, %v3062_v17  ;;  %v1570_v17 = vmul.f32 %v3114_v63, %v2963_v16 }
 0x1b3   : > { %3829 = vst [vmem:[#allocation6_spill] sm:$0xff] %v3317_v22  ;;  %v1144_v31 = vadd.f32 %v1124_v35, %v1047_v53  ;;  %v3322_v61 = vpop.permute.xlu0 %1507  ;;  %v3327_v41 = vpop.permute.xlu1 %1586  ;;  %v1776_v53 = vld [vmem:[%s3806_s7 + $0x10] sm:$0xff] }
 0x1b4   : > { %v1609_v24 = vsel %vm1608_vm8, %v1585_v45, %v3327_v41  ;;  %v1659_v45 = vmul.f32 %v2866_v54, %v3072_v8 }
 0x1b5   : > { %v1241_v29 = vadd.f32 %v1221_v7, %v1144_v31  ;;  %1687 = vrot.lane.b32.xlu0 %v1660_v59, %s2601_s20  ;;  %1681 = vrot.lane.b32.xlu1 %v1657_v49, %s2601_s20 }
 0x1b7   : > { %v1338_v50 = vadd.f32 %v1318_v43, %v1241_v29  ;;  %v3340_v40 = vpop.permute.xlu0 %1008  ;;  %v1106_v28 = vpop.permute.xlu1 %1105 }
 0x1b9   : > { %v1435_v27 = vadd.f32 %v1415_v58, %v1338_v50  ;;  %1691 = vrot.lane.b32.xlu0 %v1662_v3, %s2601_s20  ;;  %1685 = vrot.lane.b32.xlu1 %v1659_v45, %s2601_s20  ;;  %v1569_v3 = vmul.f32 %v3114_v63, %v2951_v37 }
 0x1bb   : > { %v1532_v35 = vadd.f32 %v1512_v55, %v1435_v27  ;;  %v3354_v59 = vpop.permute.xlu0 %1012  ;;  %v1110_v31 = vpop.permute.xlu1 %1109  ;;  %v1741_v55 = vld [vmem:[%s3805_s6 + $0x18] sm:$0xff] }
 0x1bc   : > { %v1052_v54 = vadd.f32 %v3354_v59, %v955_v46 }
 0x1bd   : > { %v3359_v7 = vadd.f32 %v1609_v24, %v1532_v35  ;;  %1790 = vperm.xlu0 %2457, %v1776_v53   ;;  %1689 = vrot.lane.b32.xlu1 %v1661_v33, %s2601_s20  ;;  %v1663_v24 = vmul.f32 %v2870_v56, %v2983_v9  ;;  %v1665_v53 = vmul.f32 %v2870_v56, %v3232_v30 }
 0x1be   : > { %v1149_v49 = vadd.f32 %v1110_v31, %v1052_v54  ;;  %v1571_v35 = vmul.f32 %v3114_v63, %v3164_v4 }
 0x1bf   : > { %v3364_v29 = vpop.permute.xlu0 %1103  ;;  %v1203_v43 = vpop.permute.xlu1 %1202 }
 0x1c1   : > { %1604 = vrot.lane.b32.xlu0 %v1570_v17, %s2600_s19  ;;  %1759 = vperm.xlu1 %2459, %v1741_v55   ;;  %v1664_v55 = vmul.f32 %v2870_v56, %v2990_v15  ;;  %v1667_v56 = vmul.f32 %v3126_v6, %v2963_v16 }
 0x1c3   : > { %v1108_v51 = vpop.permute.xlu0 %1107  ;;  %v1207_v50 = vpop.permute.xlu1 %1206 }
 0x1c4   : > { %v3375_v58 = vsel %vm1123_vm3, %v1106_v28, %v1108_v51  ;;  %v3378_v45 = vsel %vm1123_vm3, %v1108_v51, %v1110_v31  ;;  %v1246_v27 = vadd.f32 %v1207_v50, %v1149_v49  ;;  %v1666_v28 = vmul.f32 %v3126_v6, %v2951_v37 }
 0x1c5   : > { %1693 = vrot.lane.b32.xlu0 %v1663_v24, %s2601_s20  ;;  %1602 = vrot.lane.b32.xlu1 %v1569_v3, %s2600_s19  ;;  %v1668_v51 = vmul.f32 %v3126_v6, %v3164_v4 }
 0x1c7   : > { %v1201_v46 = vpop.permute.xlu0 %1200  ;;  %v1300_v33 = vpop.permute.xlu1 %1299 }
 0x1c9   : > { %1697 = vrot.lane.b32.xlu0 %v1665_v53, %s2601_s20  ;;  %1606 = vrot.lane.b32.xlu1 %v1571_v35, %s2600_s19 }
 0x1cb   : > { %v1205_v31 = vpop.permute.xlu0 %1204  ;;  %v1304_v54 = vpop.permute.xlu1 %1303 }
 0x1cc   : > { %v3391_v49 = vsel %vm1220_vm4, %v1203_v43, %v1205_v31  ;;  %v3394_v17 = vsel %vm1220_vm4, %v1205_v31, %v1207_v50  ;;  %v1343_v63 = vadd.f32 %v1304_v54, %v1246_v27  ;;  %v1777_v43 = vld [vmem:[%s3806_s7 + $0x18] sm:$0xff] }
 0x1cd   : > { %1699 = vrot.lane.b32.xlu0 %v1666_v28, %s2601_s20  ;;  %1695 = vrot.lane.b32.xlu1 %v1664_v55, %s2601_s20 }
 0x1cf   : > { %v1298_v37 = vpop.permute.xlu0 %1297  ;;  %v1397_v24 = vpop.permute.xlu1 %1396 }
 0x1d1   : > { %1703 = vrot.lane.b32.xlu0 %v1668_v51, %s2601_s20  ;;  %1795 = vperm.xlu1 %2459, %v1777_v43  }
 0x1d3   : > { %v1302_v3 = vpop.permute.xlu0 %1301  ;;  %v1401_v50 = vpop.permute.xlu1 %1400 }
 0x1d4   : > { %v1320_v27 = vsel %vm1317_vm6, %v1300_v33, %v1302_v3  ;;  %v1321_v53 = vsel %vm1317_vm6, %v1302_v3, %v1304_v54  ;;  %v1440_v35 = vadd.f32 %v1401_v50, %v1343_v63 }
 0x1d5   : > { %1701 = vrot.lane.b32.xlu1 %v1667_v56, %s2601_s20 }
 0x1d7   : > { %v1395_v28 = vpop.permute.xlu0 %1394  ;;  %v1494_v31 = vpop.permute.xlu1 %1493 }
 0x1db   : > { %v1399_v55 = vpop.permute.xlu0 %1398  ;;  %v1498_v2 = vpop.permute.xlu1 %1497 }
 0x1dc   : > { %v1417_v13 = vsel %vm1414_vm7, %v1397_v24, %v1399_v55  ;;  %v1418_v51 = vsel %vm1414_vm7, %v1399_v55, %v1401_v50  ;;  %v1537_v43 = vadd.f32 %v1498_v2, %v1440_v35  ;;  %v952_v24 = vmul.f32 %v3124_v57, %v3072_v8 }
 0x1dd   : > { %v951_v35 = vmul.f32 %v3124_v57, %v2956_v39  ;;  %v953_v8 = vmul.f32 %v3140_v5, %v2966_v19  ;;  %v954_v39 = vmul.f32 %v3140_v5, %v2972_v32  ;;  %v1222_v57 = vsel %vm1220_vm4, %v3230_v18, %v1201_v46 }
 0x1de   : > { %v1319_v19 = vsel %vm1317_vm6, %v3248_v25, %v1298_v37  ;;  %v960_v32 = vmul.f32 %v3138_v10, %v2963_v16  ;;  %v961_v5 = vmul.f32 %v3138_v10, %v3164_v4  ;;  %v1416_v25 = vsel %vm1414_vm7, %v3264_v26, %v1395_v28 }
 0x1df   : > { %v1492_v20 = vpop.permute.xlu0 %1491  ;;  %v3413_v0 = vpop.permute.xlu1 %1590 }
 0x1e0   : > { %v1513_v6 = vsel %vm1511_vm5, %v3288_v38, %v1492_v20 }
 0x1e3   : > { %v1496_v33 = vpop.permute.xlu0 %1495  ;;  %v3417_v54 = vpop.permute.xlu1 %1594 }
 0x1e4   : > { %v1514_v63 = vsel %vm1511_vm5, %v1494_v31, %v1496_v33  ;;  %v1515_v3 = vsel %vm1511_vm5, %v1496_v33, %v1498_v2  ;;  %v3422_v56 = vadd.f32 %v3417_v54, %v1537_v43  ;;  %v1125_v2 = vsel %vm1123_vm3, %v3212_v14, %v3364_v29 }
 0x1e7   : > { %v3426_v50 = vpop.permute.xlu0 %1588  ;;  %v1007_v55 = vpop.permute.xlu1 %1006 }
 0x1e8   : > { %v1028_v38 = vsel %vm1026_vm2, %v3300_v34, %v1007_v55  ;;  %v1049_v23 = vadd.f32 %v1007_v55, %v952_v24  ;;  %v1610_v26 = vsel %vm1608_vm8, %v3327_v41, %v3426_v50 }
 0x1e9   : > { %v1048_v36 = vadd.f32 %v1028_v38, %v951_v35 }
 0x1ea   : > { %v1146_v31 = vadd.f32 %v3364_v29, %v1049_v23 }
 0x1eb   : > { %v1593_v43 = vpop.permute.xlu0 %1592  ;;  %v1145_v33 = vadd.f32 %v1125_v2, %v1048_v36  ;;  %v1011_v22 = vpop.permute.xlu1 %1010 }
 0x1ec   : > { %v1243_v34 = vadd.f32 %v1201_v46, %v1146_v31  ;;  %v1029_v24 = vsel %vm1026_vm2, %v3340_v40, %v1011_v22  ;;  %v1030_v14 = vsel %vm1026_vm2, %v1011_v22, %v3354_v59  ;;  %v1612_v41 = vsel %vm1608_vm8, %v1593_v43, %v3417_v54 }
 0x1ed   : > { %v1242_v23 = vadd.f32 %v1222_v57, %v1145_v33  ;;  %v1050_v29 = vadd.f32 %v1029_v24, %v953_v8  ;;  %v1051_v36 = vadd.f32 %v1030_v14, %v954_v39 }
 0x1ee   : > { %v1340_v35 = vadd.f32 %v1298_v37, %v1243_v34 }
 0x1ef   : > { %v1025_v18 = vpop.permute.xlu0 %1024  ;;  %v1339_v46 = vadd.f32 %v1319_v19, %v1242_v23  ;;  %v1147_v40 = vadd.f32 %v3375_v58, %v1050_v29  ;;  %v1148_v55 = vadd.f32 %v3378_v45, %v1051_v36  ;;  %v1015_v59 = vpop.permute.xlu1 %1014 }
 0x1f0   : > { %v1034_v22 = vsel %vm1026_vm2, %v3218_v1, %v1025_v18  ;;  %v1437_v37 = vadd.f32 %v1395_v28, %v1340_v35  ;;  %v1058_v2 = vadd.f32 %v1025_v18, %v961_v5  ;;  %v956_v18 = vmul.f32 %v3152_v12, %v2983_v9 }
 0x1f1   : > { %v1057_v38 = vadd.f32 %v1034_v22, %v960_v32  ;;  %v1436_v16 = vadd.f32 %v1416_v25, %v1339_v46  ;;  %v1244_v31 = vadd.f32 %v3391_v49, %v1147_v40  ;;  %v1245_v10 = vadd.f32 %v3394_v17, %v1148_v55 }
 0x1f2   : > { %v3460_v4 = vadd.f32 %v1492_v20, %v1437_v37 }
 0x1f3   : > { %v1122_v58 = vpop.permute.xlu0 %1121  ;;  %v1533_v33 = vadd.f32 %v1513_v6, %v1436_v16  ;;  %v1341_v45 = vadd.f32 %v1320_v27, %v1244_v31  ;;  %v1342_v8 = vadd.f32 %v1321_v53, %v1245_v10  ;;  %v1112_v39 = vpop.permute.xlu1 %1111 }
 0x1f4   : > { %v1131_v1 = vsel %vm1123_vm3, %v3238_v62, %v1122_v58  ;;  %v1155_v57 = vadd.f32 %v1122_v58, %v1058_v2  ;;  %v1611_v62 = vsel %vm1608_vm8, %v3413_v0, %v1593_v43 }
 0x1f5   : > { %v1154_v28 = vadd.f32 %v1131_v1, %v1057_v38  ;;  %v3467_v34 = vadd.f32 %v1610_v26, %v1533_v33  ;;  %v1438_v49 = vadd.f32 %v1417_v13, %v1341_v45  ;;  %v1439_v17 = vadd.f32 %v1418_v51, %v1342_v8 }
 0x1f7   : > { %v1219_v20 = vpop.permute.xlu0 %1218  ;;  %v1209_v53 = vpop.permute.xlu1 %1208  ;;  %v1535_v24 = vadd.f32 %v1514_v63, %v1438_v49  ;;  %v1536_v14 = vadd.f32 %v1515_v3, %v1439_v17 }
 0x1f8   : > { %v1228_v6 = vsel %vm1220_vm4, %v3256_v42, %v1219_v20  ;;  %v1252_v27 = vadd.f32 %v1219_v20, %v1155_v57 }
 0x1f9   : > { %v1251_v23 = vadd.f32 %v1228_v6, %v1154_v28  ;;  %v3475_v29 = vadd.f32 %v1611_v62, %v1535_v24  ;;  %v3477_v36 = vadd.f32 %v1612_v41, %v1536_v14 }
 0x1fb   : > { %v1316_v13 = vpop.permute.xlu0 %1315  ;;  %v1306_v19 = vpop.permute.xlu1 %1305 }
 0x1fc   : > { %v1325_v51 = vsel %vm1317_vm6, %v3278_v47, %v1316_v13  ;;  %v1349_v42 = vadd.f32 %v1316_v13, %v1252_v27 }
 0x1fd   : > { %v1348_v35 = vadd.f32 %v1325_v51, %v1251_v23 }
 0x1ff   : > { %v1413_v63 = vpop.permute.xlu0 %1412  ;;  %v1403_v32 = vpop.permute.xlu1 %1402 }
 0x200   : > { %v1422_v3 = vsel %vm1414_vm7, %v3306_v44, %v1413_v63  ;;  %v1446_v0 = vadd.f32 %v1413_v63, %v1349_v42  ;;  %v1631_v42 = vadd.f32 %v3426_v50, %v3460_v4 }
 0x201   : > { %v1445_v5 = vadd.f32 %v1422_v3, %v1348_v35 }
 0x203   : > { %v1597_v54 = vpop.permute.xlu0 %1596  ;;  %v1500_v43 = vpop.permute.xlu1 %1499 }
 0x207   : > { %v3485_v46 = vpop.permute.xlu0 %1016  ;;  %v1510_v40 = vpop.permute.xlu1 %1509 }
 0x208   : > { %v1031_v47 = vsel %vm1026_vm2, %v1015_v59, %v3485_v46  ;;  %v1519_v55 = vsel %vm1511_vm5, %v3322_v61, %v1510_v40  ;;  %v3491_v22 = vadd.f32 %v1510_v40, %v1446_v0 }
 0x209   : > { %v1053_v44 = vadd.f32 %v1031_v47, %v956_v18  ;;  %v3493_v25 = vadd.f32 %v1519_v55, %v1445_v5 }
 0x20b   : > { %v3495_v37 = vpop.permute.xlu0 %1113  ;;  %v3497_v38 = vpop.permute.xlu1 %1018 }
 0x20c   : > { %v1128_v9 = vsel %vm1123_vm3, %v1112_v39, %v3495_v37 }
 0x20d   : > { %v1150_v2 = vadd.f32 %v1128_v9, %v1053_v44 }
 0x20f   : > { %v3501_v16 = vpop.permute.xlu0 %1210  ;;  %v3503_v31 = vpop.permute.xlu1 %1115 }
 0x210   : > { %v1225_v59 = vsel %vm1220_vm4, %v1209_v53, %v3501_v16 }
 0x211   : > { %v1247_v10 = vadd.f32 %v1225_v59, %v1150_v2 }
 0x213   : > { %v3507_v58 = vpop.permute.xlu0 %1307  ;;  %v3509_v33 = vpop.permute.xlu1 %1212 }
 0x214   : > { %v1322_v45 = vsel %vm1317_vm6, %v1306_v19, %v3507_v58 }
 0x215   : > { %v1344_v8 = vadd.f32 %v1322_v45, %v1247_v10 }
 0x217   : > { %v3513_v1 = vpop.permute.xlu0 %1404  ;;  %v3515_v39 = vpop.permute.xlu1 %1309 }
 0x218   : > { %v1419_v26 = vsel %vm1414_vm7, %v1403_v32, %v3513_v1 }
 0x219   : > { %v1441_v28 = vadd.f32 %v1419_v26, %v1344_v8  ;;  %v958_v8 = vmul.f32 %v3152_v12, %v3232_v30 }
 0x21b   : > { %v3519_v57 = vpop.permute.xlu0 %1501  ;;  %v3521_v49 = vpop.permute.xlu1 %1406  ;;  %v1055_v26 = vadd.f32 %v3497_v38, %v958_v8 }
 0x21c   : > { %v1516_v17 = vsel %vm1511_vm5, %v1500_v43, %v3519_v57 }
 0x21d   : > { %v1538_v20 = vadd.f32 %v1516_v17, %v1441_v28  ;;  %v1152_v17 = vadd.f32 %v3503_v31, %v1055_v26 }
 0x21f   : > { %v3525_v6 = vpop.permute.xlu0 %1600  ;;  %v3527_v27 = vpop.permute.xlu1 %1503 }
 0x223   : > { %v1684_v53 = vpop.permute.xlu0 %1683  ;;  %v3529_v24 = vpop.permute.xlu1 %1598 }
 0x224   : > { %v1613_v14 = vsel %vm1608_vm8, %v1597_v54, %v3529_v24 }
 0x225   : > { %v3533_v62 = vadd.f32 %v1613_v14, %v1538_v20 }
 0x227   : > { %v1688_v41 = vpop.permute.xlu0 %1687  ;;  %v1682_v23 = vpop.permute.xlu1 %1681 }
 0x228   : > { %v1706_v13 = vsel %vm1705_vm9, %v1682_v23, %v1684_v53  ;;  %v957_v23 = vmul.f32 %v3152_v12, %v2990_v15  ;;  %v1226_v15 = vsel %vm1220_vm4, %v3501_v16, %v3509_v33 }
 0x229   : > { %v1726_v51 = vadd.f32 %v1706_v13, %v3359_v7 }
 0x22b   : > { %v1692_v19 = vpop.permute.xlu0 %1691  ;;  %v1762_v35 = vmul.f32 %v3150_v48, %v1726_v51  ;;  %v1686_v63 = vpop.permute.xlu1 %1685 }
 0x22c   : > { %v1731_v3 = vadd.f32 %v1692_v19, %v3422_v56  ;;  %v1707_v0 = vsel %vm1705_vm9, %v1684_v53, %v1686_v63  ;;  %v1728_v32 = vadd.f32 %v1686_v63, %v1631_v42  ;;  %v1249_v53 = vadd.f32 %v3509_v33, %v1152_v17 }
 0x22d   : > { %v3543_v5 = vadd.f32 %v3177_v52, %v1762_v35  ;;  %v1727_v54 = vadd.f32 %v1707_v0, %v3467_v34 }
 0x22e   : > { %v1767_v43 = vmul.f32 %v3162_v11, %v1731_v3  ;;  %v1764_v7 = vmul.f32 %v3150_v48, %v1728_v32  ;;  %v1346_v13 = vadd.f32 %v3515_v39, %v1249_v53 }
 0x22f   : > { %v2335_v50 = vmul.f32 -1.442695, %v3543_v5  ;;  %v1763_v4 = vmul.f32 %v3150_v48, %v1727_v54  ;;  %v1690_v56 = vpop.permute.xlu1 %1689 }
 0x230   : > { %v3551_v18 = vadd.f32 %v3180_v21, %v1767_v43  ;;  %v3554_v40 = vadd.f32 %v3177_v52, %v1764_v7  ;;  %v1708_v47 = vsel %vm1705_vm9, %v1688_v41, %v1690_v56  ;;  %v1709_v55 = vsel %vm1705_vm9, %v1690_v56, %v1692_v19 }
 0x231   : > { %2508 = vpow2.f32 %v2335_v50  ;;  %v3559_v34 = vadd.f32 %v3177_v52, %v1763_v4  ;;  %v1729_v9 = vadd.f32 %v1708_v47, %v3475_v29  ;;  %v1730_v2 = vadd.f32 %v1709_v55, %v3477_v36 }
 0x232   : > { %v2340_v44 = vmul.f32 -1.442695, %v3551_v18  ;;  %v2337_v48 = vmul.f32 -1.442695, %v3554_v40  ;;  %v1129_v19 = vsel %vm1123_vm3, %v3495_v37, %v3503_v31  ;;  %v1443_v0 = vadd.f32 %v3521_v49, %v1346_v13 }
 0x233   : > { %v2336_v59 = vmul.f32 -1.442695, %v3559_v34  ;;  %v1765_v10 = vmul.f32 %v3162_v11, %v1729_v9  ;;  %v1766_v45 = vmul.f32 %v3162_v11, %v1730_v2  ;;  %v1323_v37 = vsel %vm1317_vm6, %v3507_v58, %v3515_v39 }
 0x234   : > { %2510 = vpow2.f32 %v2340_v44  ;;  %v1420_v56 = vsel %vm1414_vm7, %v3513_v1, %v3521_v49  ;;  %v1518_v55 = vsel %vm1511_vm5, %v3200_v60, %v3322_v61  ;;  %v1517_v58 = vsel %vm1511_vm5, %v3519_v57, %v3527_v27  ;;  %v1894_v1 = vld [vmem:[%s3807_s8] sm:$0x7]  ;;  %v3830_v60 = vld [vmem:[#allocation6_spill] sm:$0xff] }
 0x235   : > { %2512 = vpow2.f32 %v2337_v48  ;;  %v3569_v52 = vadd.f32 %v3180_v21, %v1765_v10  ;;  %v3574_v29 = vadd.f32 %v3180_v21, %v1766_v45  ;;  %v1032_v21 = vsel %vm1026_vm2, %v3485_v46, %v3497_v38  ;;  %v3831_v45 = vld [vmem:[#allocation5_spill] sm:$0xff] }
 0x236   : > { %2514 = vpow2.f32 %v2336_v59  ;;  %v1054_v3 = vadd.f32 %v1032_v21, %v957_v23  ;;  %v1540_v38 = vadd.f32 %v3527_v27, %v1443_v0  ;;  %v1614_v49 = vsel %vm1608_vm8, %v3529_v24, %v3525_v6  ;;  %v3832_v27 = vld [vmem:[#allocation3_spill] sm:$0xff] }
 0x237   : > { %v2338_v36 = vmul.f32 -1.442695, %v3569_v52  ;;  %v2339_v28 = vmul.f32 -1.442695, %v3574_v29  ;;  %v1541_v61 = vadd.f32 %v1518_v55, %v3830_v60  ;;  %v3833_v8 = vsub.s32 2, %v3832_v27 }
 0x238   : > { %v1151_v12 = vadd.f32 %v1129_v19, %v1054_v3  ;;  %v1637_v47 = vadd.f32 %v3525_v6, %v1540_v38  ;;  %v3835_v6 = vsub.s32 1, %v3832_v27 }
 0x239   : > { %2516 = vpow2.f32 %v2338_v36  ;;  %v3622_v36 = vrot.slane %v1894_v1, %v3833_v8 }
 0x23a   : > { %2518 = vpow2.f32 %v2339_v28  ;;  %v1248_v7 = vadd.f32 %v1226_v15, %v1151_v12  ;;  %v3632_v24 = vrot.slane %v1894_v1, %v3835_v6 }
 0x23b   : > { %v2509_v11 = vpop.eup %2508 }
 0x23c   : > { %v3580_v20 = vpop.permute.xlu0 %1790  ;;  %v1846_v14 = vadd.f32 1.0, %v2509_v11  ;;  %v1345_v33 = vadd.f32 %v1323_v37, %v1248_v7  ;;  %v3834_v11 = vld [vmem:[#allocation4_spill] sm:$0xff] }
 0x23d   : > { %v3628_v53 = vrot.slane %v1894_v1, %v3834_v11 }
 0x23e   : > { %v2511_v30 = vpop.eup %2510  ;;  %2520 = vrcp.f32 %v1846_v14  ;;  %v1442_v9 = vadd.f32 %v1420_v56, %v1345_v33 }
 0x23f   : > { %v2513_v41 = vpop.eup %2512  ;;  %v1851_v51 = vadd.f32 1.0, %v2511_v30 }
 0x240   : > { %v2515_v42 = vpop.eup %2514  ;;  %v1848_v35 = vadd.f32 1.0, %v2513_v41  ;;  %v1605_v63 = vpop.permute.xlu0 %1604  ;;  %v1539_v10 = vadd.f32 %v1517_v58, %v1442_v9 }
 0x241   : > { %v1847_v32 = vadd.f32 1.0, %v2515_v42  ;;  %2522 = vrcp.f32 %v1851_v51  ;;  %v3593_v46 = vpop.permute.xlu1 %1759 }
 0x242   : > { %2524 = vrcp.f32 %v1848_v35  ;;  %v1636_v30 = vadd.f32 %v1614_v49, %v1539_v10 }
 0x243   : > { %2526 = vrcp.f32 %v1847_v32  ;;  %v2517_v54 = vpop.eup %2516 }
 0x244   : > { %v1694_v31 = vpop.permute.xlu0 %1693  ;;  %v2519_v43 = vpop.eup %2518  ;;  %v1849_v50 = vadd.f32 1.0, %v2517_v54 }
 0x245   : > { %v1603_v4 = vpop.permute.xlu1 %1602  ;;  %v1850_v16 = vadd.f32 1.0, %v2519_v43 }
 0x246   : > { %2528 = vrcp.f32 %v1849_v50  ;;  %v1615_v41 = vsel %vm1608_vm8, %v1603_v4, %v1605_v63 }
 0x247   : > { %2530 = vrcp.f32 %v1850_v16 }
 0x248   : > { %v1698_v39 = vpop.permute.xlu0 %1697  ;;  %v2521_v44 = vpop.eup %2520 }
 0x249   : > { %v1607_v48 = vpop.permute.xlu1 %1606  ;;  %v1734_v2 = vadd.f32 %v1698_v39, %v1637_v47  ;;  %v3625_v28 = vmul.f32 %v2521_v44, %v3543_v5 }
 0x24a   : > { %v1640_v51 = vadd.f32 %v1607_v48, %v3491_v22 }
 0x24b   : > { %v2523_v59 = vpop.eup %2522  ;;  %v1770_v57 = vmul.f32 %v3831_v45, %v1734_v2  ;;  %v1911_v22 = vmul.f32 %v3628_v53, %v3625_v28 }
 0x24c   : > { %v2525_v26 = vpop.eup %2524  ;;  %v1700_v17 = vpop.permute.xlu0 %1699  ;;  %v3652_v32 = vmul.f32 %v2523_v59, %v3551_v18 }
 0x24d   : > { %v2527_v14 = vpop.eup %2526  ;;  %v3635_v21 = vmul.f32 %v2525_v26, %v3554_v40  ;;  %v3639_v23 = vadd.f32 %v3580_v20, %v1770_v57  ;;  %v1696_v5 = vpop.permute.xlu1 %1695 }
 0x24e   : > { %v3642_v13 = vmul.f32 %v2527_v14, %v3559_v34  ;;  %v1710_v42 = vsel %vm1705_vm9, %v1694_v31, %v1696_v5  ;;  %v1711_v19 = vsel %vm1705_vm9, %v1696_v5, %v1698_v39  ;;  %v1616_v34 = vsel %vm1608_vm8, %v1605_v63, %v1607_v48 }
 0x24f   : > { %v2343_v35 = vmul.f32 -1.442695, %v3639_v23  ;;  %v1732_v40 = vadd.f32 %v1710_v42, %v3533_v62  ;;  %v1733_v3 = vadd.f32 %v1711_v19, %v1636_v30  ;;  %v1913_v0 = vmul.f32 %v3622_v36, %v3635_v21 }
 0x250   : > { %v1704_v15 = vpop.permute.xlu0 %1703  ;;  %v1912_v12 = vmul.f32 %v3632_v24, %v3642_v13  ;;  %v2529_v38 = vpop.eup %2528  ;;  %v1638_v63 = vadd.f32 %v1615_v41, %v1541_v61  ;;  %v1639_v47 = vadd.f32 %v1616_v34, %v3493_v25  ;;  %v1916_v58 = vmul.f32 %v3622_v36, %v3652_v32 }
 0x251   : > { %2532 = vpow2.f32 %v2343_v35  ;;  %v1768_v62 = vmul.f32 %v3831_v45, %v1732_v40  ;;  %v1769_v54 = vmul.f32 %v3831_v45, %v1733_v3  ;;  %v1796_v37 = vpop.permute.xlu1 %1795  ;;  %v1737_v31 = vadd.f32 %v1704_v15, %v1640_v51  ;;  %v2531_v43 = vpop.eup %2530 }
 0x252   : > { %v3662_v18 = vmul.f32 %v2529_v38, %v3569_v52  ;;  %v1923_v7 = vadd.f32 %v1912_v12, %v1911_v22  ;;  %v1925_v50 = vsel %vm1924_vm10, %v1913_v0, 0.0  ;;  %v3666_v4 = vmul.f32 %v2531_v43, %v3574_v29 }
 0x253   : > { %v1804_v56 = vadd.f32 %v3580_v20, %v1768_v62  ;;  %v1805_v16 = vadd.f32 %v3580_v20, %v1769_v54  ;;  %v1773_v33 = vmul.f32 %v3593_v46, %v1737_v31  ;;  %v1930_v10 = vsel %vm1924_vm10, %v1916_v58, 0.0 }
 0x254   : > { %v1926_v55 = vadd.f32 %v1925_v50, %v1923_v7  ;;  %v1914_v52 = vmul.f32 %v3628_v53, %v3662_v18  ;;  %v1915_v48 = vmul.f32 %v3632_v24, %v3666_v4 }
 0x255   : > { %v2341_v39 = vmul.f32 -1.442695, %v1804_v56  ;;  %v2342_v44 = vmul.f32 -1.442695, %v1805_v16  ;;  %v1809_v9 = vadd.f32 %v1796_v37, %v1773_v33  ;;  %v1702_v29 = vpop.permute.xlu1 %1701 }
 0x256   : > { %v1712_v20 = vsel %vm1705_vm9, %v1700_v17, %v1702_v29  ;;  %v1713_v2 = vsel %vm1705_vm9, %v1702_v29, %v1704_v15  ;;  %1927 = vadd.xlane.f32.xlu1 %v1926_v55  ;;  %v1929_v59 = vadd.f32 %v1915_v48, %v1914_v52  ;;  %v1949_v48 = vld [vmem:[%s3808_s9 + $0x8] sm:$0xff] }
 0x257   : > { %2534 = vpow2.f32 %v2341_v39  ;;  %v2346_v25 = vmul.f32 -1.442695, %v1809_v9  ;;  %v1735_v1 = vadd.f32 %v1712_v20, %v1638_v63  ;;  %v1736_v49 = vadd.f32 %v1713_v2, %v1639_v47 }
 0x258   : > { %2536 = vpow2.f32 %v2342_v44  ;;  %v1931_v45 = vadd.f32 %v1930_v10, %v1929_v59 }
 0x259   : > { %2538 = vpow2.f32 %v2346_v25  ;;  %v1771_v60 = vmul.f32 %v3593_v46, %v1735_v1  ;;  %v1772_v61 = vmul.f32 %v3593_v46, %v1736_v49 }
 0x25a   : > { %1932 = vadd.xlane.f32.xlu0 %v1931_v45 }
 0x25b   : > { %v2533_v57 = vpop.eup %2532  ;;  %v1807_v27 = vadd.f32 %v1796_v37, %v1771_v60  ;;  %v1808_v8 = vadd.f32 %v1796_v37, %v1772_v61  ;;  %v1951_v60 = vld [vmem:[%s3808_s9 + $0x18] sm:$0xff] }
 0x25c   : > { %v1854_v26 = vadd.f32 1.0, %v2533_v57 }
 0x25d   : > { %v2344_v17 = vmul.f32 -1.442695, %v1807_v27  ;;  %v2345_v6 = vmul.f32 -1.442695, %v1808_v8 }
 0x25e   : > { %2540 = vrcp.f32 %v1854_v26 }
 0x25f   : > { %2542 = vpow2.f32 %v2344_v17 }
 0x260   : > { %2544 = vpow2.f32 %v2345_v6 }
 0x261   : > { %v2535_v14 = vpop.eup %2534 }
 0x262   : > { %v2537_v30 = vpop.eup %2536  ;;  %v1852_v41 = vadd.f32 1.0, %v2535_v14 }
 0x263   : > { %v2539_v5 = vpop.eup %2538  ;;  %v1853_v51 = vadd.f32 1.0, %v2537_v30 }
 0x264   : > { %2546 = vrcp.f32 %v1852_v41  ;;  %v1857_v46 = vadd.f32 1.0, %v2539_v5 }
 0x265   : > { %2548 = vrcp.f32 %v1853_v51 }
 0x266   : > { %2550 = vrcp.f32 %v1857_v46  ;;  %v1970_v46 = vld [vmem:[%s3809_s10] sm:$0x1] }
 0x268   : > { %v2541_v42 = vpop.eup %2540 }
 0x269   : > { %v2543_v19 = vpop.eup %2542  ;;  %v3684_v0 = vmul.f32 %v2541_v42, %v3639_v23 }
 0x26a   : > { %v2545_v35 = vpop.eup %2544  ;;  %v1855_v40 = vadd.f32 1.0, %v2543_v19 }
 0x26b   : > { %v1856_v3 = vadd.f32 1.0, %v2545_v35  ;;  %v1919_v62 = vmul.f32 %v3622_v36, %v3684_v0 }
 0x26c   : > { %2552 = vrcp.f32 %v1855_v40 }
 0x26d   : > { %2554 = vrcp.f32 %v1856_v3  ;;  %v1935_v43 = vsel %vm1924_vm10, %v1919_v62, 0.0  ;;  %v1979_v62 = vld [vmem:[%s3810_s11] sm:$0xff] }
 0x26e   : > { %v2547_v34 = vpop.eup %2546 }
 0x26f   : > { %v2549_v15 = vpop.eup %2548  ;;  %v3686_v22 = vmul.f32 %v2547_v34, %v1804_v56 }
 0x270   : > { %v3688_v12 = vmul.f32 %v2549_v15, %v1805_v16  ;;  %v2551_v54 = vpop.eup %2550 }
 0x271   : > { %v1917_v38 = vmul.f32 %v3628_v53, %v3686_v22  ;;  %v3696_v23 = vmul.f32 %v2551_v54, %v1809_v9 }
 0x272   : > { %v1918_v37 = vmul.f32 %v3632_v24, %v3688_v12 }
 0x273   : > { %v1922_v47 = vmul.f32 %v3622_v36, %v3696_v23  ;;  %v1948_v36 = vld [vmem:[%s3808_s9] sm:$0xff] }
 0x274   : > { %v1934_v31 = vadd.f32 %v1918_v37, %v1917_v38  ;;  %v1980_v38 = vld [vmem:[%s3810_s11 + $0x8] sm:$0xff]  ;;  %v1982_v37 = vld [vmem:[%s3810_s11 + $0x18] sm:$0xff] }
 0x275   : > { %v1940_v58 = vsel %vm1924_vm10, %v1922_v47, 0.0 }
 0x276   : > { %v2553_v63 = vpop.eup %2552  ;;  %v1936_v7 = vadd.f32 %v1935_v43, %v1934_v31  ;;  %v1981_v31 = vld [vmem:[%s3810_s11 + $0x10] sm:$0xff] }
 0x277   : > { %v2555_v50 = vpop.eup %2554  ;;  %v3699_v56 = vmul.f32 %v2553_v63, %v1807_v27 }
 0x278   : > { %v3701_v16 = vmul.f32 %v2555_v50, %v1808_v8  ;;  %1937 = vadd.xlane.f32.xlu0 %v1936_v7 }
 0x279   : > { %v1920_v33 = vmul.f32 %v3628_v53, %v3699_v56 }
 0x27a   : > { %v1921_v55 = vmul.f32 %v3632_v24, %v3701_v16  ;;  %v1950_v24 = vld [vmem:[%s3808_s9 + $0x10] sm:$0xff] }
 0x27c   : > { %v1939_v52 = vadd.f32 %v1921_v55, %v1920_v33 }
 0x27e   : > { %v1941_v39 = vadd.f32 %v1940_v58, %v1939_v52  ;;  %v2004_v52 = vld [vmem:[%s3811_s12 + $0x8] sm:$0xff]  ;;  %v2003_v58 = vld [vmem:[%s3811_s12] sm:$0xff] }
 0x280   : > { %1942 = vadd.xlane.f32.xlu1 %v1941_v39 }
 0x2e3   : > { %v1928_v9 = vpop.xlane.xlu1 %1927 }
 0x2e4   : > { %v1944_v53 = vmul.f32 0.00390625, %v1928_v9 }
 0x2e6   : > { %v1952_v1 = vmul.f32 %v1948_v36, %v1944_v53 }
 0x2e7   : > { %v1933_v44 = vpop.xlane.xlu0 %1932 }
 0x2e8   : > { %v1945_v29 = vmul.f32 0.00390625, %v1933_v44  ;;  %v1957_v10 = vsel %vm1956_vm11, %v1952_v1, 0.0 }
 0x2ea   : > { %v1953_v25 = vmul.f32 %v1949_v48, %v1945_v29  ;;  %v2006_v48 = vld [vmem:[%s3811_s12 + $0x18] sm:$0xff] }
 0x2ec   : > { %v1958_v59 = vsel %vm1956_vm11, %v1953_v25, 0.0 }
 0x2ed   : > { %v1959_v27 = vadd.f32 %v1958_v59, %v1957_v10 }
 0x305   : > { %v1938_v20 = vpop.xlane.xlu0 %1937 }
 0x306   : > { %v1946_v2 = vmul.f32 0.00390625, %v1938_v20  ;;  %v2005_v20 = vld [vmem:[%s3811_s12 + $0x10] sm:$0xff] }
 0x308   : > { %v1954_v49 = vmul.f32 %v1950_v24, %v1946_v2 }
 0x30a   : > { %v1960_v45 = vsel %vm1956_vm11, %v1954_v49, 0.0 }
 0x30b   : > { %v1961_v26 = vadd.f32 %v1960_v45, %v1959_v27 }
 0x30d   : > { %v1943_v61 = vpop.xlane.xlu1 %1942 }
 0x30e   : > { %v1947_v57 = vmul.f32 0.00390625, %v1943_v61 }
 0x310   : > { %v1955_v8 = vmul.f32 %v1951_v60, %v1947_v57 }
 0x312   : > { %v1962_v17 = vsel %vm1956_vm11, %v1955_v8, 0.0 }
 0x313   : > { %v1963_v6 = vadd.f32 %v1962_v17, %v1961_v26 }
 0x315   : > { %v1964_v14 = vrot.slane %v1963_v6, 4 }
 0x317   : > { %v1965_v30 = vadd.f32 %v1964_v14, %v1963_v6 }
 0x319   : > { %v1966_v41 = vrot.slane %v1965_v30, 2 }
 0x31b   : > { %v1967_v5 = vadd.f32 %v1966_v41, %v1965_v30  ;;  %v2602_v41 = vmov 0.0|0.0  }
 0x31c   : > { %2393 = vmatprep.subr.bf16.mxu0 %v2602_v41 }
 0x31d   : > { %v1968_v51 = vrot.slane %v1967_v5, 1 }
 0x31f   : > { %v1969_v42 = vadd.f32 %v1968_v51, %v1967_v5  ;;  %v2221_v5 = vld [vmem:[%s3814_s15] sm:$0xff] }
 0x320   : > { %v2212_v51 = vld [vmem:[%s3813_s14] sm:$0xff] }
 0x321   : > { %v1971_v19 = vadd.f32 %v1970_v46, %v1969_v42  ;;  %v3836_v46 = vmov 0.0   ;;  %v2230_v42 = vld [vmem:[%s2718_s0] sm:$0xff] }
 0x322   : > { %2382 = vmatprep.mubr.msk.f32.mxu0 %vm2603_vm12, %v3836_v46 }
 0x323   : > { %v2347_v35 = vmul.f32 -1.442695, %v1971_v19 }
 0x325   : > { %2556 = vpow2.f32 %v2347_v35  ;;  %v2232_v35 = vld [vmem:[%s2718_s0 + $0x10] sm:$0xff] }
 0x32f   : > { %v2557_v40 = vpop.eup %2556 }
 0x330   : > { %v1975_v3 = vadd.f32 1.0, %v2557_v40 }
 0x332   : > { %2558 = vrcp.f32 %v1975_v3 }
 0x33c   : > { %v2559_v34 = vpop.eup %2558 }
 0x33d   : > { %v1978_v15 = vmul.f32 %v2559_v34, %v1971_v19  ;;  %v2231_v19 = vld [vmem:[%s2718_s0 + $0x8] sm:$0xff] }
 0x33f   : > { %v1986_v54 = vrot.slane %v1978_v15, %v3834_v11 }
 0x341   : > { %v1988_v43 = vmul.f32 %v1986_v54, %v1980_v38  ;;  %v1987_v63 = vmul.f32 %v1986_v54, %v1979_v62  ;;  %v1990_v33 = vmul.f32 %v1986_v54, %v1982_v37  ;;  %v1989_v47 = vmul.f32 %v1986_v54, %v1981_v31 }
 0x343   : > { %v1994_v7 = vsel %vm1956_vm11, %v1988_v43, 0.0  ;;  %v1991_v50 = vsel %vm1956_vm11, %v1987_v63, 0.0  ;;  %v2000_v11 = vsel %vm1956_vm11, %v1990_v33, 0.0  ;;  %v1997_v55 = vsel %vm1956_vm11, %v1989_v47, 0.0 }
 0x344   : > { %1995 = vadd.xlane.f32.xlu1 %v1994_v7  ;;  %1992 = vadd.xlane.f32.xlu0 %v1991_v50 }
 0x348   : > { %2001 = vadd.xlane.f32.xlu1 %v2000_v11  ;;  %1998 = vadd.xlane.f32.xlu0 %v1997_v55 }
 0x3d1   : > { %v1996_v39 = vpop.xlane.xlu1 %1995  ;;  %v1993_v44 = vpop.xlane.xlu0 %1992 }
 0x3d2   : > { %v2008_v9 = vadd.f32 %v2004_v52, %v1996_v39  ;;  %v2007_v29 = vadd.f32 %v2003_v58, %v1993_v44 }
 0x3d4   : > { %v2349_v53 = vmul.f32 -1.442695, %v2008_v9  ;;  %v2348_v2 = vmul.f32 -1.442695, %v2007_v29 }
 0x3d5   : > { %v2002_v36 = vpop.xlane.xlu1 %2001  ;;  %v1999_v24 = vpop.xlane.xlu0 %1998 }
 0x3d6   : > { %2560 = vpow2.f32 %v2349_v53  ;;  %v2010_v25 = vadd.f32 %v2006_v48, %v2002_v36  ;;  %v2009_v1 = vadd.f32 %v2005_v20, %v1999_v24 }
 0x3d7   : > { %2562 = vpow2.f32 %v2348_v2 }
 0x3d8   : > { %v2351_v49 = vmul.f32 -1.442695, %v2010_v25  ;;  %v2350_v59 = vmul.f32 -1.442695, %v2009_v1 }
 0x3da   : > { %2564 = vpow2.f32 %v2351_v49 }
 0x3db   : > { %2566 = vpow2.f32 %v2350_v59 }
 0x3e0   : > { %v2561_v60 = vpop.eup %2560 }
 0x3e1   : > { %v2563_v61 = vpop.eup %2562  ;;  %v2024_v10 = vadd.f32 1.0, %v2561_v60 }
 0x3e2   : > { %v2023_v45 = vadd.f32 1.0, %v2563_v61 }
 0x3e3   : > { %2568 = vrcp.f32 %v2024_v10 }
 0x3e4   : > { %v2565_v57 = vpop.eup %2564  ;;  %2570 = vrcp.f32 %v2023_v45 }
 0x3e5   : > { %v2567_v27 = vpop.eup %2566  ;;  %v2026_v8 = vadd.f32 1.0, %v2565_v57 }
 0x3e6   : > { %v2025_v26 = vadd.f32 1.0, %v2567_v27 }
 0x3e7   : > { %2572 = vrcp.f32 %v2026_v8 }
 0x3e8   : > { %2574 = vrcp.f32 %v2025_v26 }
 0x3ed   : > { %v2569_v17 = vpop.eup %2568 }
 0x3ee   : > { %v2571_v6 = vpop.eup %2570  ;;  %2042 = vperm.xlu1 %2459, %v2569_v17  }
 0x3ef   : > { %2037 = vperm.xlu0 %2457, %v2571_v6  }
 0x3f1   : > { %v2573_v14 = vpop.eup %2572 }
 0x3f2   : > { %v2575_v30 = vpop.eup %2574 }
 0x3f3   : > { %2052 = vperm.xlu0 %2457, %v2573_v14   ;;  %2047 = vperm.xlu1 %2459, %v2575_v30  }
 0x3f7   : > { %2224 = vperm.xlu0 %2457, %v2221_v5   ;;  %2215 = vperm.xlu1 %2459, %v2212_v51  }
 0x3fb   : > { %2236 = vrot.lane.b32.xlu1 %v2230_v42, %s2598_s17  ;;  %2238 = vrot.lane.b32.xlu0 %v2231_v19, %s2598_s17 }
 0x3ff   : > { %2240 = vrot.lane.b32.xlu1 %v2232_v35, %s2598_s17 }
 0x46d   : > { %v2043_v40 = vpop.permute.xlu1 %2042 }
 0x46e   : > { %v2058_v3 = vmul.f32 %v2043_v40, %v3662_v18  ;;  %v2059_v34 = vmul.f32 %v2043_v40, %v3666_v4  ;;  %v2060_v15 = vmul.f32 %v2043_v40, %v3652_v32  ;;  %v2038_v38 = vpop.permute.xlu0 %2037 }
 0x46f   : > { %v2055_v62 = vmul.f32 %v2038_v38, %v3625_v28  ;;  %v2056_v54 = vmul.f32 %v2038_v38, %v3642_v13  ;;  %v2057_v37 = vmul.f32 %v2038_v38, %v3635_v21 }
 0x471   : > { %v2387_v31 = vpack.c.bf16 %v2058_v3, %v2055_v62  ;;  %v2394_v43 = vpack.c.bf16 %v2060_v15, %v2057_v37  ;;  %v2385_v63 = vpack.c.bf16 %v2059_v34, %v2056_v54 }
 0x472   : > { %v2048_v7 = vpop.permute.xlu1 %2047  ;;  %v2053_v50 = vpop.permute.xlu0 %2052 }
 0x473   : > { %v2061_v33 = vmul.f32 %v2048_v7, %v3686_v22  ;;  %v2062_v18 = vmul.f32 %v2048_v7, %v3688_v12  ;;  %v2063_v4 = vmul.f32 %v2048_v7, %v3684_v0  ;;  %v2064_v32 = vmul.f32 %v2053_v50, %v3699_v56  ;;  %2386 = vmatprep.subr.bf16.mxu1 %v2385_v63  ;;  %v2067_v22 = vld [vmem:[%s3812_s13] sm:$0xff] }
 0x474   : > { %v2065_v28 = vmul.f32 %v2053_v50, %v3701_v16  ;;  %v2066_v13 = vmul.f32 %v2053_v50, %v3696_v23  ;;  %2395 = vmatpush3.bf16.msra.mxu0 %v2394_v43  ;;  %2388 = vmatpush1.bf16.msra.mxu1 %v2387_v31 }
 0x475   : > { %v2391_v21 = vpack.c.bf16 %v2064_v32, %v2061_v33  ;;  %2396 = vmatprep.subr.bf16.mxu0 %v2602_v41 }
 0x476   : > { %v2397_v47 = vpack.c.bf16 %v2066_v13, %v2063_v4  ;;  %v2389_v11 = vpack.c.bf16 %v2065_v28, %v2062_v18  ;;  %v2216_v0 = vpop.permute.xlu1 %2215  ;;  %v2225_v23 = vpop.permute.xlu0 %2224 }
 0x478   : > { %2390 = vmatprep.subr.bf16.mxu1 %v2389_v11  ;;  %2398 = vmatpush3.bf16.msra.mxu0 %v2397_v47 }
 0x479   : > { %2392 = vmatpush1.bf16.msra.mxu1 %v2391_v21 }
 0x47a   : > { %v2237_v12 = vpop.permute.xlu1 %2236  ;;  %v2239_v9 = vpop.permute.xlu0 %2238 }
 0x47b   : > { %2383 = vmatmul.mubr.msk.f32.vlgmr.msra.gmra.mrb[6].mxu0 %vm1924_vm10, %v2067_v22  ;;  %v2242_v24 = vsel %vm1317_vm6, %v2237_v12, %v2239_v9 }
 0x47c   : > { %2352 = vmatmul.mubr.msk.f32.vlgmr.msra.gmra.mrb[6].mxu1 %vm1924_vm10, %v2067_v22 }
 0x47e   : > { %v2241_v16 = vpop.permute.xlu1 %2240 }
 0x47f   : > { %v2243_v53 = vsel %vm1317_vm6, %v2239_v9, %v2241_v16 }
 0x54e   : > { %v2208_v56 = vpop.f32.mrb[6].mxu0 }
 0x54f   : > { %v2220_v55 = vmul.f32 %v2216_v0, %v2208_v56  ;;  %v2137_v52 = vpop.f32.mrb[6].mxu1  ;;  %v2384_v58 = vpop.f32.mrb[7].mxu0 }
 0x550   : > { %v2218_v39 = vmul.f32 %v2216_v0, %v2137_v52  ;;  %v2139_v44 = vpop.f32.mrb[7].mxu1 }
 0x551   : > { %v2219_v29 = vmul.f32 %v2216_v0, %v2139_v44  ;;  %v2229_v48 = vadd.f32 %v2225_v23, %v2220_v55 }
 0x552   : > { %v2227_v20 = vadd.f32 %v2225_v23, %v2218_v39 }
 0x553   : > { %v2228_v2 = vadd.f32 %v2225_v23, %v2219_v29  ;;  %v2249_v36 = vadd.f32 %v2241_v16, %v2229_v48 }
 0x554   : > { %v2247_v25 = vadd.f32 %v2242_v24, %v2227_v20 }
 0x555   : > { %2252 = vst.msk [vmem:[%s521_s23 + $0x10] sm:$0xff] %vm1924_vm10, %v2249_v36  ;;  %v2248_v1 = vadd.f32 %v2243_v53, %v2228_v2 }
 0x556   : > { %2250 = vst [vmem:[%s521_s23] sm:$0xff] %v2247_v25 }
 0x557   : > { %2251 = vst [vmem:[%s521_s23 + $0x8] sm:$0xff] %v2248_v1 }
 0x558 PF: > { %s26_s21 = sadd.s32 1, %s2582_s21  }
 0x559   : > { %p23_p4 = scmp.ge.s32.totalorder %s26_s21, 4  }
 0x55b   :  { %25 = sbr.rel (!%p23_p4) target bundleno = 2 (0x2), region = 114 }

</bundles_post_ra>
